<compile_context>
chip_gen: v6e
topology: v6e:2x2x1
jax: 0.10.0
libtpu: 0.0.40
codegen_flags: <defaults>
</compile_context>

<pallas_src>
import functools

import numpy as np
import jax
import jax.numpy as jnp
from jax.experimental import pallas as pl
from jax.experimental.pallas import tpu as pltpu

EPS = 1e-5
NEG = -1e30


# --------------------------- host-side constants ---------------------------- #

def _conv_len(L, K, stride, pad):
    return (L + 2 * pad - K) // stride + 1


def _gather_stack(B, Lin, Lout, K, stride, pad):
    """G[k] @ x_rows gathers tap-k rows (row b*Lin + j*stride + k - pad) of a
    flattened (B*Lin, C) activation; out-of-range (padding) rows are all-zero.
    Also returns an additive mask (0 valid / -1e30 pad) for max pooling."""
    G = np.zeros((K, B * Lout, B * Lin), np.float32)
    M = np.full((K, B * Lout, 1), NEG, np.float32)
    for k in range(K):
        for b in range(B):
            for j in range(Lout):
                s = j * stride + k - pad
                if 0 <= s < Lin:
                    G[k, b * Lout + j, b * Lin + s] = 1.0
                    M[k, b * Lout + j, 0] = 0.0
    return jnp.asarray(G), jnp.asarray(M)


def prepare_kernel_params(params, B, L):
    """One-time transform of PyTorch-layout params into the kernel's pytree."""
    def conv_w(w):                      # (Cout, Cin, K) -> (K, Cin, Cout)
        return jnp.transpose(w, (2, 1, 0)).astype(jnp.float32)

    def bn_p(bn):
        g, b = bn
        return (g.reshape(1, -1).astype(jnp.float32),
                b.reshape(1, -1).astype(jnp.float32))

    kp = {}
    # stem: Conv1d(1, W, k=7, s=2, p=3) + BN + ReLU
    l_stem = _conv_len(L, 7, 2, 3)
    gamma, beta = bn_p(params["stem_bn"])
    kp["stem"] = {"w": conv_w(params["stem_conv"]),
                  "g": _gather_stack(B, L, l_stem, 7, 2, 3)[0],
                  "gamma": gamma, "beta": beta}
    # MaxPool1d(k=3, s=2, p=1)
    l_pool = _conv_len(l_stem, 3, 2, 1)
    g_pool, m_pool = _gather_stack(B, l_stem, l_pool, 3, 2, 1)
    kp["pool"] = {"g": g_pool, "m": m_pool}

    cur = l_pool
    blocks = []
    for blk in params["blocks"]:
        s = blk["stride"]
        l_out = _conv_len(cur, 3, s, 1)
        e = {"w1": conv_w(blk["conv1"]),
             "g1": _gather_stack(B, cur, l_out, 3, s, 1)[0],
             "w2": conv_w(blk["conv2"]),
             "g2": _gather_stack(B, l_out, l_out, 3, 1, 1)[0]}
        e["gamma1"], e["beta1"] = bn_p(blk["bn1"])
        e["gamma2"], e["beta2"] = bn_p(blk["bn2"])
        if "down_conv" in blk:
            e["wd"] = conv_w(blk["down_conv"])
            e["gd"] = _gather_stack(B, cur, _conv_len(cur, 1, s, 0), 1, s, 0)[0]
            e["gammad"], e["betad"] = bn_p(blk["down_bn"])
        blocks.append(e)
        cur = l_out
    kp["blocks"] = blocks

    # heads: AdaptiveAvgPool1d(1) as a (B, B*cur) averaging matmul + Linear(C,2)
    C = params["mlp1_w"].shape[1]
    P = np.zeros((B, B * cur), np.float32)
    for b in range(B):
        P[b, b * cur:(b + 1) * cur] = 1.0 / cur
    kp["head"] = {
        "p": jnp.asarray(P),
        "w": jnp.concatenate([params["mlp1_w"].reshape(C, 1),
                              params["mlp2_w"].reshape(C, 1)], axis=1),
        "b": jnp.concatenate([params["mlp1_b"], params["mlp2_b"]]).reshape(1, 2),
    }
    return kp


# ------------------------------ fused kernel -------------------------------- #

def _fused_kernel(treedef, n_params, x_ref, *refs):
    o1_ref, o2_ref = refs[n_params], refs[n_params + 1]
    kp = jax.tree_util.tree_unflatten(treedef, refs[:n_params])

    def conv(x, w_ref, g_ref):
        # K-tap Conv1d: per tap, (rows, Cin) @ (Cin, Cout) on the MXU, then a
        # 0/1 row-gather matmul that applies shift / zero-padding / stride.
        acc = None
        for k in range(w_ref.shape[0]):
            h = jnp.dot(x, w_ref[k], preferred_element_type=jnp.float32)
            t = jnp.dot(g_ref[k], h, preferred_element_type=jnp.float32)
            acc = t if acc is None else acc + t
        return acc

    def bn(y, gamma_ref, beta_ref, relu):
        # training-mode BatchNorm1d over all N*L rows; stats via ones-row
        # matmuls (MXU) instead of cross-sublane reductions; f32 throughout.
        rows = y.shape[0]
        ones = jnp.full((1, rows), 1.0 / rows, jnp.float32)
        mean = jnp.dot(ones, y, preferred_element_type=jnp.float32)
        yc = y - mean
        var = jnp.dot(ones, yc * yc, preferred_element_type=jnp.float32)
        out = yc * jax.lax.rsqrt(var + EPS) * gamma_ref[...] + beta_ref[...]
        return jnp.maximum(out, 0.0) if relu else out

    # stem
    st = kp["stem"]
    x = bn(conv(x_ref[...], st["w"], st["g"]), st["gamma"], st["beta"], True)

    # MaxPool1d(3, 2, 1): three gathered taps + elementwise max (pad -> -inf)
    pool = kp["pool"]
    m = None
    for k in range(pool["g"].shape[0]):
        t = jnp.dot(pool["g"][k], x, preferred_element_type=jnp.float32) + pool["m"][k]
        m = t if m is None else jnp.maximum(m, t)
    x = m

    # residual blocks
    for blk in kp["blocks"]:
        if "wd" in blk:
            idn = bn(conv(x, blk["wd"], blk["gd"]), blk["gammad"], blk["betad"], False)
        else:
            idn = x
        r = bn(conv(x, blk["w1"], blk["g1"]), blk["gamma1"], blk["beta1"], True)
        r = bn(conv(r, blk["w2"], blk["g2"]), blk["gamma2"], blk["beta2"], False)
        x = jnp.maximum(r + idn, 0.0)

    # heads: avg-pool (matmul) + fused 2-wide Linear
    hd = kp["head"]
    pooled = jnp.dot(hd["p"][...], x, preferred_element_type=jnp.float32)
    out = jnp.dot(pooled, hd["w"][...], preferred_element_type=jnp.float32) + hd["b"][...]
    o1_ref[...] = out[:, 0:1]
    o2_ref[...] = out[:, 1:2]


@jax.jit
def bpnet_forward(kp, ppg_x):
    """ppg_x: (B, 1, L) PyTorch NCL layout -> (out1, out2), each (B, 1)."""
    B, _, L = ppg_x.shape
    x2 = ppg_x.reshape(B * L, 1).astype(jnp.float32)      # C_in == 1: layout-free
    leaves, treedef = jax.tree_util.tree_flatten(kp)
    vmem = pl.BlockSpec(memory_space=pltpu.MemorySpace.VMEM)
    o1, o2 = pl.pallas_call(
        functools.partial(_fused_kernel, treedef, len(leaves)),
        out_shape=(jax.ShapeDtypeStruct((B, 1), jnp.float32),
                   jax.ShapeDtypeStruct((B, 1), jnp.float32)),
        in_specs=[vmem] * (1 + len(leaves)),
        out_specs=(vmem, vmem),
    )(x2, *leaves)
    return o1, o2


# --------------------------- parameter creation ----------------------------- #

def _init_conv(key, c_out, c_in, k):
    return 0.1 * jax.random.normal(key, (c_out, c_in, k), jnp.float32)


def _init_bn(key, c):
    k1, k2 = jax.random.split(key)
    gamma = 1.0 + 0.1 * jax.random.normal(k1, (c,), jnp.float32)
    beta = 0.1 * jax.random.normal(k2, (c,), jnp.float32)
    return gamma, beta


def init_bpnet_params(key, model_width, layer_dims):
    keys = iter(jax.random.split(key, 256))
    params = {
        "stem_conv": _init_conv(next(keys), model_width, 1, 7),
        "stem_bn": _init_bn(next(keys), model_width),
    }
    in_ch = model_width
    blocks = []
    for mult, n_blocks, stride0 in zip([1, 2, 4, 8], layer_dims, [1, 2, 2, 2]):
        out_ch = model_width * mult
        for s in [stride0] + [1] * (n_blocks - 1):
            blk = {
                "stride": s,
                "conv1": _init_conv(next(keys), out_ch, in_ch, 3),
                "bn1": _init_bn(next(keys), out_ch),
                "conv2": _init_conv(next(keys), out_ch, out_ch, 3),
                "bn2": _init_bn(next(keys), out_ch),
            }
            if s != 1 or in_ch != out_ch:
                blk["down_conv"] = _init_conv(next(keys), out_ch, in_ch, 1)
                blk["down_bn"] = _init_bn(next(keys), out_ch)
            blocks.append(blk)
            in_ch = out_ch
    params["blocks"] = blocks
    C = model_width * 8
    params["mlp1_w"] = 0.1 * jax.random.normal(next(keys), (1, C), jnp.float32)
    params["mlp1_b"] = 0.1 * jax.random.normal(next(keys), (1,), jnp.float32)
    params["mlp2_w"] = 0.1 * jax.random.normal(next(keys), (1, C), jnp.float32)
    params["mlp2_b"] = 0.1 * jax.random.normal(next(keys), (1,), jnp.float32)
    return params


# ---------------------------------- main ------------------------------------ #

if __name__ == "__main__":
    key = jax.random.PRNGKey(0)
    pkey, xkey = jax.random.split(key)

    model_width, layer_dims, ratio = 8, [1, 1, 1, 1], 16   # ratio unused (as in torch)
    params = init_bpnet_params(pkey, model_width, layer_dims)

    B, L = 2, 64
    kp = prepare_kernel_params(params, B, L)               # one-time host prep
    ppg_x = jax.random.normal(xkey, (B, 1, L), jnp.float32)  # (B, C=1, L)

    out1, out2 = bpnet_forward(kp, ppg_x)
    jax.block_until_ready((out1, out2))
    assert out1.shape == (B, 1) and out2.shape == (B, 1)
    assert out1.dtype == jnp.float32 and out2.dtype == jnp.float32
    print("KERNEL_OK")
</pallas_src>

<mosaic_0001>
module attributes {stable_mosaic.version = 11 : i64} {
  func.func @_fused_kernel(%arg0: memref<128x1xf32, #tpu.memory_space<vmem>>, %arg1: memref<1x8xf32, #tpu.memory_space<vmem>>, %arg2: memref<1x8xf32, #tpu.memory_space<vmem>>, %arg3: memref<3x32x32xf32, #tpu.memory_space<vmem>>, %arg4: memref<3x32x32xf32, #tpu.memory_space<vmem>>, %arg5: memref<1x8xf32, #tpu.memory_space<vmem>>, %arg6: memref<1x8xf32, #tpu.memory_space<vmem>>, %arg7: memref<3x8x8xf32, #tpu.memory_space<vmem>>, %arg8: memref<3x8x8xf32, #tpu.memory_space<vmem>>, %arg9: memref<1x16xf32, #tpu.memory_space<vmem>>, %arg10: memref<1x16xf32, #tpu.memory_space<vmem>>, %arg11: memref<1x16xf32, #tpu.memory_space<vmem>>, %arg12: memref<3x16x32xf32, #tpu.memory_space<vmem>>, %arg13: memref<3x16x16xf32, #tpu.memory_space<vmem>>, %arg14: memref<1x16xf32, #tpu.memory_space<vmem>>, %arg15: memref<1x16xf32, #tpu.memory_space<vmem>>, %arg16: memref<1x16xf32, #tpu.memory_space<vmem>>, %arg17: memref<1x16x32xf32, #tpu.memory_space<vmem>>, %arg18: memref<3x8x16xf32, #tpu.memory_space<vmem>>, %arg19: memref<3x16x16xf32, #tpu.memory_space<vmem>>, %arg20: memref<1x8x16xf32, #tpu.memory_space<vmem>>, %arg21: memref<1x32xf32, #tpu.memory_space<vmem>>, %arg22: memref<1x32xf32, #tpu.memory_space<vmem>>, %arg23: memref<1x32xf32, #tpu.memory_space<vmem>>, %arg24: memref<3x8x16xf32, #tpu.memory_space<vmem>>, %arg25: memref<3x8x8xf32, #tpu.memory_space<vmem>>, %arg26: memref<1x32xf32, #tpu.memory_space<vmem>>, %arg27: memref<1x32xf32, #tpu.memory_space<vmem>>, %arg28: memref<1x32xf32, #tpu.memory_space<vmem>>, %arg29: memref<1x8x16xf32, #tpu.memory_space<vmem>>, %arg30: memref<3x16x32xf32, #tpu.memory_space<vmem>>, %arg31: memref<3x32x32xf32, #tpu.memory_space<vmem>>, %arg32: memref<1x16x32xf32, #tpu.memory_space<vmem>>, %arg33: memref<1x64xf32, #tpu.memory_space<vmem>>, %arg34: memref<1x64xf32, #tpu.memory_space<vmem>>, %arg35: memref<1x64xf32, #tpu.memory_space<vmem>>, %arg36: memref<3x4x8xf32, #tpu.memory_space<vmem>>, %arg37: memref<3x4x4xf32, #tpu.memory_space<vmem>>, %arg38: memref<1x64xf32, #tpu.memory_space<vmem>>, %arg39: memref<1x64xf32, #tpu.memory_space<vmem>>, %arg40: memref<1x64xf32, #tpu.memory_space<vmem>>, %arg41: memref<1x4x8xf32, #tpu.memory_space<vmem>>, %arg42: memref<3x32x64xf32, #tpu.memory_space<vmem>>, %arg43: memref<3x64x64xf32, #tpu.memory_space<vmem>>, %arg44: memref<1x32x64xf32, #tpu.memory_space<vmem>>, %arg45: memref<1x2xf32, #tpu.memory_space<vmem>>, %arg46: memref<2x4xf32, #tpu.memory_space<vmem>>, %arg47: memref<64x2xf32, #tpu.memory_space<vmem>>, %arg48: memref<3x32x64xf32, #tpu.memory_space<vmem>>, %arg49: memref<3x32x1xf32, #tpu.memory_space<vmem>>, %arg50: memref<1x8xf32, #tpu.memory_space<vmem>>, %arg51: memref<7x64x128xf32, #tpu.memory_space<vmem>>, %arg52: memref<1x8xf32, #tpu.memory_space<vmem>>, %arg53: memref<7x1x8xf32, #tpu.memory_space<vmem>>, %arg54: memref<2x1xf32, #tpu.memory_space<vmem>>, %arg55: memref<2x1xf32, #tpu.memory_space<vmem>>) attributes {dimension_semantics = [], scalar_prefetch = 0 : i64, scratch_operands = 0 : i64, tpu.core_type = #tpu.core_type<tc>} {
    %c0 = arith.constant 0 : index
    %c0_0 = arith.constant 0 : index
    %0 = vector.load %arg0[%c0, %c0_0] : memref<128x1xf32, #tpu.memory_space<vmem>>, vector<128x1xf32>
    %c0_1 = arith.constant 0 : index
    %c0_2 = arith.constant 0 : index
    %c0_3 = arith.constant 0 : index
    %1 = vector.load %arg53[%c0_1, %c0_2, %c0_3] : memref<7x1x8xf32, #tpu.memory_space<vmem>>, vector<1x1x8xf32>
    %2 = vector.shape_cast %1 : vector<1x1x8xf32> to vector<1x8xf32>
    %cst = arith.constant dense<0.000000e+00> : vector<128x8xf32>
    %3 = tpu.matmul %0, %2, %cst {dimension_numbers = #tpu.dot_dimension_numbers<[1], [0], [0], [1], [0, 0, 1, 1], [], []>} : vector<128x1xf32>, vector<1x8xf32>, vector<128x8xf32> -> vector<128x8xf32>
    %c0_4 = arith.constant 0 : index
    %c0_5 = arith.constant 0 : index
    %c0_6 = arith.constant 0 : index
    %4 = vector.load %arg51[%c0_4, %c0_5, %c0_6] : memref<7x64x128xf32, #tpu.memory_space<vmem>>, vector<1x64x128xf32>
    %5 = vector.shape_cast %4 : vector<1x64x128xf32> to vector<64x128xf32>
    %cst_7 = arith.constant dense<0.000000e+00> : vector<64x8xf32>
    %6 = tpu.matmul %5, %3, %cst_7 {dimension_numbers = #tpu.dot_dimension_numbers<[1], [0], [0], [1], [0, 0, 1, 1], [], []>} : vector<64x128xf32>, vector<128x8xf32>, vector<64x8xf32> -> vector<64x8xf32>
    %c1 = arith.constant 1 : index
    %c0_8 = arith.constant 0 : index
    %c0_9 = arith.constant 0 : index
    %7 = vector.load %arg53[%c1, %c0_8, %c0_9] : memref<7x1x8xf32, #tpu.memory_space<vmem>>, vector<1x1x8xf32>
    %8 = vector.shape_cast %7 : vector<1x1x8xf32> to vector<1x8xf32>
    %cst_10 = arith.constant dense<0.000000e+00> : vector<128x8xf32>
    %9 = tpu.matmul %0, %8, %cst_10 {dimension_numbers = #tpu.dot_dimension_numbers<[1], [0], [0], [1], [0, 0, 1, 1], [], []>} : vector<128x1xf32>, vector<1x8xf32>, vector<128x8xf32> -> vector<128x8xf32>
    %c1_11 = arith.constant 1 : index
    %c0_12 = arith.constant 0 : index
    %c0_13 = arith.constant 0 : index
    %10 = vector.load %arg51[%c1_11, %c0_12, %c0_13] : memref<7x64x128xf32, #tpu.memory_space<vmem>>, vector<1x64x128xf32>
    %11 = vector.shape_cast %10 : vector<1x64x128xf32> to vector<64x128xf32>
    %cst_14 = arith.constant dense<0.000000e+00> : vector<64x8xf32>
    %12 = tpu.matmul %11, %9, %cst_14 {dimension_numbers = #tpu.dot_dimension_numbers<[1], [0], [0], [1], [0, 0, 1, 1], [], []>} : vector<64x128xf32>, vector<128x8xf32>, vector<64x8xf32> -> vector<64x8xf32>
    %13 = arith.addf %6, %12 : vector<64x8xf32>
    %c2 = arith.constant 2 : index
    %c0_15 = arith.constant 0 : index
    %c0_16 = arith.constant 0 : index
    %14 = vector.load %arg53[%c2, %c0_15, %c0_16] : memref<7x1x8xf32, #tpu.memory_space<vmem>>, vector<1x1x8xf32>
    %15 = vector.shape_cast %14 : vector<1x1x8xf32> to vector<1x8xf32>
    %cst_17 = arith.constant dense<0.000000e+00> : vector<128x8xf32>
    %16 = tpu.matmul %0, %15, %cst_17 {dimension_numbers = #tpu.dot_dimension_numbers<[1], [0], [0], [1], [0, 0, 1, 1], [], []>} : vector<128x1xf32>, vector<1x8xf32>, vector<128x8xf32> -> vector<128x8xf32>
    %c2_18 = arith.constant 2 : index
    %c0_19 = arith.constant 0 : index
    %c0_20 = arith.constant 0 : index
    %17 = vector.load %arg51[%c2_18, %c0_19, %c0_20] : memref<7x64x128xf32, #tpu.memory_space<vmem>>, vector<1x64x128xf32>
    %18 = vector.shape_cast %17 : vector<1x64x128xf32> to vector<64x128xf32>
    %cst_21 = arith.constant dense<0.000000e+00> : vector<64x8xf32>
    %19 = tpu.matmul %18, %16, %cst_21 {dimension_numbers = #tpu.dot_dimension_numbers<[1], [0], [0], [1], [0, 0, 1, 1], [], []>} : vector<64x128xf32>, vector<128x8xf32>, vector<64x8xf32> -> vector<64x8xf32>
    %20 = arith.addf %13, %19 : vector<64x8xf32>
    %c3 = arith.constant 3 : index
    %c0_22 = arith.constant 0 : index
    %c0_23 = arith.constant 0 : index
    %21 = vector.load %arg53[%c3, %c0_22, %c0_23] : memref<7x1x8xf32, #tpu.memory_space<vmem>>, vector<1x1x8xf32>
    %22 = vector.shape_cast %21 : vector<1x1x8xf32> to vector<1x8xf32>
    %cst_24 = arith.constant dense<0.000000e+00> : vector<128x8xf32>
    %23 = tpu.matmul %0, %22, %cst_24 {dimension_numbers = #tpu.dot_dimension_numbers<[1], [0], [0], [1], [0, 0, 1, 1], [], []>} : vector<128x1xf32>, vector<1x8xf32>, vector<128x8xf32> -> vector<128x8xf32>
    %c3_25 = arith.constant 3 : index
    %c0_26 = arith.constant 0 : index
    %c0_27 = arith.constant 0 : index
    %24 = vector.load %arg51[%c3_25, %c0_26, %c0_27] : memref<7x64x128xf32, #tpu.memory_space<vmem>>, vector<1x64x128xf32>
    %25 = vector.shape_cast %24 : vector<1x64x128xf32> to vector<64x128xf32>
    %cst_28 = arith.constant dense<0.000000e+00> : vector<64x8xf32>
    %26 = tpu.matmul %25, %23, %cst_28 {dimension_numbers = #tpu.dot_dimension_numbers<[1], [0], [0], [1], [0, 0, 1, 1], [], []>} : vector<64x128xf32>, vector<128x8xf32>, vector<64x8xf32> -> vector<64x8xf32>
    %27 = arith.addf %20, %26 : vector<64x8xf32>
    %c4 = arith.constant 4 : index
    %c0_29 = arith.constant 0 : index
    %c0_30 = arith.constant 0 : index
    %28 = vector.load %arg53[%c4, %c0_29, %c0_30] : memref<7x1x8xf32, #tpu.memory_space<vmem>>, vector<1x1x8xf32>
    %29 = vector.shape_cast %28 : vector<1x1x8xf32> to vector<1x8xf32>
    %cst_31 = arith.constant dense<0.000000e+00> : vector<128x8xf32>
    %30 = tpu.matmul %0, %29, %cst_31 {dimension_numbers = #tpu.dot_dimension_numbers<[1], [0], [0], [1], [0, 0, 1, 1], [], []>} : vector<128x1xf32>, vector<1x8xf32>, vector<128x8xf32> -> vector<128x8xf32>
    %c4_32 = arith.constant 4 : index
    %c0_33 = arith.constant 0 : index
    %c0_34 = arith.constant 0 : index
    %31 = vector.load %arg51[%c4_32, %c0_33, %c0_34] : memref<7x64x128xf32, #tpu.memory_space<vmem>>, vector<1x64x128xf32>
    %32 = vector.shape_cast %31 : vector<1x64x128xf32> to vector<64x128xf32>
    %cst_35 = arith.constant dense<0.000000e+00> : vector<64x8xf32>
    %33 = tpu.matmul %32, %30, %cst_35 {dimension_numbers = #tpu.dot_dimension_numbers<[1], [0], [0], [1], [0, 0, 1, 1], [], []>} : vector<64x128xf32>, vector<128x8xf32>, vector<64x8xf32> -> vector<64x8xf32>
    %34 = arith.addf %27, %33 : vector<64x8xf32>
    %c5 = arith.constant 5 : index
    %c0_36 = arith.constant 0 : index
    %c0_37 = arith.constant 0 : index
    %35 = vector.load %arg53[%c5, %c0_36, %c0_37] : memref<7x1x8xf32, #tpu.memory_space<vmem>>, vector<1x1x8xf32>
    %36 = vector.shape_cast %35 : vector<1x1x8xf32> to vector<1x8xf32>
    %cst_38 = arith.constant dense<0.000000e+00> : vector<128x8xf32>
    %37 = tpu.matmul %0, %36, %cst_38 {dimension_numbers = #tpu.dot_dimension_numbers<[1], [0], [0], [1], [0, 0, 1, 1], [], []>} : vector<128x1xf32>, vector<1x8xf32>, vector<128x8xf32> -> vector<128x8xf32>
    %c5_39 = arith.constant 5 : index
    %c0_40 = arith.constant 0 : index
    %c0_41 = arith.constant 0 : index
    %38 = vector.load %arg51[%c5_39, %c0_40, %c0_41] : memref<7x64x128xf32, #tpu.memory_space<vmem>>, vector<1x64x128xf32>
    %39 = vector.shape_cast %38 : vector<1x64x128xf32> to vector<64x128xf32>
    %cst_42 = arith.constant dense<0.000000e+00> : vector<64x8xf32>
    %40 = tpu.matmul %39, %37, %cst_42 {dimension_numbers = #tpu.dot_dimension_numbers<[1], [0], [0], [1], [0, 0, 1, 1], [], []>} : vector<64x128xf32>, vector<128x8xf32>, vector<64x8xf32> -> vector<64x8xf32>
    %41 = arith.addf %34, %40 : vector<64x8xf32>
    %c6 = arith.constant 6 : index
    %c0_43 = arith.constant 0 : index
    %c0_44 = arith.constant 0 : index
    %42 = vector.load %arg53[%c6, %c0_43, %c0_44] : memref<7x1x8xf32, #tpu.memory_space<vmem>>, vector<1x1x8xf32>
    %43 = vector.shape_cast %42 : vector<1x1x8xf32> to vector<1x8xf32>
    %cst_45 = arith.constant dense<0.000000e+00> : vector<128x8xf32>
    %44 = tpu.matmul %0, %43, %cst_45 {dimension_numbers = #tpu.dot_dimension_numbers<[1], [0], [0], [1], [0, 0, 1, 1], [], []>} : vector<128x1xf32>, vector<1x8xf32>, vector<128x8xf32> -> vector<128x8xf32>
    %c6_46 = arith.constant 6 : index
    %c0_47 = arith.constant 0 : index
    %c0_48 = arith.constant 0 : index
    %45 = vector.load %arg51[%c6_46, %c0_47, %c0_48] : memref<7x64x128xf32, #tpu.memory_space<vmem>>, vector<1x64x128xf32>
    %46 = vector.shape_cast %45 : vector<1x64x128xf32> to vector<64x128xf32>
    %cst_49 = arith.constant dense<0.000000e+00> : vector<64x8xf32>
    %47 = tpu.matmul %46, %44, %cst_49 {dimension_numbers = #tpu.dot_dimension_numbers<[1], [0], [0], [1], [0, 0, 1, 1], [], []>} : vector<64x128xf32>, vector<128x8xf32>, vector<64x8xf32> -> vector<64x8xf32>
    %48 = arith.addf %41, %47 : vector<64x8xf32>
    %cst_50 = arith.constant 1.562500e-02 : f32
    %49 = vector.broadcast %cst_50 : f32 to vector<1x64xf32>
    %cst_51 = arith.constant dense<0.000000e+00> : vector<1x8xf32>
    %50 = tpu.matmul %49, %48, %cst_51 {dimension_numbers = #tpu.dot_dimension_numbers<[1], [0], [0], [1], [0, 0, 1, 1], [], []>} : vector<1x64xf32>, vector<64x8xf32>, vector<1x8xf32> -> vector<1x8xf32>
    %51 = vector.broadcast %50 : vector<1x8xf32> to vector<64x8xf32>
    %52 = arith.subf %48, %51 : vector<64x8xf32>
    %53 = arith.mulf %52, %52 : vector<64x8xf32>
    %cst_52 = arith.constant dense<0.000000e+00> : vector<1x8xf32>
    %54 = tpu.matmul %49, %53, %cst_52 {dimension_numbers = #tpu.dot_dimension_numbers<[1], [0], [0], [1], [0, 0, 1, 1], [], []>} : vector<1x64xf32>, vector<64x8xf32>, vector<1x8xf32> -> vector<1x8xf32>
    %cst_53 = arith.constant 9.99999974E-6 : f32
    %55 = vector.broadcast %cst_53 : f32 to vector<1x8xf32>
    %56 = arith.addf %54, %55 : vector<1x8xf32>
    %57 = math.rsqrt %56 : vector<1x8xf32>
    %58 = vector.broadcast %57 : vector<1x8xf32> to vector<64x8xf32>
    %59 = arith.mulf %52, %58 : vector<64x8xf32>
    %c0_54 = arith.constant 0 : index
    %c0_55 = arith.constant 0 : index
    %60 = vector.load %arg52[%c0_54, %c0_55] : memref<1x8xf32, #tpu.memory_space<vmem>>, vector<1x8xf32>
    %61 = vector.broadcast %60 : vector<1x8xf32> to vector<64x8xf32>
    %62 = arith.mulf %59, %61 : vector<64x8xf32>
    %c0_56 = arith.constant 0 : index
    %c0_57 = arith.constant 0 : index
    %63 = vector.load %arg50[%c0_56, %c0_57] : memref<1x8xf32, #tpu.memory_space<vmem>>, vector<1x8xf32>
    %64 = vector.broadcast %63 : vector<1x8xf32> to vector<64x8xf32>
    %65 = arith.addf %62, %64 : vector<64x8xf32>
    %cst_58 = arith.constant 0.000000e+00 : f32
    %66 = vector.broadcast %cst_58 : f32 to vector<64x8xf32>
    %67 = arith.maximumf %65, %66 : vector<64x8xf32>
    %c0_59 = arith.constant 0 : index
    %c0_60 = arith.constant 0 : index
    %c0_61 = arith.constant 0 : index
    %68 = vector.load %arg48[%c0_59, %c0_60, %c0_61] : memref<3x32x64xf32, #tpu.memory_space<vmem>>, vector<1x32x64xf32>
    %69 = vector.shape_cast %68 : vector<1x32x64xf32> to vector<32x64xf32>
    %cst_62 = arith.constant dense<0.000000e+00> : vector<32x8xf32>
    %70 = tpu.matmul %69, %67, %cst_62 {dimension_numbers = #tpu.dot_dimension_numbers<[1], [0], [0], [1], [0, 0, 1, 1], [], []>} : vector<32x64xf32>, vector<64x8xf32>, vector<32x8xf32> -> vector<32x8xf32>
    %c0_63 = arith.constant 0 : index
    %c0_64 = arith.constant 0 : index
    %c0_65 = arith.constant 0 : index
    %71 = vector.load %arg49[%c0_63, %c0_64, %c0_65] : memref<3x32x1xf32, #tpu.memory_space<vmem>>, vector<1x32x1xf32>
    %72 = vector.shape_cast %71 : vector<1x32x1xf32> to vector<32x1xf32>
    %73 = vector.broadcast %72 : vector<32x1xf32> to vector<32x8xf32>
    %74 = arith.addf %70, %73 : vector<32x8xf32>
    %c1_66 = arith.constant 1 : index
    %c0_67 = arith.constant 0 : index
    %c0_68 = arith.constant 0 : index
    %75 = vector.load %arg48[%c1_66, %c0_67, %c0_68] : memref<3x32x64xf32, #tpu.memory_space<vmem>>, vector<1x32x64xf32>
    %76 = vector.shape_cast %75 : vector<1x32x64xf32> to vector<32x64xf32>
    %cst_69 = arith.constant dense<0.000000e+00> : vector<32x8xf32>
    %77 = tpu.matmul %76, %67, %cst_69 {dimension_numbers = #tpu.dot_dimension_numbers<[1], [0], [0], [1], [0, 0, 1, 1], [], []>} : vector<32x64xf32>, vector<64x8xf32>, vector<32x8xf32> -> vector<32x8xf32>
    %c1_70 = arith.constant 1 : index
    %c0_71 = arith.constant 0 : index
    %c0_72 = arith.constant 0 : index
    %78 = vector.load %arg49[%c1_70, %c0_71, %c0_72] : memref<3x32x1xf32, #tpu.memory_space<vmem>>, vector<1x32x1xf32>
    %79 = vector.shape_cast %78 : vector<1x32x1xf32> to vector<32x1xf32>
    %80 = vector.broadcast %79 : vector<32x1xf32> to vector<32x8xf32>
    %81 = arith.addf %77, %80 : vector<32x8xf32>
    %82 = arith.maximumf %74, %81 : vector<32x8xf32>
    %c2_73 = arith.constant 2 : index
    %c0_74 = arith.constant 0 : index
    %c0_75 = arith.constant 0 : index
    %83 = vector.load %arg48[%c2_73, %c0_74, %c0_75] : memref<3x32x64xf32, #tpu.memory_space<vmem>>, vector<1x32x64xf32>
    %84 = vector.shape_cast %83 : vector<1x32x64xf32> to vector<32x64xf32>
    %cst_76 = arith.constant dense<0.000000e+00> : vector<32x8xf32>
    %85 = tpu.matmul %84, %67, %cst_76 {dimension_numbers = #tpu.dot_dimension_numbers<[1], [0], [0], [1], [0, 0, 1, 1], [], []>} : vector<32x64xf32>, vector<64x8xf32>, vector<32x8xf32> -> vector<32x8xf32>
    %c2_77 = arith.constant 2 : index
    %c0_78 = arith.constant 0 : index
    %c0_79 = arith.constant 0 : index
    %86 = vector.load %arg49[%c2_77, %c0_78, %c0_79] : memref<3x32x1xf32, #tpu.memory_space<vmem>>, vector<1x32x1xf32>
    %87 = vector.shape_cast %86 : vector<1x32x1xf32> to vector<32x1xf32>
    %88 = vector.broadcast %87 : vector<32x1xf32> to vector<32x8xf32>
    %89 = arith.addf %85, %88 : vector<32x8xf32>
    %90 = arith.maximumf %82, %89 : vector<32x8xf32>
    %c0_80 = arith.constant 0 : index
    %c0_81 = arith.constant 0 : index
    %c0_82 = arith.constant 0 : index
    %91 = vector.load %arg7[%c0_80, %c0_81, %c0_82] : memref<3x8x8xf32, #tpu.memory_space<vmem>>, vector<1x8x8xf32>
    %92 = vector.shape_cast %91 : vector<1x8x8xf32> to vector<8x8xf32>
    %cst_83 = arith.constant dense<0.000000e+00> : vector<32x8xf32>
    %93 = tpu.matmul %90, %92, %cst_83 {dimension_numbers = #tpu.dot_dimension_numbers<[1], [0], [0], [1], [0, 0, 1, 1], [], []>} : vector<32x8xf32>, vector<8x8xf32>, vector<32x8xf32> -> vector<32x8xf32>
    %c0_84 = arith.constant 0 : index
    %c0_85 = arith.constant 0 : index
    %c0_86 = arith.constant 0 : index
    %94 = vector.load %arg3[%c0_84, %c0_85, %c0_86] : memref<3x32x32xf32, #tpu.memory_space<vmem>>, vector<1x32x32xf32>
    %95 = vector.shape_cast %94 : vector<1x32x32xf32> to vector<32x32xf32>
    %cst_87 = arith.constant dense<0.000000e+00> : vector<32x8xf32>
    %96 = tpu.matmul %95, %93, %cst_87 {dimension_numbers = #tpu.dot_dimension_numbers<[1], [0], [0], [1], [0, 0, 1, 1], [], []>} : vector<32x32xf32>, vector<32x8xf32>, vector<32x8xf32> -> vector<32x8xf32>
    %c1_88 = arith.constant 1 : index
    %c0_89 = arith.constant 0 : index
    %c0_90 = arith.constant 0 : index
    %97 = vector.load %arg7[%c1_88, %c0_89, %c0_90] : memref<3x8x8xf32, #tpu.memory_space<vmem>>, vector<1x8x8xf32>
    %98 = vector.shape_cast %97 : vector<1x8x8xf32> to vector<8x8xf32>
    %cst_91 = arith.constant dense<0.000000e+00> : vector<32x8xf32>
    %99 = tpu.matmul %90, %98, %cst_91 {dimension_numbers = #tpu.dot_dimension_numbers<[1], [0], [0], [1], [0, 0, 1, 1], [], []>} : vector<32x8xf32>, vector<8x8xf32>, vector<32x8xf32> -> vector<32x8xf32>
    %c1_92 = arith.constant 1 : index
    %c0_93 = arith.constant 0 : index
    %c0_94 = arith.constant 0 : index
    %100 = vector.load %arg3[%c1_92, %c0_93, %c0_94] : memref<3x32x32xf32, #tpu.memory_space<vmem>>, vector<1x32x32xf32>
    %101 = vector.shape_cast %100 : vector<1x32x32xf32> to vector<32x32xf32>
    %cst_95 = arith.constant dense<0.000000e+00> : vector<32x8xf32>
    %102 = tpu.matmul %101, %99, %cst_95 {dimension_numbers = #tpu.dot_dimension_numbers<[1], [0], [0], [1], [0, 0, 1, 1], [], []>} : vector<32x32xf32>, vector<32x8xf32>, vector<32x8xf32> -> vector<32x8xf32>
    %103 = arith.addf %96, %102 : vector<32x8xf32>
    %c2_96 = arith.constant 2 : index
    %c0_97 = arith.constant 0 : index
    %c0_98 = arith.constant 0 : index
    %104 = vector.load %arg7[%c2_96, %c0_97, %c0_98] : memref<3x8x8xf32, #tpu.memory_space<vmem>>, vector<1x8x8xf32>
    %105 = vector.shape_cast %104 : vector<1x8x8xf32> to vector<8x8xf32>
    %cst_99 = arith.constant dense<0.000000e+00> : vector<32x8xf32>
    %106 = tpu.matmul %90, %105, %cst_99 {dimension_numbers = #tpu.dot_dimension_numbers<[1], [0], [0], [1], [0, 0, 1, 1], [], []>} : vector<32x8xf32>, vector<8x8xf32>, vector<32x8xf32> -> vector<32x8xf32>
    %c2_100 = arith.constant 2 : index
    %c0_101 = arith.constant 0 : index
    %c0_102 = arith.constant 0 : index
    %107 = vector.load %arg3[%c2_100, %c0_101, %c0_102] : memref<3x32x32xf32, #tpu.memory_space<vmem>>, vector<1x32x32xf32>
    %108 = vector.shape_cast %107 : vector<1x32x32xf32> to vector<32x32xf32>
    %cst_103 = arith.constant dense<0.000000e+00> : vector<32x8xf32>
    %109 = tpu.matmul %108, %106, %cst_103 {dimension_numbers = #tpu.dot_dimension_numbers<[1], [0], [0], [1], [0, 0, 1, 1], [], []>} : vector<32x32xf32>, vector<32x8xf32>, vector<32x8xf32> -> vector<32x8xf32>
    %110 = arith.addf %103, %109 : vector<32x8xf32>
    %cst_104 = arith.constant 3.125000e-02 : f32
    %111 = vector.broadcast %cst_104 : f32 to vector<1x32xf32>
    %cst_105 = arith.constant dense<0.000000e+00> : vector<1x8xf32>
    %112 = tpu.matmul %111, %110, %cst_105 {dimension_numbers = #tpu.dot_dimension_numbers<[1], [0], [0], [1], [0, 0, 1, 1], [], []>} : vector<1x32xf32>, vector<32x8xf32>, vector<1x8xf32> -> vector<1x8xf32>
    %113 = vector.broadcast %112 : vector<1x8xf32> to vector<32x8xf32>
    %114 = arith.subf %110, %113 : vector<32x8xf32>
    %115 = arith.mulf %114, %114 : vector<32x8xf32>
    %cst_106 = arith.constant dense<0.000000e+00> : vector<1x8xf32>
    %116 = tpu.matmul %111, %115, %cst_106 {dimension_numbers = #tpu.dot_dimension_numbers<[1], [0], [0], [1], [0, 0, 1, 1], [], []>} : vector<1x32xf32>, vector<32x8xf32>, vector<1x8xf32> -> vector<1x8xf32>
    %cst_107 = arith.constant 9.99999974E-6 : f32
    %117 = vector.broadcast %cst_107 : f32 to vector<1x8xf32>
    %118 = arith.addf %116, %117 : vector<1x8xf32>
    %119 = math.rsqrt %118 : vector<1x8xf32>
    %120 = vector.broadcast %119 : vector<1x8xf32> to vector<32x8xf32>
    %121 = arith.mulf %114, %120 : vector<32x8xf32>
    %c0_108 = arith.constant 0 : index
    %c0_109 = arith.constant 0 : index
    %122 = vector.load %arg5[%c0_108, %c0_109] : memref<1x8xf32, #tpu.memory_space<vmem>>, vector<1x8xf32>
    %123 = vector.broadcast %122 : vector<1x8xf32> to vector<32x8xf32>
    %124 = arith.mulf %121, %123 : vector<32x8xf32>
    %c0_110 = arith.constant 0 : index
    %c0_111 = arith.constant 0 : index
    %125 = vector.load %arg1[%c0_110, %c0_111] : memref<1x8xf32, #tpu.memory_space<vmem>>, vector<1x8xf32>
    %126 = vector.broadcast %125 : vector<1x8xf32> to vector<32x8xf32>
    %127 = arith.addf %124, %126 : vector<32x8xf32>
    %cst_112 = arith.constant 0.000000e+00 : f32
    %128 = vector.broadcast %cst_112 : f32 to vector<32x8xf32>
    %129 = arith.maximumf %127, %128 : vector<32x8xf32>
    %c0_113 = arith.constant 0 : index
    %c0_114 = arith.constant 0 : index
    %c0_115 = arith.constant 0 : index
    %130 = vector.load %arg8[%c0_113, %c0_114, %c0_115] : memref<3x8x8xf32, #tpu.memory_space<vmem>>, vector<1x8x8xf32>
    %131 = vector.shape_cast %130 : vector<1x8x8xf32> to vector<8x8xf32>
    %cst_116 = arith.constant dense<0.000000e+00> : vector<32x8xf32>
    %132 = tpu.matmul %129, %131, %cst_116 {dimension_numbers = #tpu.dot_dimension_numbers<[1], [0], [0], [1], [0, 0, 1, 1], [], []>} : vector<32x8xf32>, vector<8x8xf32>, vector<32x8xf32> -> vector<32x8xf32>
    %c0_117 = arith.constant 0 : index
    %c0_118 = arith.constant 0 : index
    %c0_119 = arith.constant 0 : index
    %133 = vector.load %arg4[%c0_117, %c0_118, %c0_119] : memref<3x32x32xf32, #tpu.memory_space<vmem>>, vector<1x32x32xf32>
    %134 = vector.shape_cast %133 : vector<1x32x32xf32> to vector<32x32xf32>
    %cst_120 = arith.constant dense<0.000000e+00> : vector<32x8xf32>
    %135 = tpu.matmul %134, %132, %cst_120 {dimension_numbers = #tpu.dot_dimension_numbers<[1], [0], [0], [1], [0, 0, 1, 1], [], []>} : vector<32x32xf32>, vector<32x8xf32>, vector<32x8xf32> -> vector<32x8xf32>
    %c1_121 = arith.constant 1 : index
    %c0_122 = arith.constant 0 : index
    %c0_123 = arith.constant 0 : index
    %136 = vector.load %arg8[%c1_121, %c0_122, %c0_123] : memref<3x8x8xf32, #tpu.memory_space<vmem>>, vector<1x8x8xf32>
    %137 = vector.shape_cast %136 : vector<1x8x8xf32> to vector<8x8xf32>
    %cst_124 = arith.constant dense<0.000000e+00> : vector<32x8xf32>
    %138 = tpu.matmul %129, %137, %cst_124 {dimension_numbers = #tpu.dot_dimension_numbers<[1], [0], [0], [1], [0, 0, 1, 1], [], []>} : vector<32x8xf32>, vector<8x8xf32>, vector<32x8xf32> -> vector<32x8xf32>
    %c1_125 = arith.constant 1 : index
    %c0_126 = arith.constant 0 : index
    %c0_127 = arith.constant 0 : index
    %139 = vector.load %arg4[%c1_125, %c0_126, %c0_127] : memref<3x32x32xf32, #tpu.memory_space<vmem>>, vector<1x32x32xf32>
    %140 = vector.shape_cast %139 : vector<1x32x32xf32> to vector<32x32xf32>
    %cst_128 = arith.constant dense<0.000000e+00> : vector<32x8xf32>
    %141 = tpu.matmul %140, %138, %cst_128 {dimension_numbers = #tpu.dot_dimension_numbers<[1], [0], [0], [1], [0, 0, 1, 1], [], []>} : vector<32x32xf32>, vector<32x8xf32>, vector<32x8xf32> -> vector<32x8xf32>
    %142 = arith.addf %135, %141 : vector<32x8xf32>
    %c2_129 = arith.constant 2 : index
    %c0_130 = arith.constant 0 : index
    %c0_131 = arith.constant 0 : index
    %143 = vector.load %arg8[%c2_129, %c0_130, %c0_131] : memref<3x8x8xf32, #tpu.memory_space<vmem>>, vector<1x8x8xf32>
    %144 = vector.shape_cast %143 : vector<1x8x8xf32> to vector<8x8xf32>
    %cst_132 = arith.constant dense<0.000000e+00> : vector<32x8xf32>
    %145 = tpu.matmul %129, %144, %cst_132 {dimension_numbers = #tpu.dot_dimension_numbers<[1], [0], [0], [1], [0, 0, 1, 1], [], []>} : vector<32x8xf32>, vector<8x8xf32>, vector<32x8xf32> -> vector<32x8xf32>
    %c2_133 = arith.constant 2 : index
    %c0_134 = arith.constant 0 : index
    %c0_135 = arith.constant 0 : index
    %146 = vector.load %arg4[%c2_133, %c0_134, %c0_135] : memref<3x32x32xf32, #tpu.memory_space<vmem>>, vector<1x32x32xf32>
    %147 = vector.shape_cast %146 : vector<1x32x32xf32> to vector<32x32xf32>
    %cst_136 = arith.constant dense<0.000000e+00> : vector<32x8xf32>
    %148 = tpu.matmul %147, %145, %cst_136 {dimension_numbers = #tpu.dot_dimension_numbers<[1], [0], [0], [1], [0, 0, 1, 1], [], []>} : vector<32x32xf32>, vector<32x8xf32>, vector<32x8xf32> -> vector<32x8xf32>
    %149 = arith.addf %142, %148 : vector<32x8xf32>
    %cst_137 = arith.constant 3.125000e-02 : f32
    %150 = vector.broadcast %cst_137 : f32 to vector<1x32xf32>
    %cst_138 = arith.constant dense<0.000000e+00> : vector<1x8xf32>
    %151 = tpu.matmul %150, %149, %cst_138 {dimension_numbers = #tpu.dot_dimension_numbers<[1], [0], [0], [1], [0, 0, 1, 1], [], []>} : vector<1x32xf32>, vector<32x8xf32>, vector<1x8xf32> -> vector<1x8xf32>
    %152 = vector.broadcast %151 : vector<1x8xf32> to vector<32x8xf32>
    %153 = arith.subf %149, %152 : vector<32x8xf32>
    %154 = arith.mulf %153, %153 : vector<32x8xf32>
    %cst_139 = arith.constant dense<0.000000e+00> : vector<1x8xf32>
    %155 = tpu.matmul %150, %154, %cst_139 {dimension_numbers = #tpu.dot_dimension_numbers<[1], [0], [0], [1], [0, 0, 1, 1], [], []>} : vector<1x32xf32>, vector<32x8xf32>, vector<1x8xf32> -> vector<1x8xf32>
    %cst_140 = arith.constant 9.99999974E-6 : f32
    %156 = vector.broadcast %cst_140 : f32 to vector<1x8xf32>
    %157 = arith.addf %155, %156 : vector<1x8xf32>
    %158 = math.rsqrt %157 : vector<1x8xf32>
    %159 = vector.broadcast %158 : vector<1x8xf32> to vector<32x8xf32>
    %160 = arith.mulf %153, %159 : vector<32x8xf32>
    %c0_141 = arith.constant 0 : index
    %c0_142 = arith.constant 0 : index
    %161 = vector.load %arg6[%c0_141, %c0_142] : memref<1x8xf32, #tpu.memory_space<vmem>>, vector<1x8xf32>
    %162 = vector.broadcast %161 : vector<1x8xf32> to vector<32x8xf32>
    %163 = arith.mulf %160, %162 : vector<32x8xf32>
    %c0_143 = arith.constant 0 : index
    %c0_144 = arith.constant 0 : index
    %164 = vector.load %arg2[%c0_143, %c0_144] : memref<1x8xf32, #tpu.memory_space<vmem>>, vector<1x8xf32>
    %165 = vector.broadcast %164 : vector<1x8xf32> to vector<32x8xf32>
    %166 = arith.addf %163, %165 : vector<32x8xf32>
    %167 = arith.addf %166, %90 : vector<32x8xf32>
    %cst_145 = arith.constant 0.000000e+00 : f32
    %168 = vector.broadcast %cst_145 : f32 to vector<32x8xf32>
    %169 = arith.maximumf %167, %168 : vector<32x8xf32>
    %c0_146 = arith.constant 0 : index
    %c0_147 = arith.constant 0 : index
    %c0_148 = arith.constant 0 : index
    %170 = vector.load %arg20[%c0_146, %c0_147, %c0_148] : memref<1x8x16xf32, #tpu.memory_space<vmem>>, vector<1x8x16xf32>
    %171 = vector.shape_cast %170 : vector<1x8x16xf32> to vector<8x16xf32>
    %cst_149 = arith.constant dense<0.000000e+00> : vector<32x16xf32>
    %172 = tpu.matmul %169, %171, %cst_149 {dimension_numbers = #tpu.dot_dimension_numbers<[1], [0], [0], [1], [0, 0, 1, 1], [], []>} : vector<32x8xf32>, vector<8x16xf32>, vector<32x16xf32> -> vector<32x16xf32>
    %c0_150 = arith.constant 0 : index
    %c0_151 = arith.constant 0 : index
    %c0_152 = arith.constant 0 : index
    %173 = vector.load %arg17[%c0_150, %c0_151, %c0_152] : memref<1x16x32xf32, #tpu.memory_space<vmem>>, vector<1x16x32xf32>
    %174 = vector.shape_cast %173 : vector<1x16x32xf32> to vector<16x32xf32>
    %cst_153 = arith.constant dense<0.000000e+00> : vector<16x16xf32>
    %175 = tpu.matmul %174, %172, %cst_153 {dimension_numbers = #tpu.dot_dimension_numbers<[1], [0], [0], [1], [0, 0, 1, 1], [], []>} : vector<16x32xf32>, vector<32x16xf32>, vector<16x16xf32> -> vector<16x16xf32>
    %cst_154 = arith.constant 6.250000e-02 : f32
    %176 = vector.broadcast %cst_154 : f32 to vector<1x16xf32>
    %cst_155 = arith.constant dense<0.000000e+00> : vector<1x16xf32>
    %177 = tpu.matmul %176, %175, %cst_155 {dimension_numbers = #tpu.dot_dimension_numbers<[1], [0], [0], [1], [0, 0, 1, 1], [], []>} : vector<1x16xf32>, vector<16x16xf32>, vector<1x16xf32> -> vector<1x16xf32>
    %178 = vector.broadcast %177 : vector<1x16xf32> to vector<16x16xf32>
    %179 = arith.subf %175, %178 : vector<16x16xf32>
    %180 = arith.mulf %179, %179 : vector<16x16xf32>
    %cst_156 = arith.constant dense<0.000000e+00> : vector<1x16xf32>
    %181 = tpu.matmul %176, %180, %cst_156 {dimension_numbers = #tpu.dot_dimension_numbers<[1], [0], [0], [1], [0, 0, 1, 1], [], []>} : vector<1x16xf32>, vector<16x16xf32>, vector<1x16xf32> -> vector<1x16xf32>
    %cst_157 = arith.constant 9.99999974E-6 : f32
    %182 = vector.broadcast %cst_157 : f32 to vector<1x16xf32>
    %183 = arith.addf %181, %182 : vector<1x16xf32>
    %184 = math.rsqrt %183 : vector<1x16xf32>
    %185 = vector.broadcast %184 : vector<1x16xf32> to vector<16x16xf32>
    %186 = arith.mulf %179, %185 : vector<16x16xf32>
    %c0_158 = arith.constant 0 : index
    %c0_159 = arith.constant 0 : index
    %187 = vector.load %arg16[%c0_158, %c0_159] : memref<1x16xf32, #tpu.memory_space<vmem>>, vector<1x16xf32>
    %188 = vector.broadcast %187 : vector<1x16xf32> to vector<16x16xf32>
    %189 = arith.mulf %186, %188 : vector<16x16xf32>
    %c0_160 = arith.constant 0 : index
    %c0_161 = arith.constant 0 : index
    %190 = vector.load %arg11[%c0_160, %c0_161] : memref<1x16xf32, #tpu.memory_space<vmem>>, vector<1x16xf32>
    %191 = vector.broadcast %190 : vector<1x16xf32> to vector<16x16xf32>
    %192 = arith.addf %189, %191 : vector<16x16xf32>
    %c0_162 = arith.constant 0 : index
    %c0_163 = arith.constant 0 : index
    %c0_164 = arith.constant 0 : index
    %193 = vector.load %arg18[%c0_162, %c0_163, %c0_164] : memref<3x8x16xf32, #tpu.memory_space<vmem>>, vector<1x8x16xf32>
    %194 = vector.shape_cast %193 : vector<1x8x16xf32> to vector<8x16xf32>
    %cst_165 = arith.constant dense<0.000000e+00> : vector<32x16xf32>
    %195 = tpu.matmul %169, %194, %cst_165 {dimension_numbers = #tpu.dot_dimension_numbers<[1], [0], [0], [1], [0, 0, 1, 1], [], []>} : vector<32x8xf32>, vector<8x16xf32>, vector<32x16xf32> -> vector<32x16xf32>
    %c0_166 = arith.constant 0 : index
    %c0_167 = arith.constant 0 : index
    %c0_168 = arith.constant 0 : index
    %196 = vector.load %arg12[%c0_166, %c0_167, %c0_168] : memref<3x16x32xf32, #tpu.memory_space<vmem>>, vector<1x16x32xf32>
    %197 = vector.shape_cast %196 : vector<1x16x32xf32> to vector<16x32xf32>
    %cst_169 = arith.constant dense<0.000000e+00> : vector<16x16xf32>
    %198 = tpu.matmul %197, %195, %cst_169 {dimension_numbers = #tpu.dot_dimension_numbers<[1], [0], [0], [1], [0, 0, 1, 1], [], []>} : vector<16x32xf32>, vector<32x16xf32>, vector<16x16xf32> -> vector<16x16xf32>
    %c1_170 = arith.constant 1 : index
    %c0_171 = arith.constant 0 : index
    %c0_172 = arith.constant 0 : index
    %199 = vector.load %arg18[%c1_170, %c0_171, %c0_172] : memref<3x8x16xf32, #tpu.memory_space<vmem>>, vector<1x8x16xf32>
    %200 = vector.shape_cast %199 : vector<1x8x16xf32> to vector<8x16xf32>
    %cst_173 = arith.constant dense<0.000000e+00> : vector<32x16xf32>
    %201 = tpu.matmul %169, %200, %cst_173 {dimension_numbers = #tpu.dot_dimension_numbers<[1], [0], [0], [1], [0, 0, 1, 1], [], []>} : vector<32x8xf32>, vector<8x16xf32>, vector<32x16xf32> -> vector<32x16xf32>
    %c1_174 = arith.constant 1 : index
    %c0_175 = arith.constant 0 : index
    %c0_176 = arith.constant 0 : index
    %202 = vector.load %arg12[%c1_174, %c0_175, %c0_176] : memref<3x16x32xf32, #tpu.memory_space<vmem>>, vector<1x16x32xf32>
    %203 = vector.shape_cast %202 : vector<1x16x32xf32> to vector<16x32xf32>
    %cst_177 = arith.constant dense<0.000000e+00> : vector<16x16xf32>
    %204 = tpu.matmul %203, %201, %cst_177 {dimension_numbers = #tpu.dot_dimension_numbers<[1], [0], [0], [1], [0, 0, 1, 1], [], []>} : vector<16x32xf32>, vector<32x16xf32>, vector<16x16xf32> -> vector<16x16xf32>
    %205 = arith.addf %198, %204 : vector<16x16xf32>
    %c2_178 = arith.constant 2 : index
    %c0_179 = arith.constant 0 : index
    %c0_180 = arith.constant 0 : index
    %206 = vector.load %arg18[%c2_178, %c0_179, %c0_180] : memref<3x8x16xf32, #tpu.memory_space<vmem>>, vector<1x8x16xf32>
    %207 = vector.shape_cast %206 : vector<1x8x16xf32> to vector<8x16xf32>
    %cst_181 = arith.constant dense<0.000000e+00> : vector<32x16xf32>
    %208 = tpu.matmul %169, %207, %cst_181 {dimension_numbers = #tpu.dot_dimension_numbers<[1], [0], [0], [1], [0, 0, 1, 1], [], []>} : vector<32x8xf32>, vector<8x16xf32>, vector<32x16xf32> -> vector<32x16xf32>
    %c2_182 = arith.constant 2 : index
    %c0_183 = arith.constant 0 : index
    %c0_184 = arith.constant 0 : index
    %209 = vector.load %arg12[%c2_182, %c0_183, %c0_184] : memref<3x16x32xf32, #tpu.memory_space<vmem>>, vector<1x16x32xf32>
    %210 = vector.shape_cast %209 : vector<1x16x32xf32> to vector<16x32xf32>
    %cst_185 = arith.constant dense<0.000000e+00> : vector<16x16xf32>
    %211 = tpu.matmul %210, %208, %cst_185 {dimension_numbers = #tpu.dot_dimension_numbers<[1], [0], [0], [1], [0, 0, 1, 1], [], []>} : vector<16x32xf32>, vector<32x16xf32>, vector<16x16xf32> -> vector<16x16xf32>
    %212 = arith.addf %205, %211 : vector<16x16xf32>
    %cst_186 = arith.constant 6.250000e-02 : f32
    %213 = vector.broadcast %cst_186 : f32 to vector<1x16xf32>
    %cst_187 = arith.constant dense<0.000000e+00> : vector<1x16xf32>
    %214 = tpu.matmul %213, %212, %cst_187 {dimension_numbers = #tpu.dot_dimension_numbers<[1], [0], [0], [1], [0, 0, 1, 1], [], []>} : vector<1x16xf32>, vector<16x16xf32>, vector<1x16xf32> -> vector<1x16xf32>
    %215 = vector.broadcast %214 : vector<1x16xf32> to vector<16x16xf32>
    %216 = arith.subf %212, %215 : vector<16x16xf32>
    %217 = arith.mulf %216, %216 : vector<16x16xf32>
    %cst_188 = arith.constant dense<0.000000e+00> : vector<1x16xf32>
    %218 = tpu.matmul %213, %217, %cst_188 {dimension_numbers = #tpu.dot_dimension_numbers<[1], [0], [0], [1], [0, 0, 1, 1], [], []>} : vector<1x16xf32>, vector<16x16xf32>, vector<1x16xf32> -> vector<1x16xf32>
    %cst_189 = arith.constant 9.99999974E-6 : f32
    %219 = vector.broadcast %cst_189 : f32 to vector<1x16xf32>
    %220 = arith.addf %218, %219 : vector<1x16xf32>
    %221 = math.rsqrt %220 : vector<1x16xf32>
    %222 = vector.broadcast %221 : vector<1x16xf32> to vector<16x16xf32>
    %223 = arith.mulf %216, %222 : vector<16x16xf32>
    %c0_190 = arith.constant 0 : index
    %c0_191 = arith.constant 0 : index
    %224 = vector.load %arg14[%c0_190, %c0_191] : memref<1x16xf32, #tpu.memory_space<vmem>>, vector<1x16xf32>
    %225 = vector.broadcast %224 : vector<1x16xf32> to vector<16x16xf32>
    %226 = arith.mulf %223, %225 : vector<16x16xf32>
    %c0_192 = arith.constant 0 : index
    %c0_193 = arith.constant 0 : index
    %227 = vector.load %arg9[%c0_192, %c0_193] : memref<1x16xf32, #tpu.memory_space<vmem>>, vector<1x16xf32>
    %228 = vector.broadcast %227 : vector<1x16xf32> to vector<16x16xf32>
    %229 = arith.addf %226, %228 : vector<16x16xf32>
    %cst_194 = arith.constant 0.000000e+00 : f32
    %230 = vector.broadcast %cst_194 : f32 to vector<16x16xf32>
    %231 = arith.maximumf %229, %230 : vector<16x16xf32>
    %c0_195 = arith.constant 0 : index
    %c0_196 = arith.constant 0 : index
    %c0_197 = arith.constant 0 : index
    %232 = vector.load %arg19[%c0_195, %c0_196, %c0_197] : memref<3x16x16xf32, #tpu.memory_space<vmem>>, vector<1x16x16xf32>
    %233 = vector.shape_cast %232 : vector<1x16x16xf32> to vector<16x16xf32>
    %cst_198 = arith.constant dense<0.000000e+00> : vector<16x16xf32>
    %234 = tpu.matmul %231, %233, %cst_198 {dimension_numbers = #tpu.dot_dimension_numbers<[1], [0], [0], [1], [0, 0, 1, 1], [], []>} : vector<16x16xf32>, vector<16x16xf32>, vector<16x16xf32> -> vector<16x16xf32>
    %c0_199 = arith.constant 0 : index
    %c0_200 = arith.constant 0 : index
    %c0_201 = arith.constant 0 : index
    %235 = vector.load %arg13[%c0_199, %c0_200, %c0_201] : memref<3x16x16xf32, #tpu.memory_space<vmem>>, vector<1x16x16xf32>
    %236 = vector.shape_cast %235 : vector<1x16x16xf32> to vector<16x16xf32>
    %cst_202 = arith.constant dense<0.000000e+00> : vector<16x16xf32>
    %237 = tpu.matmul %236, %234, %cst_202 {dimension_numbers = #tpu.dot_dimension_numbers<[1], [0], [0], [1], [0, 0, 1, 1], [], []>} : vector<16x16xf32>, vector<16x16xf32>, vector<16x16xf32> -> vector<16x16xf32>
    %c1_203 = arith.constant 1 : index
    %c0_204 = arith.constant 0 : index
    %c0_205 = arith.constant 0 : index
    %238 = vector.load %arg19[%c1_203, %c0_204, %c0_205] : memref<3x16x16xf32, #tpu.memory_space<vmem>>, vector<1x16x16xf32>
    %239 = vector.shape_cast %238 : vector<1x16x16xf32> to vector<16x16xf32>
    %cst_206 = arith.constant dense<0.000000e+00> : vector<16x16xf32>
    %240 = tpu.matmul %231, %239, %cst_206 {dimension_numbers = #tpu.dot_dimension_numbers<[1], [0], [0], [1], [0, 0, 1, 1], [], []>} : vector<16x16xf32>, vector<16x16xf32>, vector<16x16xf32> -> vector<16x16xf32>
    %c1_207 = arith.constant 1 : index
    %c0_208 = arith.constant 0 : index
    %c0_209 = arith.constant 0 : index
    %241 = vector.load %arg13[%c1_207, %c0_208, %c0_209] : memref<3x16x16xf32, #tpu.memory_space<vmem>>, vector<1x16x16xf32>
    %242 = vector.shape_cast %241 : vector<1x16x16xf32> to vector<16x16xf32>
    %cst_210 = arith.constant dense<0.000000e+00> : vector<16x16xf32>
    %243 = tpu.matmul %242, %240, %cst_210 {dimension_numbers = #tpu.dot_dimension_numbers<[1], [0], [0], [1], [0, 0, 1, 1], [], []>} : vector<16x16xf32>, vector<16x16xf32>, vector<16x16xf32> -> vector<16x16xf32>
    %244 = arith.addf %237, %243 : vector<16x16xf32>
    %c2_211 = arith.constant 2 : index
    %c0_212 = arith.constant 0 : index
    %c0_213 = arith.constant 0 : index
    %245 = vector.load %arg19[%c2_211, %c0_212, %c0_213] : memref<3x16x16xf32, #tpu.memory_space<vmem>>, vector<1x16x16xf32>
    %246 = vector.shape_cast %245 : vector<1x16x16xf32> to vector<16x16xf32>
    %cst_214 = arith.constant dense<0.000000e+00> : vector<16x16xf32>
    %247 = tpu.matmul %231, %246, %cst_214 {dimension_numbers = #tpu.dot_dimension_numbers<[1], [0], [0], [1], [0, 0, 1, 1], [], []>} : vector<16x16xf32>, vector<16x16xf32>, vector<16x16xf32> -> vector<16x16xf32>
    %c2_215 = arith.constant 2 : index
    %c0_216 = arith.constant 0 : index
    %c0_217 = arith.constant 0 : index
    %248 = vector.load %arg13[%c2_215, %c0_216, %c0_217] : memref<3x16x16xf32, #tpu.memory_space<vmem>>, vector<1x16x16xf32>
    %249 = vector.shape_cast %248 : vector<1x16x16xf32> to vector<16x16xf32>
    %cst_218 = arith.constant dense<0.000000e+00> : vector<16x16xf32>
    %250 = tpu.matmul %249, %247, %cst_218 {dimension_numbers = #tpu.dot_dimension_numbers<[1], [0], [0], [1], [0, 0, 1, 1], [], []>} : vector<16x16xf32>, vector<16x16xf32>, vector<16x16xf32> -> vector<16x16xf32>
    %251 = arith.addf %244, %250 : vector<16x16xf32>
    %cst_219 = arith.constant 6.250000e-02 : f32
    %252 = vector.broadcast %cst_219 : f32 to vector<1x16xf32>
    %cst_220 = arith.constant dense<0.000000e+00> : vector<1x16xf32>
    %253 = tpu.matmul %252, %251, %cst_220 {dimension_numbers = #tpu.dot_dimension_numbers<[1], [0], [0], [1], [0, 0, 1, 1], [], []>} : vector<1x16xf32>, vector<16x16xf32>, vector<1x16xf32> -> vector<1x16xf32>
    %254 = vector.broadcast %253 : vector<1x16xf32> to vector<16x16xf32>
    %255 = arith.subf %251, %254 : vector<16x16xf32>
    %256 = arith.mulf %255, %255 : vector<16x16xf32>
    %cst_221 = arith.constant dense<0.000000e+00> : vector<1x16xf32>
    %257 = tpu.matmul %252, %256, %cst_221 {dimension_numbers = #tpu.dot_dimension_numbers<[1], [0], [0], [1], [0, 0, 1, 1], [], []>} : vector<1x16xf32>, vector<16x16xf32>, vector<1x16xf32> -> vector<1x16xf32>
    %cst_222 = arith.constant 9.99999974E-6 : f32
    %258 = vector.broadcast %cst_222 : f32 to vector<1x16xf32>
    %259 = arith.addf %257, %258 : vector<1x16xf32>
    %260 = math.rsqrt %259 : vector<1x16xf32>
    %261 = vector.broadcast %260 : vector<1x16xf32> to vector<16x16xf32>
    %262 = arith.mulf %255, %261 : vector<16x16xf32>
    %c0_223 = arith.constant 0 : index
    %c0_224 = arith.constant 0 : index
    %263 = vector.load %arg15[%c0_223, %c0_224] : memref<1x16xf32, #tpu.memory_space<vmem>>, vector<1x16xf32>
    %264 = vector.broadcast %263 : vector<1x16xf32> to vector<16x16xf32>
    %265 = arith.mulf %262, %264 : vector<16x16xf32>
    %c0_225 = arith.constant 0 : index
    %c0_226 = arith.constant 0 : index
    %266 = vector.load %arg10[%c0_225, %c0_226] : memref<1x16xf32, #tpu.memory_space<vmem>>, vector<1x16xf32>
    %267 = vector.broadcast %266 : vector<1x16xf32> to vector<16x16xf32>
    %268 = arith.addf %265, %267 : vector<16x16xf32>
    %269 = arith.addf %268, %192 : vector<16x16xf32>
    %cst_227 = arith.constant 0.000000e+00 : f32
    %270 = vector.broadcast %cst_227 : f32 to vector<16x16xf32>
    %271 = arith.maximumf %269, %270 : vector<16x16xf32>
    %c0_228 = arith.constant 0 : index
    %c0_229 = arith.constant 0 : index
    %c0_230 = arith.constant 0 : index
    %272 = vector.load %arg32[%c0_228, %c0_229, %c0_230] : memref<1x16x32xf32, #tpu.memory_space<vmem>>, vector<1x16x32xf32>
    %273 = vector.shape_cast %272 : vector<1x16x32xf32> to vector<16x32xf32>
    %cst_231 = arith.constant dense<0.000000e+00> : vector<16x32xf32>
    %274 = tpu.matmul %271, %273, %cst_231 {dimension_numbers = #tpu.dot_dimension_numbers<[1], [0], [0], [1], [0, 0, 1, 1], [], []>} : vector<16x16xf32>, vector<16x32xf32>, vector<16x32xf32> -> vector<16x32xf32>
    %c0_232 = arith.constant 0 : index
    %c0_233 = arith.constant 0 : index
    %c0_234 = arith.constant 0 : index
    %275 = vector.load %arg29[%c0_232, %c0_233, %c0_234] : memref<1x8x16xf32, #tpu.memory_space<vmem>>, vector<1x8x16xf32>
    %276 = vector.shape_cast %275 : vector<1x8x16xf32> to vector<8x16xf32>
    %cst_235 = arith.constant dense<0.000000e+00> : vector<8x32xf32>
    %277 = tpu.matmul %276, %274, %cst_235 {dimension_numbers = #tpu.dot_dimension_numbers<[1], [0], [0], [1], [0, 0, 1, 1], [], []>} : vector<8x16xf32>, vector<16x32xf32>, vector<8x32xf32> -> vector<8x32xf32>
    %cst_236 = arith.constant 1.250000e-01 : f32
    %278 = vector.broadcast %cst_236 : f32 to vector<1x8xf32>
    %cst_237 = arith.constant dense<0.000000e+00> : vector<1x32xf32>
    %279 = tpu.matmul %278, %277, %cst_237 {dimension_numbers = #tpu.dot_dimension_numbers<[1], [0], [0], [1], [0, 0, 1, 1], [], []>} : vector<1x8xf32>, vector<8x32xf32>, vector<1x32xf32> -> vector<1x32xf32>
    %280 = vector.broadcast %279 : vector<1x32xf32> to vector<8x32xf32>
    %281 = arith.subf %277, %280 : vector<8x32xf32>
    %282 = arith.mulf %281, %281 : vector<8x32xf32>
    %cst_238 = arith.constant dense<0.000000e+00> : vector<1x32xf32>
    %283 = tpu.matmul %278, %282, %cst_238 {dimension_numbers = #tpu.dot_dimension_numbers<[1], [0], [0], [1], [0, 0, 1, 1], [], []>} : vector<1x8xf32>, vector<8x32xf32>, vector<1x32xf32> -> vector<1x32xf32>
    %cst_239 = arith.constant 9.99999974E-6 : f32
    %284 = vector.broadcast %cst_239 : f32 to vector<1x32xf32>
    %285 = arith.addf %283, %284 : vector<1x32xf32>
    %286 = math.rsqrt %285 : vector<1x32xf32>
    %287 = vector.broadcast %286 : vector<1x32xf32> to vector<8x32xf32>
    %288 = arith.mulf %281, %287 : vector<8x32xf32>
    %c0_240 = arith.constant 0 : index
    %c0_241 = arith.constant 0 : index
    %289 = vector.load %arg28[%c0_240, %c0_241] : memref<1x32xf32, #tpu.memory_space<vmem>>, vector<1x32xf32>
    %290 = vector.broadcast %289 : vector<1x32xf32> to vector<8x32xf32>
    %291 = arith.mulf %288, %290 : vector<8x32xf32>
    %c0_242 = arith.constant 0 : index
    %c0_243 = arith.constant 0 : index
    %292 = vector.load %arg23[%c0_242, %c0_243] : memref<1x32xf32, #tpu.memory_space<vmem>>, vector<1x32xf32>
    %293 = vector.broadcast %292 : vector<1x32xf32> to vector<8x32xf32>
    %294 = arith.addf %291, %293 : vector<8x32xf32>
    %c0_244 = arith.constant 0 : index
    %c0_245 = arith.constant 0 : index
    %c0_246 = arith.constant 0 : index
    %295 = vector.load %arg30[%c0_244, %c0_245, %c0_246] : memref<3x16x32xf32, #tpu.memory_space<vmem>>, vector<1x16x32xf32>
    %296 = vector.shape_cast %295 : vector<1x16x32xf32> to vector<16x32xf32>
    %cst_247 = arith.constant dense<0.000000e+00> : vector<16x32xf32>
    %297 = tpu.matmul %271, %296, %cst_247 {dimension_numbers = #tpu.dot_dimension_numbers<[1], [0], [0], [1], [0, 0, 1, 1], [], []>} : vector<16x16xf32>, vector<16x32xf32>, vector<16x32xf32> -> vector<16x32xf32>
    %c0_248 = arith.constant 0 : index
    %c0_249 = arith.constant 0 : index
    %c0_250 = arith.constant 0 : index
    %298 = vector.load %arg24[%c0_248, %c0_249, %c0_250] : memref<3x8x16xf32, #tpu.memory_space<vmem>>, vector<1x8x16xf32>
    %299 = vector.shape_cast %298 : vector<1x8x16xf32> to vector<8x16xf32>
    %cst_251 = arith.constant dense<0.000000e+00> : vector<8x32xf32>
    %300 = tpu.matmul %299, %297, %cst_251 {dimension_numbers = #tpu.dot_dimension_numbers<[1], [0], [0], [1], [0, 0, 1, 1], [], []>} : vector<8x16xf32>, vector<16x32xf32>, vector<8x32xf32> -> vector<8x32xf32>
    %c1_252 = arith.constant 1 : index
    %c0_253 = arith.constant 0 : index
    %c0_254 = arith.constant 0 : index
    %301 = vector.load %arg30[%c1_252, %c0_253, %c0_254] : memref<3x16x32xf32, #tpu.memory_space<vmem>>, vector<1x16x32xf32>
    %302 = vector.shape_cast %301 : vector<1x16x32xf32> to vector<16x32xf32>
    %cst_255 = arith.constant dense<0.000000e+00> : vector<16x32xf32>
    %303 = tpu.matmul %271, %302, %cst_255 {dimension_numbers = #tpu.dot_dimension_numbers<[1], [0], [0], [1], [0, 0, 1, 1], [], []>} : vector<16x16xf32>, vector<16x32xf32>, vector<16x32xf32> -> vector<16x32xf32>
    %c1_256 = arith.constant 1 : index
    %c0_257 = arith.constant 0 : index
    %c0_258 = arith.constant 0 : index
    %304 = vector.load %arg24[%c1_256, %c0_257, %c0_258] : memref<3x8x16xf32, #tpu.memory_space<vmem>>, vector<1x8x16xf32>
    %305 = vector.shape_cast %304 : vector<1x8x16xf32> to vector<8x16xf32>
    %cst_259 = arith.constant dense<0.000000e+00> : vector<8x32xf32>
    %306 = tpu.matmul %305, %303, %cst_259 {dimension_numbers = #tpu.dot_dimension_numbers<[1], [0], [0], [1], [0, 0, 1, 1], [], []>} : vector<8x16xf32>, vector<16x32xf32>, vector<8x32xf32> -> vector<8x32xf32>
    %307 = arith.addf %300, %306 : vector<8x32xf32>
    %c2_260 = arith.constant 2 : index
    %c0_261 = arith.constant 0 : index
    %c0_262 = arith.constant 0 : index
    %308 = vector.load %arg30[%c2_260, %c0_261, %c0_262] : memref<3x16x32xf32, #tpu.memory_space<vmem>>, vector<1x16x32xf32>
    %309 = vector.shape_cast %308 : vector<1x16x32xf32> to vector<16x32xf32>
    %cst_263 = arith.constant dense<0.000000e+00> : vector<16x32xf32>
    %310 = tpu.matmul %271, %309, %cst_263 {dimension_numbers = #tpu.dot_dimension_numbers<[1], [0], [0], [1], [0, 0, 1, 1], [], []>} : vector<16x16xf32>, vector<16x32xf32>, vector<16x32xf32> -> vector<16x32xf32>
    %c2_264 = arith.constant 2 : index
    %c0_265 = arith.constant 0 : index
    %c0_266 = arith.constant 0 : index
    %311 = vector.load %arg24[%c2_264, %c0_265, %c0_266] : memref<3x8x16xf32, #tpu.memory_space<vmem>>, vector<1x8x16xf32>
    %312 = vector.shape_cast %311 : vector<1x8x16xf32> to vector<8x16xf32>
    %cst_267 = arith.constant dense<0.000000e+00> : vector<8x32xf32>
    %313 = tpu.matmul %312, %310, %cst_267 {dimension_numbers = #tpu.dot_dimension_numbers<[1], [0], [0], [1], [0, 0, 1, 1], [], []>} : vector<8x16xf32>, vector<16x32xf32>, vector<8x32xf32> -> vector<8x32xf32>
    %314 = arith.addf %307, %313 : vector<8x32xf32>
    %cst_268 = arith.constant 1.250000e-01 : f32
    %315 = vector.broadcast %cst_268 : f32 to vector<1x8xf32>
    %cst_269 = arith.constant dense<0.000000e+00> : vector<1x32xf32>
    %316 = tpu.matmul %315, %314, %cst_269 {dimension_numbers = #tpu.dot_dimension_numbers<[1], [0], [0], [1], [0, 0, 1, 1], [], []>} : vector<1x8xf32>, vector<8x32xf32>, vector<1x32xf32> -> vector<1x32xf32>
    %317 = vector.broadcast %316 : vector<1x32xf32> to vector<8x32xf32>
    %318 = arith.subf %314, %317 : vector<8x32xf32>
    %319 = arith.mulf %318, %318 : vector<8x32xf32>
    %cst_270 = arith.constant dense<0.000000e+00> : vector<1x32xf32>
    %320 = tpu.matmul %315, %319, %cst_270 {dimension_numbers = #tpu.dot_dimension_numbers<[1], [0], [0], [1], [0, 0, 1, 1], [], []>} : vector<1x8xf32>, vector<8x32xf32>, vector<1x32xf32> -> vector<1x32xf32>
    %cst_271 = arith.constant 9.99999974E-6 : f32
    %321 = vector.broadcast %cst_271 : f32 to vector<1x32xf32>
    %322 = arith.addf %320, %321 : vector<1x32xf32>
    %323 = math.rsqrt %322 : vector<1x32xf32>
    %324 = vector.broadcast %323 : vector<1x32xf32> to vector<8x32xf32>
    %325 = arith.mulf %318, %324 : vector<8x32xf32>
    %c0_272 = arith.constant 0 : index
    %c0_273 = arith.constant 0 : index
    %326 = vector.load %arg26[%c0_272, %c0_273] : memref<1x32xf32, #tpu.memory_space<vmem>>, vector<1x32xf32>
    %327 = vector.broadcast %326 : vector<1x32xf32> to vector<8x32xf32>
    %328 = arith.mulf %325, %327 : vector<8x32xf32>
    %c0_274 = arith.constant 0 : index
    %c0_275 = arith.constant 0 : index
    %329 = vector.load %arg21[%c0_274, %c0_275] : memref<1x32xf32, #tpu.memory_space<vmem>>, vector<1x32xf32>
    %330 = vector.broadcast %329 : vector<1x32xf32> to vector<8x32xf32>
    %331 = arith.addf %328, %330 : vector<8x32xf32>
    %cst_276 = arith.constant 0.000000e+00 : f32
    %332 = vector.broadcast %cst_276 : f32 to vector<8x32xf32>
    %333 = arith.maximumf %331, %332 : vector<8x32xf32>
    %c0_277 = arith.constant 0 : index
    %c0_278 = arith.constant 0 : index
    %c0_279 = arith.constant 0 : index
    %334 = vector.load %arg31[%c0_277, %c0_278, %c0_279] : memref<3x32x32xf32, #tpu.memory_space<vmem>>, vector<1x32x32xf32>
    %335 = vector.shape_cast %334 : vector<1x32x32xf32> to vector<32x32xf32>
    %cst_280 = arith.constant dense<0.000000e+00> : vector<8x32xf32>
    %336 = tpu.matmul %333, %335, %cst_280 {dimension_numbers = #tpu.dot_dimension_numbers<[1], [0], [0], [1], [0, 0, 1, 1], [], []>} : vector<8x32xf32>, vector<32x32xf32>, vector<8x32xf32> -> vector<8x32xf32>
    %c0_281 = arith.constant 0 : index
    %c0_282 = arith.constant 0 : index
    %c0_283 = arith.constant 0 : index
    %337 = vector.load %arg25[%c0_281, %c0_282, %c0_283] : memref<3x8x8xf32, #tpu.memory_space<vmem>>, vector<1x8x8xf32>
    %338 = vector.shape_cast %337 : vector<1x8x8xf32> to vector<8x8xf32>
    %cst_284 = arith.constant dense<0.000000e+00> : vector<8x32xf32>
    %339 = tpu.matmul %338, %336, %cst_284 {dimension_numbers = #tpu.dot_dimension_numbers<[1], [0], [0], [1], [0, 0, 1, 1], [], []>} : vector<8x8xf32>, vector<8x32xf32>, vector<8x32xf32> -> vector<8x32xf32>
    %c1_285 = arith.constant 1 : index
    %c0_286 = arith.constant 0 : index
    %c0_287 = arith.constant 0 : index
    %340 = vector.load %arg31[%c1_285, %c0_286, %c0_287] : memref<3x32x32xf32, #tpu.memory_space<vmem>>, vector<1x32x32xf32>
    %341 = vector.shape_cast %340 : vector<1x32x32xf32> to vector<32x32xf32>
    %cst_288 = arith.constant dense<0.000000e+00> : vector<8x32xf32>
    %342 = tpu.matmul %333, %341, %cst_288 {dimension_numbers = #tpu.dot_dimension_numbers<[1], [0], [0], [1], [0, 0, 1, 1], [], []>} : vector<8x32xf32>, vector<32x32xf32>, vector<8x32xf32> -> vector<8x32xf32>
    %c1_289 = arith.constant 1 : index
    %c0_290 = arith.constant 0 : index
    %c0_291 = arith.constant 0 : index
    %343 = vector.load %arg25[%c1_289, %c0_290, %c0_291] : memref<3x8x8xf32, #tpu.memory_space<vmem>>, vector<1x8x8xf32>
    %344 = vector.shape_cast %343 : vector<1x8x8xf32> to vector<8x8xf32>
    %cst_292 = arith.constant dense<0.000000e+00> : vector<8x32xf32>
    %345 = tpu.matmul %344, %342, %cst_292 {dimension_numbers = #tpu.dot_dimension_numbers<[1], [0], [0], [1], [0, 0, 1, 1], [], []>} : vector<8x8xf32>, vector<8x32xf32>, vector<8x32xf32> -> vector<8x32xf32>
    %346 = arith.addf %339, %345 : vector<8x32xf32>
    %c2_293 = arith.constant 2 : index
    %c0_294 = arith.constant 0 : index
    %c0_295 = arith.constant 0 : index
    %347 = vector.load %arg31[%c2_293, %c0_294, %c0_295] : memref<3x32x32xf32, #tpu.memory_space<vmem>>, vector<1x32x32xf32>
    %348 = vector.shape_cast %347 : vector<1x32x32xf32> to vector<32x32xf32>
    %cst_296 = arith.constant dense<0.000000e+00> : vector<8x32xf32>
    %349 = tpu.matmul %333, %348, %cst_296 {dimension_numbers = #tpu.dot_dimension_numbers<[1], [0], [0], [1], [0, 0, 1, 1], [], []>} : vector<8x32xf32>, vector<32x32xf32>, vector<8x32xf32> -> vector<8x32xf32>
    %c2_297 = arith.constant 2 : index
    %c0_298 = arith.constant 0 : index
    %c0_299 = arith.constant 0 : index
    %350 = vector.load %arg25[%c2_297, %c0_298, %c0_299] : memref<3x8x8xf32, #tpu.memory_space<vmem>>, vector<1x8x8xf32>
    %351 = vector.shape_cast %350 : vector<1x8x8xf32> to vector<8x8xf32>
    %cst_300 = arith.constant dense<0.000000e+00> : vector<8x32xf32>
    %352 = tpu.matmul %351, %349, %cst_300 {dimension_numbers = #tpu.dot_dimension_numbers<[1], [0], [0], [1], [0, 0, 1, 1], [], []>} : vector<8x8xf32>, vector<8x32xf32>, vector<8x32xf32> -> vector<8x32xf32>
    %353 = arith.addf %346, %352 : vector<8x32xf32>
    %cst_301 = arith.constant 1.250000e-01 : f32
    %354 = vector.broadcast %cst_301 : f32 to vector<1x8xf32>
    %cst_302 = arith.constant dense<0.000000e+00> : vector<1x32xf32>
    %355 = tpu.matmul %354, %353, %cst_302 {dimension_numbers = #tpu.dot_dimension_numbers<[1], [0], [0], [1], [0, 0, 1, 1], [], []>} : vector<1x8xf32>, vector<8x32xf32>, vector<1x32xf32> -> vector<1x32xf32>
    %356 = vector.broadcast %355 : vector<1x32xf32> to vector<8x32xf32>
    %357 = arith.subf %353, %356 : vector<8x32xf32>
    %358 = arith.mulf %357, %357 : vector<8x32xf32>
    %cst_303 = arith.constant dense<0.000000e+00> : vector<1x32xf32>
    %359 = tpu.matmul %354, %358, %cst_303 {dimension_numbers = #tpu.dot_dimension_numbers<[1], [0], [0], [1], [0, 0, 1, 1], [], []>} : vector<1x8xf32>, vector<8x32xf32>, vector<1x32xf32> -> vector<1x32xf32>
    %cst_304 = arith.constant 9.99999974E-6 : f32
    %360 = vector.broadcast %cst_304 : f32 to vector<1x32xf32>
    %361 = arith.addf %359, %360 : vector<1x32xf32>
    %362 = math.rsqrt %361 : vector<1x32xf32>
    %363 = vector.broadcast %362 : vector<1x32xf32> to vector<8x32xf32>
    %364 = arith.mulf %357, %363 : vector<8x32xf32>
    %c0_305 = arith.constant 0 : index
    %c0_306 = arith.constant 0 : index
    %365 = vector.load %arg27[%c0_305, %c0_306] : memref<1x32xf32, #tpu.memory_space<vmem>>, vector<1x32xf32>
    %366 = vector.broadcast %365 : vector<1x32xf32> to vector<8x32xf32>
    %367 = arith.mulf %364, %366 : vector<8x32xf32>
    %c0_307 = arith.constant 0 : index
    %c0_308 = arith.constant 0 : index
    %368 = vector.load %arg22[%c0_307, %c0_308] : memref<1x32xf32, #tpu.memory_space<vmem>>, vector<1x32xf32>
    %369 = vector.broadcast %368 : vector<1x32xf32> to vector<8x32xf32>
    %370 = arith.addf %367, %369 : vector<8x32xf32>
    %371 = arith.addf %370, %294 : vector<8x32xf32>
    %cst_309 = arith.constant 0.000000e+00 : f32
    %372 = vector.broadcast %cst_309 : f32 to vector<8x32xf32>
    %373 = arith.maximumf %371, %372 : vector<8x32xf32>
    %c0_310 = arith.constant 0 : index
    %c0_311 = arith.constant 0 : index
    %c0_312 = arith.constant 0 : index
    %374 = vector.load %arg44[%c0_310, %c0_311, %c0_312] : memref<1x32x64xf32, #tpu.memory_space<vmem>>, vector<1x32x64xf32>
    %375 = vector.shape_cast %374 : vector<1x32x64xf32> to vector<32x64xf32>
    %cst_313 = arith.constant dense<0.000000e+00> : vector<8x64xf32>
    %376 = tpu.matmul %373, %375, %cst_313 {dimension_numbers = #tpu.dot_dimension_numbers<[1], [0], [0], [1], [0, 0, 1, 1], [], []>} : vector<8x32xf32>, vector<32x64xf32>, vector<8x64xf32> -> vector<8x64xf32>
    %c0_314 = arith.constant 0 : index
    %c0_315 = arith.constant 0 : index
    %c0_316 = arith.constant 0 : index
    %377 = vector.load %arg41[%c0_314, %c0_315, %c0_316] : memref<1x4x8xf32, #tpu.memory_space<vmem>>, vector<1x4x8xf32>
    %378 = vector.shape_cast %377 : vector<1x4x8xf32> to vector<4x8xf32>
    %cst_317 = arith.constant dense<0.000000e+00> : vector<4x64xf32>
    %379 = tpu.matmul %378, %376, %cst_317 {dimension_numbers = #tpu.dot_dimension_numbers<[1], [0], [0], [1], [0, 0, 1, 1], [], []>} : vector<4x8xf32>, vector<8x64xf32>, vector<4x64xf32> -> vector<4x64xf32>
    %cst_318 = arith.constant 2.500000e-01 : f32
    %380 = vector.broadcast %cst_318 : f32 to vector<1x4xf32>
    %cst_319 = arith.constant dense<0.000000e+00> : vector<1x64xf32>
    %381 = tpu.matmul %380, %379, %cst_319 {dimension_numbers = #tpu.dot_dimension_numbers<[1], [0], [0], [1], [0, 0, 1, 1], [], []>} : vector<1x4xf32>, vector<4x64xf32>, vector<1x64xf32> -> vector<1x64xf32>
    %382 = vector.broadcast %381 : vector<1x64xf32> to vector<4x64xf32>
    %383 = arith.subf %379, %382 : vector<4x64xf32>
    %384 = arith.mulf %383, %383 : vector<4x64xf32>
    %cst_320 = arith.constant dense<0.000000e+00> : vector<1x64xf32>
    %385 = tpu.matmul %380, %384, %cst_320 {dimension_numbers = #tpu.dot_dimension_numbers<[1], [0], [0], [1], [0, 0, 1, 1], [], []>} : vector<1x4xf32>, vector<4x64xf32>, vector<1x64xf32> -> vector<1x64xf32>
    %cst_321 = arith.constant 9.99999974E-6 : f32
    %386 = vector.broadcast %cst_321 : f32 to vector<1x64xf32>
    %387 = arith.addf %385, %386 : vector<1x64xf32>
    %388 = math.rsqrt %387 : vector<1x64xf32>
    %389 = vector.broadcast %388 : vector<1x64xf32> to vector<4x64xf32>
    %390 = arith.mulf %383, %389 : vector<4x64xf32>
    %c0_322 = arith.constant 0 : index
    %c0_323 = arith.constant 0 : index
    %391 = vector.load %arg40[%c0_322, %c0_323] : memref<1x64xf32, #tpu.memory_space<vmem>>, vector<1x64xf32>
    %392 = vector.broadcast %391 : vector<1x64xf32> to vector<4x64xf32>
    %393 = arith.mulf %390, %392 : vector<4x64xf32>
    %c0_324 = arith.constant 0 : index
    %c0_325 = arith.constant 0 : index
    %394 = vector.load %arg35[%c0_324, %c0_325] : memref<1x64xf32, #tpu.memory_space<vmem>>, vector<1x64xf32>
    %395 = vector.broadcast %394 : vector<1x64xf32> to vector<4x64xf32>
    %396 = arith.addf %393, %395 : vector<4x64xf32>
    %c0_326 = arith.constant 0 : index
    %c0_327 = arith.constant 0 : index
    %c0_328 = arith.constant 0 : index
    %397 = vector.load %arg42[%c0_326, %c0_327, %c0_328] : memref<3x32x64xf32, #tpu.memory_space<vmem>>, vector<1x32x64xf32>
    %398 = vector.shape_cast %397 : vector<1x32x64xf32> to vector<32x64xf32>
    %cst_329 = arith.constant dense<0.000000e+00> : vector<8x64xf32>
    %399 = tpu.matmul %373, %398, %cst_329 {dimension_numbers = #tpu.dot_dimension_numbers<[1], [0], [0], [1], [0, 0, 1, 1], [], []>} : vector<8x32xf32>, vector<32x64xf32>, vector<8x64xf32> -> vector<8x64xf32>
    %c0_330 = arith.constant 0 : index
    %c0_331 = arith.constant 0 : index
    %c0_332 = arith.constant 0 : index
    %400 = vector.load %arg36[%c0_330, %c0_331, %c0_332] : memref<3x4x8xf32, #tpu.memory_space<vmem>>, vector<1x4x8xf32>
    %401 = vector.shape_cast %400 : vector<1x4x8xf32> to vector<4x8xf32>
    %cst_333 = arith.constant dense<0.000000e+00> : vector<4x64xf32>
    %402 = tpu.matmul %401, %399, %cst_333 {dimension_numbers = #tpu.dot_dimension_numbers<[1], [0], [0], [1], [0, 0, 1, 1], [], []>} : vector<4x8xf32>, vector<8x64xf32>, vector<4x64xf32> -> vector<4x64xf32>
    %c1_334 = arith.constant 1 : index
    %c0_335 = arith.constant 0 : index
    %c0_336 = arith.constant 0 : index
    %403 = vector.load %arg42[%c1_334, %c0_335, %c0_336] : memref<3x32x64xf32, #tpu.memory_space<vmem>>, vector<1x32x64xf32>
    %404 = vector.shape_cast %403 : vector<1x32x64xf32> to vector<32x64xf32>
    %cst_337 = arith.constant dense<0.000000e+00> : vector<8x64xf32>
    %405 = tpu.matmul %373, %404, %cst_337 {dimension_numbers = #tpu.dot_dimension_numbers<[1], [0], [0], [1], [0, 0, 1, 1], [], []>} : vector<8x32xf32>, vector<32x64xf32>, vector<8x64xf32> -> vector<8x64xf32>
    %c1_338 = arith.constant 1 : index
    %c0_339 = arith.constant 0 : index
    %c0_340 = arith.constant 0 : index
    %406 = vector.load %arg36[%c1_338, %c0_339, %c0_340] : memref<3x4x8xf32, #tpu.memory_space<vmem>>, vector<1x4x8xf32>
    %407 = vector.shape_cast %406 : vector<1x4x8xf32> to vector<4x8xf32>
    %cst_341 = arith.constant dense<0.000000e+00> : vector<4x64xf32>
    %408 = tpu.matmul %407, %405, %cst_341 {dimension_numbers = #tpu.dot_dimension_numbers<[1], [0], [0], [1], [0, 0, 1, 1], [], []>} : vector<4x8xf32>, vector<8x64xf32>, vector<4x64xf32> -> vector<4x64xf32>
    %409 = arith.addf %402, %408 : vector<4x64xf32>
    %c2_342 = arith.constant 2 : index
    %c0_343 = arith.constant 0 : index
    %c0_344 = arith.constant 0 : index
    %410 = vector.load %arg42[%c2_342, %c0_343, %c0_344] : memref<3x32x64xf32, #tpu.memory_space<vmem>>, vector<1x32x64xf32>
    %411 = vector.shape_cast %410 : vector<1x32x64xf32> to vector<32x64xf32>
    %cst_345 = arith.constant dense<0.000000e+00> : vector<8x64xf32>
    %412 = tpu.matmul %373, %411, %cst_345 {dimension_numbers = #tpu.dot_dimension_numbers<[1], [0], [0], [1], [0, 0, 1, 1], [], []>} : vector<8x32xf32>, vector<32x64xf32>, vector<8x64xf32> -> vector<8x64xf32>
    %c2_346 = arith.constant 2 : index
    %c0_347 = arith.constant 0 : index
    %c0_348 = arith.constant 0 : index
    %413 = vector.load %arg36[%c2_346, %c0_347, %c0_348] : memref<3x4x8xf32, #tpu.memory_space<vmem>>, vector<1x4x8xf32>
    %414 = vector.shape_cast %413 : vector<1x4x8xf32> to vector<4x8xf32>
    %cst_349 = arith.constant dense<0.000000e+00> : vector<4x64xf32>
    %415 = tpu.matmul %414, %412, %cst_349 {dimension_numbers = #tpu.dot_dimension_numbers<[1], [0], [0], [1], [0, 0, 1, 1], [], []>} : vector<4x8xf32>, vector<8x64xf32>, vector<4x64xf32> -> vector<4x64xf32>
    %416 = arith.addf %409, %415 : vector<4x64xf32>
    %cst_350 = arith.constant 2.500000e-01 : f32
    %417 = vector.broadcast %cst_350 : f32 to vector<1x4xf32>
    %cst_351 = arith.constant dense<0.000000e+00> : vector<1x64xf32>
    %418 = tpu.matmul %417, %416, %cst_351 {dimension_numbers = #tpu.dot_dimension_numbers<[1], [0], [0], [1], [0, 0, 1, 1], [], []>} : vector<1x4xf32>, vector<4x64xf32>, vector<1x64xf32> -> vector<1x64xf32>
    %419 = vector.broadcast %418 : vector<1x64xf32> to vector<4x64xf32>
    %420 = arith.subf %416, %419 : vector<4x64xf32>
    %421 = arith.mulf %420, %420 : vector<4x64xf32>
    %cst_352 = arith.constant dense<0.000000e+00> : vector<1x64xf32>
    %422 = tpu.matmul %417, %421, %cst_352 {dimension_numbers = #tpu.dot_dimension_numbers<[1], [0], [0], [1], [0, 0, 1, 1], [], []>} : vector<1x4xf32>, vector<4x64xf32>, vector<1x64xf32> -> vector<1x64xf32>
    %cst_353 = arith.constant 9.99999974E-6 : f32
    %423 = vector.broadcast %cst_353 : f32 to vector<1x64xf32>
    %424 = arith.addf %422, %423 : vector<1x64xf32>
    %425 = math.rsqrt %424 : vector<1x64xf32>
    %426 = vector.broadcast %425 : vector<1x64xf32> to vector<4x64xf32>
    %427 = arith.mulf %420, %426 : vector<4x64xf32>
    %c0_354 = arith.constant 0 : index
    %c0_355 = arith.constant 0 : index
    %428 = vector.load %arg38[%c0_354, %c0_355] : memref<1x64xf32, #tpu.memory_space<vmem>>, vector<1x64xf32>
    %429 = vector.broadcast %428 : vector<1x64xf32> to vector<4x64xf32>
    %430 = arith.mulf %427, %429 : vector<4x64xf32>
    %c0_356 = arith.constant 0 : index
    %c0_357 = arith.constant 0 : index
    %431 = vector.load %arg33[%c0_356, %c0_357] : memref<1x64xf32, #tpu.memory_space<vmem>>, vector<1x64xf32>
    %432 = vector.broadcast %431 : vector<1x64xf32> to vector<4x64xf32>
    %433 = arith.addf %430, %432 : vector<4x64xf32>
    %cst_358 = arith.constant 0.000000e+00 : f32
    %434 = vector.broadcast %cst_358 : f32 to vector<4x64xf32>
    %435 = arith.maximumf %433, %434 : vector<4x64xf32>
    %c0_359 = arith.constant 0 : index
    %c0_360 = arith.constant 0 : index
    %c0_361 = arith.constant 0 : index
    %436 = vector.load %arg43[%c0_359, %c0_360, %c0_361] : memref<3x64x64xf32, #tpu.memory_space<vmem>>, vector<1x64x64xf32>
    %437 = vector.shape_cast %436 : vector<1x64x64xf32> to vector<64x64xf32>
    %cst_362 = arith.constant dense<0.000000e+00> : vector<4x64xf32>
    %438 = tpu.matmul %435, %437, %cst_362 {dimension_numbers = #tpu.dot_dimension_numbers<[1], [0], [0], [1], [0, 0, 1, 1], [], []>} : vector<4x64xf32>, vector<64x64xf32>, vector<4x64xf32> -> vector<4x64xf32>
    %c0_363 = arith.constant 0 : index
    %c0_364 = arith.constant 0 : index
    %c0_365 = arith.constant 0 : index
    %439 = vector.load %arg37[%c0_363, %c0_364, %c0_365] : memref<3x4x4xf32, #tpu.memory_space<vmem>>, vector<1x4x4xf32>
    %440 = vector.shape_cast %439 : vector<1x4x4xf32> to vector<4x4xf32>
    %cst_366 = arith.constant dense<0.000000e+00> : vector<4x64xf32>
    %441 = tpu.matmul %440, %438, %cst_366 {dimension_numbers = #tpu.dot_dimension_numbers<[1], [0], [0], [1], [0, 0, 1, 1], [], []>} : vector<4x4xf32>, vector<4x64xf32>, vector<4x64xf32> -> vector<4x64xf32>
    %c1_367 = arith.constant 1 : index
    %c0_368 = arith.constant 0 : index
    %c0_369 = arith.constant 0 : index
    %442 = vector.load %arg43[%c1_367, %c0_368, %c0_369] : memref<3x64x64xf32, #tpu.memory_space<vmem>>, vector<1x64x64xf32>
    %443 = vector.shape_cast %442 : vector<1x64x64xf32> to vector<64x64xf32>
    %cst_370 = arith.constant dense<0.000000e+00> : vector<4x64xf32>
    %444 = tpu.matmul %435, %443, %cst_370 {dimension_numbers = #tpu.dot_dimension_numbers<[1], [0], [0], [1], [0, 0, 1, 1], [], []>} : vector<4x64xf32>, vector<64x64xf32>, vector<4x64xf32> -> vector<4x64xf32>
    %c1_371 = arith.constant 1 : index
    %c0_372 = arith.constant 0 : index
    %c0_373 = arith.constant 0 : index
    %445 = vector.load %arg37[%c1_371, %c0_372, %c0_373] : memref<3x4x4xf32, #tpu.memory_space<vmem>>, vector<1x4x4xf32>
    %446 = vector.shape_cast %445 : vector<1x4x4xf32> to vector<4x4xf32>
    %cst_374 = arith.constant dense<0.000000e+00> : vector<4x64xf32>
    %447 = tpu.matmul %446, %444, %cst_374 {dimension_numbers = #tpu.dot_dimension_numbers<[1], [0], [0], [1], [0, 0, 1, 1], [], []>} : vector<4x4xf32>, vector<4x64xf32>, vector<4x64xf32> -> vector<4x64xf32>
    %448 = arith.addf %441, %447 : vector<4x64xf32>
    %c2_375 = arith.constant 2 : index
    %c0_376 = arith.constant 0 : index
    %c0_377 = arith.constant 0 : index
    %449 = vector.load %arg43[%c2_375, %c0_376, %c0_377] : memref<3x64x64xf32, #tpu.memory_space<vmem>>, vector<1x64x64xf32>
    %450 = vector.shape_cast %449 : vector<1x64x64xf32> to vector<64x64xf32>
    %cst_378 = arith.constant dense<0.000000e+00> : vector<4x64xf32>
    %451 = tpu.matmul %435, %450, %cst_378 {dimension_numbers = #tpu.dot_dimension_numbers<[1], [0], [0], [1], [0, 0, 1, 1], [], []>} : vector<4x64xf32>, vector<64x64xf32>, vector<4x64xf32> -> vector<4x64xf32>
    %c2_379 = arith.constant 2 : index
    %c0_380 = arith.constant 0 : index
    %c0_381 = arith.constant 0 : index
    %452 = vector.load %arg37[%c2_379, %c0_380, %c0_381] : memref<3x4x4xf32, #tpu.memory_space<vmem>>, vector<1x4x4xf32>
    %453 = vector.shape_cast %452 : vector<1x4x4xf32> to vector<4x4xf32>
    %cst_382 = arith.constant dense<0.000000e+00> : vector<4x64xf32>
    %454 = tpu.matmul %453, %451, %cst_382 {dimension_numbers = #tpu.dot_dimension_numbers<[1], [0], [0], [1], [0, 0, 1, 1], [], []>} : vector<4x4xf32>, vector<4x64xf32>, vector<4x64xf32> -> vector<4x64xf32>
    %455 = arith.addf %448, %454 : vector<4x64xf32>
    %cst_383 = arith.constant 2.500000e-01 : f32
    %456 = vector.broadcast %cst_383 : f32 to vector<1x4xf32>
    %cst_384 = arith.constant dense<0.000000e+00> : vector<1x64xf32>
    %457 = tpu.matmul %456, %455, %cst_384 {dimension_numbers = #tpu.dot_dimension_numbers<[1], [0], [0], [1], [0, 0, 1, 1], [], []>} : vector<1x4xf32>, vector<4x64xf32>, vector<1x64xf32> -> vector<1x64xf32>
    %458 = vector.broadcast %457 : vector<1x64xf32> to vector<4x64xf32>
    %459 = arith.subf %455, %458 : vector<4x64xf32>
    %460 = arith.mulf %459, %459 : vector<4x64xf32>
    %cst_385 = arith.constant dense<0.000000e+00> : vector<1x64xf32>
    %461 = tpu.matmul %456, %460, %cst_385 {dimension_numbers = #tpu.dot_dimension_numbers<[1], [0], [0], [1], [0, 0, 1, 1], [], []>} : vector<1x4xf32>, vector<4x64xf32>, vector<1x64xf32> -> vector<1x64xf32>
    %cst_386 = arith.constant 9.99999974E-6 : f32
    %462 = vector.broadcast %cst_386 : f32 to vector<1x64xf32>
    %463 = arith.addf %461, %462 : vector<1x64xf32>
    %464 = math.rsqrt %463 : vector<1x64xf32>
    %465 = vector.broadcast %464 : vector<1x64xf32> to vector<4x64xf32>
    %466 = arith.mulf %459, %465 : vector<4x64xf32>
    %c0_387 = arith.constant 0 : index
    %c0_388 = arith.constant 0 : index
    %467 = vector.load %arg39[%c0_387, %c0_388] : memref<1x64xf32, #tpu.memory_space<vmem>>, vector<1x64xf32>
    %468 = vector.broadcast %467 : vector<1x64xf32> to vector<4x64xf32>
    %469 = arith.mulf %466, %468 : vector<4x64xf32>
    %c0_389 = arith.constant 0 : index
    %c0_390 = arith.constant 0 : index
    %470 = vector.load %arg34[%c0_389, %c0_390] : memref<1x64xf32, #tpu.memory_space<vmem>>, vector<1x64xf32>
    %471 = vector.broadcast %470 : vector<1x64xf32> to vector<4x64xf32>
    %472 = arith.addf %469, %471 : vector<4x64xf32>
    %473 = arith.addf %472, %396 : vector<4x64xf32>
    %cst_391 = arith.constant 0.000000e+00 : f32
    %474 = vector.broadcast %cst_391 : f32 to vector<4x64xf32>
    %475 = arith.maximumf %473, %474 : vector<4x64xf32>
    %c0_392 = arith.constant 0 : index
    %c0_393 = arith.constant 0 : index
    %476 = vector.load %arg46[%c0_392, %c0_393] : memref<2x4xf32, #tpu.memory_space<vmem>>, vector<2x4xf32>
    %cst_394 = arith.constant dense<0.000000e+00> : vector<2x64xf32>
    %477 = tpu.matmul %476, %475, %cst_394 {dimension_numbers = #tpu.dot_dimension_numbers<[1], [0], [0], [1], [0, 0, 1, 1], [], []>} : vector<2x4xf32>, vector<4x64xf32>, vector<2x64xf32> -> vector<2x64xf32>
    %c0_395 = arith.constant 0 : index
    %c0_396 = arith.constant 0 : index
    %478 = vector.load %arg47[%c0_395, %c0_396] : memref<64x2xf32, #tpu.memory_space<vmem>>, vector<64x2xf32>
    %cst_397 = arith.constant dense<0.000000e+00> : vector<2x2xf32>
    %479 = tpu.matmul %477, %478, %cst_397 {dimension_numbers = #tpu.dot_dimension_numbers<[1], [0], [0], [1], [0, 0, 1, 1], [], []>} : vector<2x64xf32>, vector<64x2xf32>, vector<2x2xf32> -> vector<2x2xf32>
    %c0_398 = arith.constant 0 : index
    %c0_399 = arith.constant 0 : index
    %480 = vector.load %arg45[%c0_398, %c0_399] : memref<1x2xf32, #tpu.memory_space<vmem>>, vector<1x2xf32>
    %481 = vector.broadcast %480 : vector<1x2xf32> to vector<2x2xf32>
    %482 = arith.addf %479, %481 : vector<2x2xf32>
    %483 = vector.extract_strided_slice %482 {offsets = [0, 0], sizes = [2, 1], strides = [1, 1]} : vector<2x2xf32> to vector<2x1xf32>
    %c0_400 = arith.constant 0 : index
    %c0_401 = arith.constant 0 : index
    %484 = vector.load %arg54[%c0_400, %c0_401] : memref<2x1xf32, #tpu.memory_space<vmem>>, vector<2x1xf32>
    tpu.vector_store %arg54[%c0_400, %c0_401], %483 {strides = array<i32>} : memref<2x1xf32, #tpu.memory_space<vmem>>, vector<2x1xf32>,
    %485 = vector.extract_strided_slice %482 {offsets = [0, 1], sizes = [2, 1], strides = [1, 1]} : vector<2x2xf32> to vector<2x1xf32>
    %c0_402 = arith.constant 0 : index
    %c0_403 = arith.constant 0 : index
    %486 = vector.load %arg55[%c0_402, %c0_403] : memref<2x1xf32, #tpu.memory_space<vmem>>, vector<2x1xf32>
    tpu.vector_store %arg55[%c0_402, %c0_403], %485 {strides = array<i32>} : memref<2x1xf32, #tpu.memory_space<vmem>>, vector<2x1xf32>,
    return
  }
}

</mosaic_0001>

<bundles_post_ra>
// kernel: bpnet_forward.1
= control target key start
LH: loop header
LB: loop body
LE: loop exit
PB: predicated region body
PF: predicated region fallthrough
CT: control target
= control target key end

     0   :  { %s13430_s6 = smov 1   ;;  %s13431_s10 = smov 2   ;;  %s15091_s0 = inlined_call_operand.smem [shape: u32[56], index: -1, kind: input, shape index: {}] }
   0x1   :  { %s13552_s5 = sld [smem:[%s15091_s0]]   ;;  %s13432_s14 = smov 3  }
   0x2   :  { %s13557_s9 = sld [smem:[%s15091_s0 + %s13430_s6]]   ;;  %s13433_s18 = smov 4  }
   0x3   :  { %s13562_s13 = sld [smem:[%s15091_s0 + %s13431_s10]]   ;;  %s13434_s22 = smov 5  }
   0x4   :  { %s13567_s17 = sld [smem:[%s15091_s0 + %s13432_s14]]   ;;  %s13435_s26 = smov 6  }
   0x5   :  { %s13572_s21 = sld [smem:[%s15091_s0 + %s13433_s18]]   ;;  %s13436_s30 = smov 7  }
   0x6   :  { %s13577_s25 = sld [smem:[%s15091_s0 + %s13434_s22]]   ;;  %s13437_s4 = smov 8  }
   0x7   :  { %15098 = sst [smem:[#allocation96_spill]] %s13552_s5  ;;  %s13438_s10 = smov 9  }
   0x8   :  { %15099 = sst [smem:[#allocation97_spill]] %s13557_s9  ;;  %s13439_s15 = smov 10  }
   0x9   :  { %s13582_s29 = sld [smem:[%s15091_s0 + %s13435_s26]]   ;;  %s13440_s20 = smov 11  }
   0xa   :  { %15100 = sst [smem:[#allocation98_spill]] %s13567_s17  ;;  %s13441_s26 = smov 12  }
   0xb   :  { %15101 = sst [smem:[#allocation99_spill]] %s13572_s21  ;;  %s13442_s1 = smov 13  }
   0xc   :  { %s13587_s3 = sld [smem:[%s15091_s0 + %s13436_s30]]   ;;  %s13443_s7 = smov 14  }
   0xd   :  { %s13592_s8 = sld [smem:[%s15091_s0 + %s13437_s4]]   ;;  %s13445_s22 = smov 16  }
   0xe   :  { %s13597_s14 = sld [smem:[%s15091_s0 + %s13438_s10]]   ;;  %s13446_s28 = smov 17  }
   0xf   :  { %15102 = sst [smem:[#allocation100_spill]] %s13582_s29 }
  0x10   :  { %s13602_s19 = sld [smem:[%s15091_s0 + %s13439_s15]]   ;;  %s13444_s15 = smov 15  }
  0x11   :  { %s13607_s24 = sld [smem:[%s15091_s0 + %s13440_s20]]  }
  0x12   :  { %s13612_s30 = sld [smem:[%s15091_s0 + %s13441_s26]]  }
  0x13   :  { %15103 = sst [smem:[#allocation101_spill]] %s13592_s8 }
  0x14   :  { %s13617_s6 = sld [smem:[%s15091_s0 + %s13442_s1]]  }
  0x15   :  { %s13622_s12 = sld [smem:[%s15091_s0 + %s13443_s7]]   ;;  %s13447_s7 = smov 18  }
  0x16   :  { %15104 = sst [smem:[#allocation102_spill]] %s13602_s19 }
  0x17   :  { %s13627_s20 = sld [smem:[%s15091_s0 + %s13444_s15]]   ;;  %s13448_s15 = smov 19  }
  0x18   :  { %15105 = sst [smem:[#allocation103_spill]] %s13612_s30 }
  0x19   :  { %s13632_s27 = sld [smem:[%s15091_s0 + %s13445_s22]]   ;;  %s13449_s22 = smov 20  }
  0x1a   :  { %s13637_s4 = sld [smem:[%s15091_s0 + %s13446_s28]]   ;;  %s13450_s28 = smov 21  }
  0x1b   :  { %15106 = sst [smem:[#allocation104_spill]] %s13622_s12 }
  0x1c   :  { %s13642_s17 = sld [smem:[%s15091_s0 + %s13447_s7]]   ;;  %s13451_s7 = smov 22  }
  0x1d   :  { %s13647_s5 = sld [smem:[%s15091_s0 + %s13448_s15]]   ;;  %s13452_s15 = smov 23  }
  0x1e   :  { %s13657_s12 = sld [smem:[%s15091_s0 + %s13450_s28]]   ;;  %s13454_s28 = smov 25  }
  0x1f   :  { %15107 = sst [smem:[#allocation105_spill]] %s13632_s27 }
  0x20   :  { %s13652_s27 = sld [smem:[%s15091_s0 + %s13449_s22]]   ;;  %s13453_s22 = smov 24  }
  0x21   :  { %s13667_s30 = sld [smem:[%s15091_s0 + %s13452_s15]]   ;;  %s13456_s15 = smov 27  }
  0x22   :  { %15108 = sst [smem:[#allocation106_spill]] %s13642_s17 }
  0x23   :  { %s13662_s17 = sld [smem:[%s15091_s0 + %s13451_s7]]   ;;  %s13455_s7 = smov 26  }
  0x24   :  { %s13677_s19 = sld [smem:[%s15091_s0 + %s13454_s28]]   ;;  %s13458_s28 = smov 29  }
  0x25   :  { %s13687_s8 = sld [smem:[%s15091_s0 + %s13456_s15]]   ;;  %s13460_s15 = smov 31  }
  0x26   :  { %15109 = sst [smem:[#allocation107_spill]] %s13652_s27 }
  0x27   :  { %s13672_s27 = sld [smem:[%s15091_s0 + %s13453_s22]]   ;;  %s13457_s22 = smov 28  }
  0x28   :  { %s13697_s29 = sld [smem:[%s15091_s0 + %s13458_s28]]   ;;  %s13462_s28 = smov 33  }
  0x29   :  { %15110 = sst [smem:[#allocation108_spill]] %s13662_s17 }
  0x2a   :  { %s13682_s17 = sld [smem:[%s15091_s0 + %s13455_s7]]   ;;  %s13459_s7 = smov 30  }
  0x2b   :  { %s13707_s21 = sld [smem:[%s15091_s0 + %s13460_s15]]   ;;  %s13464_s15 = smov 35  }
  0x2c   :  { %s13717_s9 = sld [smem:[%s15091_s0 + %s13462_s28]]   ;;  %s13466_s28 = smov 37  }
  0x2d   :  { %15111 = sst [smem:[#allocation109_spill]] %s13672_s27 }
  0x2e   :  { %s13692_s27 = sld [smem:[%s15091_s0 + %s13457_s22]]   ;;  %s13461_s22 = smov 32  }
  0x30   :  { %15112 = sst [smem:[#allocation110_spill]] %s13682_s17 }
  0x31   :  { %s13702_s17 = sld [smem:[%s15091_s0 + %s13459_s7]]   ;;  %s13463_s7 = smov 34  }
  0x32   :  { %15115 = sst [smem:[#allocation113_spill]] %s13707_s21 }
  0x33   :  { %15117 = sst [smem:[#allocation115_spill]] %s13717_s9 }
  0x34   :  { %15113 = sst [smem:[#allocation111_spill]] %s13692_s27 }
  0x35   :  { %s13712_s27 = sld [smem:[%s15091_s0 + %s13461_s22]]   ;;  %s13465_s22 = smov 36  }
  0x36   :  { %s13727_s21 = sld [smem:[%s15091_s0 + %s13464_s15]]   ;;  %s13468_s15 = smov 39  }
  0x37   :  { %15114 = sst [smem:[#allocation112_spill]] %s13702_s17 }
  0x38   :  { %s13722_s17 = sld [smem:[%s15091_s0 + %s13463_s7]]   ;;  %s13467_s7 = smov 38  }
  0x39   :  { %s13737_s9 = sld [smem:[%s15091_s0 + %s13466_s28]]   ;;  %s13470_s28 = smov 41  }
  0x3b   :  { %15116 = sst [smem:[#allocation114_spill]] %s13712_s27 }
  0x3c   :  { %15119 = sst [smem:[#allocation117_spill]] %s13727_s21 }
  0x3d   :  { %s13732_s27 = sld [smem:[%s15091_s0 + %s13465_s22]]   ;;  %s13469_s22 = smov 40  }
  0x3e   :  { %15118 = sst [smem:[#allocation116_spill]] %s13722_s17 }
  0x3f   :  { %15121 = sst [smem:[#allocation119_spill]] %s13737_s9 }
  0x40   :  { %s13742_s17 = sld [smem:[%s15091_s0 + %s13467_s7]]   ;;  %s13471_s7 = smov 42  }
  0x41   :  { %s13747_s21 = sld [smem:[%s15091_s0 + %s13468_s15]]   ;;  %s13472_s15 = smov 43  }
  0x42   :  { %s13757_s9 = sld [smem:[%s15091_s0 + %s13470_s28]]   ;;  %s13474_s28 = smov 45  }
  0x43   :  { %15120 = sst [smem:[#allocation118_spill]] %s13732_s27 }
  0x44   :  { %s13752_s27 = sld [smem:[%s15091_s0 + %s13469_s22]]   ;;  %s13473_s22 = smov 44  }
  0x46   :  { %15122 = sst [smem:[#allocation120_spill]] %s13742_s17 }
  0x47   :  { %15123 = sst [smem:[#allocation121_spill]] %s13747_s21 }
  0x48   :  { %15125 = sst [smem:[#allocation123_spill]] %s13757_s9 }
  0x49   :  { %s13762_s17 = sld [smem:[%s15091_s0 + %s13471_s7]]   ;;  %s13475_s7 = smov 46  }
  0x4a   :  { %15124 = sst [smem:[#allocation122_spill]] %s13752_s27 }
  0x4b   :  { %s13767_s21 = sld [smem:[%s15091_s0 + %s13472_s15]]   ;;  %s13476_s15 = smov 47  }
  0x4c   :  { %s13772_s27 = sld [smem:[%s15091_s0 + %s13473_s22]]   ;;  %s13477_s22 = smov 48  }
  0x4d   :  { %s13777_s9 = sld [smem:[%s15091_s0 + %s13474_s28]]   ;;  %s13478_s28 = smov 49  }
  0x4f   :  { %15126 = sst [smem:[#allocation124_spill]] %s13762_s17 }
  0x50   :  { %s13782_s17 = sld [smem:[%s15091_s0 + %s13475_s7]]   ;;  %s13479_s7 = smov 50  }
  0x51   :  { %15127 = sst [smem:[#allocation125_spill]] %s13767_s21 }
  0x52   :  { %15128 = sst [smem:[#allocation126_spill]] %s13772_s27 }
  0x53   :  { %15129 = sst [smem:[#allocation127_spill]] %s13777_s9 }
  0x54   :  { %s13787_s21 = sld [smem:[%s15091_s0 + %s13476_s15]]   ;;  %s13480_s15 = smov 51  }
  0x55   :  { %s13792_s27 = sld [smem:[%s15091_s0 + %s13477_s22]]   ;;  %s13481_s22 = smov 52  }
  0x56   :  { %15130 = sst [smem:[#allocation128_spill]] %s13782_s17 }
  0x57   :  { %s13797_s9 = sld [smem:[%s15091_s0 + %s13478_s28]]   ;;  %s13482_s28 = smov 53  }
  0x58   :  { %s13802_s17 = sld [smem:[%s15091_s0 + %s13479_s7]]   ;;  %s13483_s7 = smov 54  }
  0x5a   :  { %15131 = sst [smem:[#allocation129_spill]] %s13787_s21 }
  0x5b   :  { %15132 = sst [smem:[#allocation130_spill]] %s13792_s27 }
  0x5c   :  { %s13807_s21 = sld [smem:[%s15091_s0 + %s13480_s15]]   ;;  %s13484_s15 = smov 55  }
  0x5d   :  { %15133 = sst [smem:[#allocation131_spill]] %s13797_s9 }
  0x5e   :  { %15134 = sst [smem:[#allocation132_spill]] %s13802_s17 }
  0x5f   :  { %s13812_s27 = sld [smem:[%s15091_s0 + %s13481_s22]]  }
  0x60   :  { %s13817_s9 = sld [smem:[%s15091_s0 + %s13482_s28]]  }
  0x61   :  { %s13822_s17 = sld [smem:[%s15091_s0 + %s13483_s7]]  }
  0x62   :  { %15135 = sst [smem:[#allocation133_spill]] %s13807_s21 }
  0x63   :  { %s13827_s21 = sld [smem:[%s15091_s0 + %s13484_s15]]  }
  0x64   :  { %117 = vsyncpa [#allocation3], 0 }
  0x65   :  { %118 = vsyncpa [#allocation5], 0 }
  0x66   :  { %119 = vsyncpa [#allocation8], 0 }
  0x67   :  { %120 = vsyncpa [#allocation11], 0 }
  0x68   :  { %121 = vsyncpa [#allocation14], 0 }
  0x69   :  { %122 = vsyncpa [#allocation17], 0 }
  0x6a   :  { %123 = vsyncpa [#allocation20], 0 }
  0x6b   :  { %124 = vsyncpa [#allocation23], 0 }
  0x6c   :  { %125 = vsyncpa [#allocation26], 0 }
  0x6d   :  { %126 = vsyncpa [#allocation29], 0 }
  0x6e   :  { %127 = vsyncpa [#allocation32], 0 }
  0x6f   :  { %128 = vsyncpa [#allocation35], 0 }
  0x70   :  { %129 = vsyncpa [#allocation38], 0 }
  0x71   :  { %130 = vsyncpa [#allocation41], 0 }
  0x72   :  { %131 = vsyncpa [#allocation44], 0 }
  0x73   :  { %132 = vsyncpa [#allocation47], 0 }
  0x74   :  { %133 = vsyncpa [#allocation50], 0 }
  0x75   :  { %134 = vsyncpa [#allocation53], 0 }
  0x76   :  { %135 = vsyncpa [#allocation56], 0 }
  0x77   :  { %136 = vsyncpa [#allocation59], 0 }
  0x78   :  { %137 = vsyncpa [#allocation62], 0 }
  0x79   :  { %138 = vsyncpa [#allocation65], 0 }
  0x7a   :  { %139 = vsyncpa [#allocation68], 0 }
  0x7b   :  { %140 = vsyncpa [#allocation71], 0  ;;  %s13485_s0 = smov [#allocation4]   ;;  %s13486_s23 = smov [#allocation7]  }
  0x7c   :  { %s159_s22 = sshll.u32 %s13485_s0, 4  ;;  %s183_s26 = sshll.u32 %s13486_s23, 4  ;;  %s160_s22 = int_to_ptr.vmem [resolvable:$true] %s159_s22  ;;  %s184_s26 = int_to_ptr.vmem [resolvable:$true] %s183_s26 }
  0x7d   :  { %s12470_s28 = scalar_lea.vmem %s160_s22, 16  ;;  %s12474_s1 = scalar_lea.vmem %s160_s22, 32 }
  0x7e   :  { %p12471_p0 = scmp.ne.s32.totalorder %s160_s22, %s12470_s28  ;;  %p12475_p1 = scmp.lt.s32.totalorder %s160_s22, %s160_s22 }
  0x7f   :  { %p12476_p2 = scmp.lt.s32.totalorder %s12474_s1, %s12470_s28 }
  0x81   :  { %p12477_p3 = por %p12476_p2, %p12475_p1 }
  0x83   :  { %p12478_p4 = pnand %p12477_p3, %p12471_p0 }
  0x85   :  { %12481 = shalt.err (!%p12478_p4)
}
  0x86   :  { %162 = dma.hbm_to_vmem [thread:$0]  %s13562_s13, 16, %s160_s22, [#allocation5]  }
  0x87   :  { %s12490_s2 = scalar_lea.vmem %s184_s26, 16  ;;  %s12494_s7 = scalar_lea.vmem %s184_s26, 32 }
  0x88   :  { %p12491_p5 = scmp.ne.s32.totalorder %s184_s26, %s12490_s2  ;;  %p12495_p6 = scmp.lt.s32.totalorder %s184_s26, %s184_s26 }
  0x89   :  { %p12496_p7 = scmp.lt.s32.totalorder %s12494_s7, %s12490_s2 }
  0x8b   :  { %p12497_p8 = por %p12496_p7, %p12495_p6 }
  0x8d   :  { %p12498_p9 = pnand %p12497_p8, %p12491_p5 }
  0x8f   :  { %12501 = shalt.err (!%p12498_p9)
}
  0x90   :  { %186 = dma.hbm_to_vmem [thread:$0]  %s13577_s25, 16, %s184_s26, [#allocation8]  }
  0x91   :  { %s13487_s10 = smov [#allocation10]   ;;  %s13488_s15 = smov [#allocation13]  }
  0x92   :  { %s202_s11 = sshll.u32 %s13487_s10, 4  ;;  %s227_s16 = sshll.u32 %s13488_s15, 4  ;;  %s203_s11 = int_to_ptr.vmem [resolvable:$true] %s202_s11  ;;  %s228_s16 = int_to_ptr.vmem [resolvable:$true] %s227_s16 }
  0x93   :  { %s12510_s18 = scalar_lea.vmem %s203_s11, 384  ;;  %p12515_p11 = scmp.lt.s32.totalorder %s203_s11, %s203_s11 }
  0x94   :  { %p12511_p10 = scmp.ne.s32.totalorder %s203_s11, %s12510_s18  ;;  %p12516_p12 = scmp.lt.s32.totalorder %s12510_s18, %s12510_s18 }
  0x96   :  { %p12517_p13 = por %p12516_p12, %p12515_p11 }
  0x98   :  { %p12518_p0 = pnand %p12517_p13, %p12511_p10 }
  0x9a   :  { %12521 = shalt.err (!%p12518_p0)
}
  0x9b   :  { %s13489_s13 = smov 128   ;;  %s13490_s0 = smov 8  }
  0x9c   :  { %208 = dma.hbm_to_vmem [thread:$0]  %s13587_s3, 384, %s203_s11, [#allocation11], %s13489_s13, %s13489_s13, %s13490_s0  }
  0x9d   :  { %s12530_s25 = scalar_lea.vmem %s228_s16, 16  ;;  %s12534_s22 = scalar_lea.vmem %s228_s16, 32 }
  0x9e   :  { %p12531_p1 = scmp.ne.s32.totalorder %s228_s16, %s12530_s25  ;;  %p12535_p2 = scmp.lt.s32.totalorder %s228_s16, %s228_s16 }
  0x9f   :  { %p12536_p3 = scmp.lt.s32.totalorder %s12534_s22, %s12530_s25 }
  0xa1   :  { %p12537_p4 = por %p12536_p3, %p12535_p2 }
  0xa3   :  { %p12538_p5 = pnand %p12537_p4, %p12531_p1 }
  0xa5   :  { %12541 = shalt.err (!%p12538_p5)
}
  0xa6   :  { %230 = dma.hbm_to_vmem [thread:$0]  %s13597_s14, 16, %s228_s16, [#allocation14]  }
  0xa7   :  { %s13491_s23 = smov [#allocation16]   ;;  %s13492_s28 = smov [#allocation19]  }
  0xa8   :  { %s247_s26 = sshll.u32 %s13491_s23, 4  ;;  %s268_s1 = sshll.u32 %s13492_s28, 4  ;;  %s248_s26 = int_to_ptr.vmem [resolvable:$true] %s247_s26  ;;  %s269_s1 = int_to_ptr.vmem [resolvable:$true] %s268_s1 }
  0xa9   :  { %s12550_s2 = scalar_lea.vmem %s248_s26, 16  ;;  %s12554_s7 = scalar_lea.vmem %s248_s26, 32 }
  0xaa   :  { %p12551_p6 = scmp.ne.s32.totalorder %s248_s26, %s12550_s2  ;;  %p12555_p7 = scmp.lt.s32.totalorder %s248_s26, %s248_s26 }
  0xab   :  { %p12556_p8 = scmp.lt.s32.totalorder %s12554_s7, %s12550_s2 }
  0xad   :  { %p12557_p9 = por %p12556_p8, %p12555_p7 }
  0xaf   :  { %p12558_p10 = pnand %p12557_p9, %p12551_p6 }
  0xb1   :  { %12561 = shalt.err (!%p12558_p10)
}
  0xb2   :  { %250 = dma.hbm_to_vmem [thread:$0]  %s13607_s24, 16, %s248_s26, [#allocation17]  }
  0xb3   :  { %s12570_s3 = scalar_lea.vmem %s269_s1, 768  ;;  %p12575_p12 = scmp.lt.s32.totalorder %s269_s1, %s269_s1 }
  0xb4   :  { %p12571_p11 = scmp.ne.s32.totalorder %s269_s1, %s12570_s3  ;;  %p12576_p13 = scmp.lt.s32.totalorder %s12570_s3, %s12570_s3 }
  0xb6   :  { %p12577_p0 = por %p12576_p13, %p12575_p12 }
  0xb8   :  { %p12578_p1 = pnand %p12577_p0, %p12571_p11 }
  0xba   :  { %12581 = shalt.err (!%p12578_p1)
}
  0xbb   :  { %274 = dma.hbm_to_vmem [thread:$0]  %s13617_s6, 768, %s269_s1, [#allocation20], %s13489_s13, %s13489_s13, %s13490_s0  }
  0xbc   :  { %s13493_s14 = smov [#allocation22]   ;;  %s13494_s11 = smov [#allocation25]  }
  0xbd   :  { %s291_s10 = sshll.u32 %s13493_s14, 4  ;;  %s310_s15 = sshll.u32 %s13494_s11, 4  ;;  %s292_s10 = int_to_ptr.vmem [resolvable:$true] %s291_s10  ;;  %s311_s15 = int_to_ptr.vmem [resolvable:$true] %s310_s15 }
  0xbe   :  { %s12590_s16 = scalar_lea.vmem %s292_s10, 16  ;;  %s12594_s24 = scalar_lea.vmem %s292_s10, 32 }
  0xbf   :  { %p12591_p2 = scmp.ne.s32.totalorder %s292_s10, %s12590_s16  ;;  %p12595_p3 = scmp.lt.s32.totalorder %s292_s10, %s292_s10 }
  0xc0   :  { %p12596_p4 = scmp.lt.s32.totalorder %s12594_s24, %s12590_s16 }
  0xc2   :  { %p12597_p5 = por %p12596_p4, %p12595_p3 }
  0xc4   :  { %p12598_p6 = pnand %p12597_p5, %p12591_p2 }
  0xc6   :  { %12601 = shalt.err (!%p12598_p6)
}
  0xc7   :  { %294 = dma.hbm_to_vmem [thread:$0]  %s13627_s20, 16, %s292_s10, [#allocation23]  }
  0xc8   :  { %s12610_s18 = scalar_lea.vmem %s311_s15, 256  ;;  %p12615_p8 = scmp.lt.s32.totalorder %s311_s15, %s311_s15 }
  0xc9   :  { %p12611_p7 = scmp.ne.s32.totalorder %s311_s15, %s12610_s18  ;;  %p12616_p9 = scmp.lt.s32.totalorder %s12610_s18, %s12610_s18 }
  0xcb   :  { %p12617_p10 = por %p12616_p9, %p12615_p8 }
  0xcd   :  { %p12618_p11 = pnand %p12617_p10, %p12611_p7 }
  0xcf   :  { %12621 = shalt.err (!%p12618_p11)
}
  0xd0   :  { %316 = dma.hbm_to_vmem [thread:$0]  %s13637_s4, 256, %s311_s15, [#allocation26], %s13489_s13, %s13489_s13, %s13490_s0  }
  0xd1   :  { %s13495_s6 = smov [#allocation28]   ;;  %s13496_s22 = smov [#allocation31]  }
  0xd2   :  { %s334_s25 = sshll.u32 %s13495_s6, 4  ;;  %s357_s23 = sshll.u32 %s13496_s22, 4  ;;  %s335_s25 = int_to_ptr.vmem [resolvable:$true] %s334_s25  ;;  %s358_s23 = int_to_ptr.vmem [resolvable:$true] %s357_s23 }
  0xd3   :  { %s12630_s26 = scalar_lea.vmem %s335_s25, 768  ;;  %p12635_p13 = scmp.lt.s32.totalorder %s335_s25, %s335_s25 }
  0xd4   :  { %p12631_p12 = scmp.ne.s32.totalorder %s335_s25, %s12630_s26  ;;  %p12636_p0 = scmp.lt.s32.totalorder %s12630_s26, %s12630_s26 }
  0xd6   :  { %p12637_p1 = por %p12636_p0, %p12635_p13 }
  0xd8   :  { %p12638_p2 = pnand %p12637_p1, %p12631_p12 }
  0xda   :  { %12641 = shalt.err (!%p12638_p2)
}
  0xdb   :  { %340 = dma.hbm_to_vmem [thread:$0]  %s13647_s5, 768, %s335_s25, [#allocation29], %s13489_s13, %s13489_s13, %s13490_s0  }
  0xdc   :  { %s12650_s20 = scalar_lea.vmem %s358_s23, 16  ;;  %s12654_s4 = scalar_lea.vmem %s358_s23, 32 }
  0xdd   :  { %p12651_p3 = scmp.ne.s32.totalorder %s358_s23, %s12650_s20  ;;  %p12655_p4 = scmp.lt.s32.totalorder %s358_s23, %s358_s23 }
  0xde   :  { %p12656_p5 = scmp.lt.s32.totalorder %s12654_s4, %s12650_s20 }
  0xe0   :  { %p12657_p6 = por %p12656_p5, %p12655_p4 }
  0xe2   :  { %p12658_p7 = pnand %p12657_p6, %p12651_p3 }
  0xe4   :  { %12661 = shalt.err (!%p12658_p7)
}
  0xe5   :  { %360 = dma.hbm_to_vmem [thread:$0]  %s13657_s12, 16, %s358_s23, [#allocation32]  }
  0xe6   :  { %s13497_s28 = smov [#allocation34]   ;;  %s13498_s2 = smov [#allocation37]  }
  0xe7   :  { %s377_s1 = sshll.u32 %s13497_s28, 4  ;;  %s398_s7 = sshll.u32 %s13498_s2, 4  ;;  %s378_s1 = int_to_ptr.vmem [resolvable:$true] %s377_s1  ;;  %s399_s7 = int_to_ptr.vmem [resolvable:$true] %s398_s7 }
  0xe8   :  { %s12670_s3 = scalar_lea.vmem %s378_s1, 16  ;;  %s12674_s14 = scalar_lea.vmem %s378_s1, 32 }
  0xe9   :  { %p12671_p8 = scmp.ne.s32.totalorder %s378_s1, %s12670_s3  ;;  %p12675_p9 = scmp.lt.s32.totalorder %s378_s1, %s378_s1 }
  0xea   :  { %p12676_p10 = scmp.lt.s32.totalorder %s12674_s14, %s12670_s3 }
  0xec   :  { %p12677_p11 = por %p12676_p10, %p12675_p9 }
  0xee   :  { %p12678_p12 = pnand %p12677_p11, %p12671_p8 }
  0xf0   :  { %12681 = shalt.err (!%p12678_p12)
}
  0xf1   :  { %380 = dma.hbm_to_vmem [thread:$0]  %s13667_s30, 16, %s378_s1, [#allocation35]  }
  0xf2   :  { %s12690_s5 = scalar_lea.vmem %s399_s7, 384  ;;  %p12695_p0 = scmp.lt.s32.totalorder %s399_s7, %s399_s7 }
  0xf3   :  { %p12691_p13 = scmp.ne.s32.totalorder %s399_s7, %s12690_s5  ;;  %p12696_p1 = scmp.lt.s32.totalorder %s12690_s5, %s12690_s5 }
  0xf5   :  { %p12697_p2 = por %p12696_p1, %p12695_p0 }
  0xf7   :  { %p12698_p3 = pnand %p12697_p2, %p12691_p13 }
  0xf9   :  { %12701 = shalt.err (!%p12698_p3)
}
  0xfa   :  { %404 = dma.hbm_to_vmem [thread:$0]  %s13677_s19, 384, %s399_s7, [#allocation38], %s13489_s13, %s13489_s13, %s13490_s0  }
  0xfb   :  { %s13499_s12 = smov [#allocation40]   ;;  %s13500_s11 = smov [#allocation43]  }
  0xfc   :  { %s421_s10 = sshll.u32 %s13499_s12, 4  ;;  %s441_s15 = sshll.u32 %s13500_s11, 4  ;;  %s422_s10 = int_to_ptr.vmem [resolvable:$true] %s421_s10  ;;  %s442_s15 = int_to_ptr.vmem [resolvable:$true] %s441_s15 }
  0xfd   :  { %s12710_s16 = scalar_lea.vmem %s422_s10, 16  ;;  %s12714_s30 = scalar_lea.vmem %s422_s10, 32 }
  0xfe   :  { %p12711_p4 = scmp.ne.s32.totalorder %s422_s10, %s12710_s16  ;;  %p12715_p5 = scmp.lt.s32.totalorder %s422_s10, %s422_s10 }
  0xff   :  { %p12716_p6 = scmp.lt.s32.totalorder %s12714_s30, %s12710_s16 }
 0x101   :  { %p12717_p7 = por %p12716_p6, %p12715_p5 }
 0x103   :  { %p12718_p8 = pnand %p12717_p7, %p12711_p4 }
 0x105   :  { %12721 = shalt.err (!%p12718_p8)
}
 0x106   :  { %424 = dma.hbm_to_vmem [thread:$0]  %s13687_s8, 16, %s422_s10, [#allocation41]  }
 0x107   :  { %s12730_s24 = scalar_lea.vmem %s442_s15, 128  ;;  %p12735_p10 = scmp.lt.s32.totalorder %s442_s15, %s442_s15 }
 0x108   :  { %p12731_p9 = scmp.ne.s32.totalorder %s442_s15, %s12730_s24  ;;  %p12736_p11 = scmp.lt.s32.totalorder %s12730_s24, %s12730_s24 }
 0x10a   :  { %p12737_p12 = por %p12736_p11, %p12735_p10 }
 0x10c   :  { %p12738_p13 = pnand %p12737_p12, %p12731_p9 }
 0x10e   :  { %12741 = shalt.err (!%p12738_p13)
}
 0x10f   :  { %444 = dma.hbm_to_vmem [thread:$0]  %s13697_s29, 128, %s442_s15, [#allocation44]  }
 0x110   :  { %s13501_s19 = smov [#allocation46]   ;;  %s13502_s6 = smov [#allocation49]  }
 0x111   :  { %s462_s18 = sshll.u32 %s13501_s19, 4  ;;  %s487_s25 = sshll.u32 %s13502_s6, 4  ;;  %s463_s18 = int_to_ptr.vmem [resolvable:$true] %s462_s18  ;;  %s488_s25 = int_to_ptr.vmem [resolvable:$true] %s487_s25 }
 0x112   :  { %s12750_s22 = scalar_lea.vmem %s463_s18, 1536  ;;  %p12755_p1 = scmp.lt.s32.totalorder %s463_s18, %s463_s18 }
 0x113   :  { %p12751_p0 = scmp.ne.s32.totalorder %s463_s18, %s12750_s22  ;;  %p12756_p2 = scmp.lt.s32.totalorder %s12750_s22, %s12750_s22 }
 0x115   :  { %p12757_p3 = por %p12756_p2, %p12755_p1 }
 0x117   :  { %p12758_p4 = pnand %p12757_p3, %p12751_p0 }
 0x119   :  { %12761 = shalt.err (!%p12758_p4)
}
 0x11a   :  { %s15136_s8 = sld [smem:[#allocation113_spill]]  ;;  %s12770_s23 = scalar_lea.vmem %s488_s25, 16 }
 0x11b   :  { %p12771_p5 = scmp.ne.s32.totalorder %s488_s25, %s12770_s23  ;;  %s12774_s29 = scalar_lea.vmem %s488_s25, 32 }
 0x11c   :  { %p12775_p6 = scmp.lt.s32.totalorder %s488_s25, %s488_s25  ;;  %p12776_p7 = scmp.lt.s32.totalorder %s12774_s29, %s12770_s23 }
 0x11e   :  { %p12777_p8 = por %p12776_p7, %p12775_p6 }
 0x120   :  { %468 = dma.hbm_to_vmem [thread:$0]  %s15136_s8, 1536, %s463_s18, [#allocation47], %s13489_s13, %s13489_s13, %s13490_s0  }
 0x121   :  { %p12778_p9 = pnand %p12777_p8, %p12771_p5 }
 0x123   :  { %12781 = shalt.err (!%p12778_p9)
}
 0x124   :  { %s15137_s26 = sld [smem:[#allocation115_spill]]  ;;  %s13503_s20 = smov [#allocation52]  }
 0x125   :  { %s507_s4 = sshll.u32 %s13503_s20, 4  ;;  %s508_s4 = int_to_ptr.vmem [resolvable:$true] %s507_s4 }
 0x126   :  { %s12790_s28 = scalar_lea.vmem %s508_s4, 16  ;;  %s12794_s1 = scalar_lea.vmem %s508_s4, 32 }
 0x127   :  { %p12791_p10 = scmp.ne.s32.totalorder %s508_s4, %s12790_s28  ;;  %p12795_p11 = scmp.lt.s32.totalorder %s508_s4, %s508_s4 }
 0x128   :  { %p12796_p12 = scmp.lt.s32.totalorder %s12794_s1, %s12790_s28 }
 0x12a   :  { %490 = dma.hbm_to_vmem [thread:$0]  %s15137_s26, 16, %s488_s25, [#allocation50]  }
 0x12b   :  { %p12797_p13 = por %p12796_p12, %p12795_p11 }
 0x12d   :  { %p12798_p0 = pnand %p12797_p13, %p12791_p10 }
 0x12f   :  { %12801 = shalt.err (!%p12798_p0)
}
 0x130   :  { %s15138_s2 = sld [smem:[#allocation117_spill]]  ;;  %s13504_s7 = smov [#allocation55]  }
 0x131   :  { %s528_s3 = sshll.u32 %s13504_s7, 4  ;;  %s13505_s14 = smov [#allocation58]   ;;  %s529_s3 = int_to_ptr.vmem [resolvable:$true] %s528_s3 }
 0x132   :  { %s551_s5 = sshll.u32 %s13505_s14, 4  ;;  %s12810_s12 = scalar_lea.vmem %s529_s3, 192  ;;  %s552_s5 = int_to_ptr.vmem [resolvable:$true] %s551_s5 }
 0x133   :  { %p12811_p1 = scmp.ne.s32.totalorder %s529_s3, %s12810_s12  ;;  %p12815_p2 = scmp.lt.s32.totalorder %s529_s3, %s529_s3 }
 0x134   :  { %p12816_p3 = scmp.lt.s32.totalorder %s12810_s12, %s12810_s12 }
 0x136   :  { %510 = dma.hbm_to_vmem [thread:$0]  %s15138_s2, 16, %s508_s4, [#allocation53]  }
 0x137   :  { %p12817_p4 = por %p12816_p3, %p12815_p2 }
 0x139   :  { %p12818_p5 = pnand %p12817_p4, %p12811_p1 }
 0x13b   :  { %12821 = shalt.err (!%p12818_p5)
}
 0x13c   :  { %s13506_s10 = smov 64   ;;  %s15139_s11 = sld [smem:[#allocation119_spill]] }
 0x13d   :  { %s13507_s15 = smov 4   ;;  %s12830_s16 = scalar_lea.vmem %s552_s5, 16 }
 0x13e   :  { %p12831_p6 = scmp.ne.s32.totalorder %s552_s5, %s12830_s16  ;;  %s12834_s30 = scalar_lea.vmem %s552_s5, 32 }
 0x13f   :  { %p12835_p7 = scmp.lt.s32.totalorder %s552_s5, %s552_s5  ;;  %p12836_p8 = scmp.lt.s32.totalorder %s12834_s30, %s12830_s16 }
 0x141   :  { %p12837_p9 = por %p12836_p8, %p12835_p7 }
 0x142   :  { %534 = dma.hbm_to_vmem [thread:$0]  %s15139_s11, 192, %s529_s3, [#allocation56], %s13506_s10, %s13506_s10, %s13507_s15  }
 0x143   :  { %p12838_p10 = pnand %p12837_p9, %p12831_p6 }
 0x145   :  { %12841 = shalt.err (!%p12838_p10)
}
 0x146   :  { %s15140_s24 = sld [smem:[#allocation121_spill]]  ;;  %s13508_s19 = smov [#allocation61]  }
 0x147   :  { %s571_s18 = sshll.u32 %s13508_s19, 4  ;;  %s13509_s6 = smov [#allocation64]   ;;  %s572_s18 = int_to_ptr.vmem [resolvable:$true] %s571_s18 }
 0x148   :  { %s594_s25 = sshll.u32 %s13509_s6, 4  ;;  %s12850_s22 = scalar_lea.vmem %s572_s18, 64  ;;  %s595_s25 = int_to_ptr.vmem [resolvable:$true] %s594_s25 }
 0x149   :  { %p12851_p11 = scmp.ne.s32.totalorder %s572_s18, %s12850_s22  ;;  %p12855_p12 = scmp.lt.s32.totalorder %s572_s18, %s572_s18 }
 0x14a   :  { %p12856_p13 = scmp.lt.s32.totalorder %s12850_s22, %s12850_s22 }
 0x14c   :  { %554 = dma.hbm_to_vmem [thread:$0]  %s15140_s24, 16, %s552_s5, [#allocation59]  }
 0x14d   :  { %p12857_p0 = por %p12856_p13, %p12855_p12 }
 0x14f   :  { %p12858_p1 = pnand %p12857_p0, %p12851_p11 }
 0x151   :  { %12861 = shalt.err (!%p12858_p1)
}
 0x152   :  { %s15141_s8 = sld [smem:[#allocation123_spill]]  ;;  %s12870_s23 = scalar_lea.vmem %s595_s25, 512 }
 0x153   :  { %p12871_p2 = scmp.ne.s32.totalorder %s595_s25, %s12870_s23  ;;  %p12875_p3 = scmp.lt.s32.totalorder %s595_s25, %s595_s25 }
 0x154   :  { %p12876_p4 = scmp.lt.s32.totalorder %s12870_s23, %s12870_s23 }
 0x156   :  { %p12877_p5 = por %p12876_p4, %p12875_p3 }
 0x158   :  { %574 = dma.hbm_to_vmem [thread:$0]  %s15141_s8, 64, %s572_s18, [#allocation62]  }
 0x159   :  { %p12878_p6 = pnand %p12877_p5, %p12871_p2 }
 0x15b   :  { %12881 = shalt.err (!%p12878_p6)
}
 0x15c   :  { %s15142_s29 = sld [smem:[#allocation126_spill]]  ;;  %s13510_s26 = smov [#allocation67]  }
 0x15d   :  { %s625_s20 = sshll.u32 %s13510_s26, 4  ;;  %s13511_s4 = smov [#allocation2]   ;;  %s626_s20 = int_to_ptr.vmem [resolvable:$true] %s625_s20 }
 0x15e   :  { %s149_s28 = sshll.u32 %s13511_s4, 4  ;;  %s12890_s1 = scalar_lea.vmem %s626_s20, 16  ;;  %s150_s28 = int_to_ptr.vmem [resolvable:$true] %s149_s28 }
 0x15f   :  { %p12891_p7 = scmp.ne.s32.totalorder %s626_s20, %s12890_s1  ;;  %s12894_s2 = scalar_lea.vmem %s626_s20, 32 }
 0x160   :  { %p12895_p8 = scmp.lt.s32.totalorder %s626_s20, %s626_s20  ;;  %p12896_p9 = scmp.lt.s32.totalorder %s12894_s2, %s12890_s1 }
 0x162   :  { %600 = dma.hbm_to_vmem [thread:$0]  %s15142_s29, 512, %s595_s25, [#allocation65], %s13489_s13, %s13489_s13, %s13490_s0  }
 0x163   :  { %p12897_p10 = por %p12896_p9, %p12895_p8 }
 0x165   :  { %p12898_p11 = pnand %p12897_p10, %p12891_p7 }
 0x167   :  { %12901 = shalt.err (!%p12898_p11)
}
 0x168   :  { %s15143_s7 = sld [smem:[#allocation132_spill]]  ;;  %s12910_s3 = scalar_lea.vmem %s150_s28, 16 }
 0x169   :  { %p12911_p12 = scmp.ne.s32.totalorder %s150_s28, %s12910_s3  ;;  %s12914_s14 = scalar_lea.vmem %s150_s28, 32 }
 0x16a   :  { %p12915_p13 = scmp.lt.s32.totalorder %s150_s28, %s150_s28  ;;  %p12916_p0 = scmp.lt.s32.totalorder %s12914_s14, %s12910_s3 }
 0x16c   :  { %p12917_p1 = por %p12916_p0, %p12915_p13 }
 0x16e   :  { %628 = dma.hbm_to_vmem [thread:$0]  %s15143_s7, 16, %s626_s20, [#allocation68]  }
 0x16f   :  { %p12918_p2 = pnand %p12917_p1, %p12911_p12 }
 0x171   :  { %12921 = shalt.err (!%p12918_p2)
}
 0x172   :  { %s15144_s5 = sld [smem:[#allocation97_spill]]  ;;  %s13512_s12 = smov [#allocation6]  }
 0x173   :  { %s170_s11 = sshll.u32 %s13512_s12, 4  ;;  %s13513_s16 = smov [#allocation9]   ;;  %s171_s11 = int_to_ptr.vmem [resolvable:$true] %s170_s11 }
 0x174   :  { %s193_s30 = sshll.u32 %s13513_s16, 4  ;;  %s12930_s24 = scalar_lea.vmem %s171_s11, 1536  ;;  %s194_s30 = int_to_ptr.vmem [resolvable:$true] %s193_s30 }
 0x175   :  { %p12931_p3 = scmp.ne.s32.totalorder %s171_s11, %s12930_s24  ;;  %p12935_p4 = scmp.lt.s32.totalorder %s171_s11, %s171_s11 }
 0x176   :  { %p12936_p5 = scmp.lt.s32.totalorder %s12930_s24, %s12930_s24 }
 0x178   :  { %152 = dma.hbm_to_vmem [thread:$0]  %s15144_s5, 16, %s150_s28, [#allocation3]  }
 0x179   :  { %p12937_p6 = por %p12936_p5, %p12935_p4 }
 0x17b   :  { %p12938_p7 = pnand %p12937_p6, %p12931_p3 }
 0x17d   :  { %12941 = shalt.err (!%p12938_p7)
}
 0x17e   :  { %s15145_s19 = sld [smem:[#allocation99_spill]]  ;;  %s12950_s18 = scalar_lea.vmem %s194_s30, 16 }
 0x17f   :  { %p12951_p8 = scmp.ne.s32.totalorder %s194_s30, %s12950_s18  ;;  %s12954_s6 = scalar_lea.vmem %s194_s30, 32 }
 0x180   :  { %p12955_p9 = scmp.lt.s32.totalorder %s194_s30, %s194_s30  ;;  %p12956_p10 = scmp.lt.s32.totalorder %s12954_s6, %s12950_s18 }
 0x182   :  { %p12957_p11 = por %p12956_p10, %p12955_p9 }
 0x184   :  { %176 = dma.hbm_to_vmem [thread:$0]  %s15145_s19, 1536, %s171_s11, [#allocation5], %s13489_s13, %s13489_s13, %s13490_s0  }
 0x185   :  { %p12958_p12 = pnand %p12957_p11, %p12951_p8 }
 0x187   :  { %12961 = shalt.err (!%p12958_p12)
}
 0x188   :  { %s15146_s25 = sld [smem:[#allocation100_spill]]  ;;  %s13514_s22 = smov [#allocation12]  }
 0x189   :  { %s214_s8 = sshll.u32 %s13514_s22, 4  ;;  %s13515_s23 = smov [#allocation15]   ;;  %s215_s8 = int_to_ptr.vmem [resolvable:$true] %s214_s8 }
 0x18a   :  { %s237_s29 = sshll.u32 %s13515_s23, 4  ;;  %s12970_s26 = scalar_lea.vmem %s215_s8, 384  ;;  %s238_s29 = int_to_ptr.vmem [resolvable:$true] %s237_s29 }
 0x18b   :  { %p12971_p13 = scmp.ne.s32.totalorder %s215_s8, %s12970_s26  ;;  %p12975_p0 = scmp.lt.s32.totalorder %s215_s8, %s215_s8 }
 0x18c   :  { %p12976_p1 = scmp.lt.s32.totalorder %s12970_s26, %s12970_s26 }
 0x18e   :  { %196 = dma.hbm_to_vmem [thread:$0]  %s15146_s25, 16, %s194_s30, [#allocation8]  }
 0x18f   :  { %p12977_p2 = por %p12976_p1, %p12975_p0 }
 0x191   :  { %p12978_p3 = pnand %p12977_p2, %p12971_p13 }
 0x193   :  { %12981 = shalt.err (!%p12978_p3)
}
 0x194   :  { %s15147_s20 = sld [smem:[#allocation101_spill]]  ;;  %s12990_s4 = scalar_lea.vmem %s238_s29, 16 }
 0x195   :  { %p12991_p4 = scmp.ne.s32.totalorder %s238_s29, %s12990_s4  ;;  %s12994_s28 = scalar_lea.vmem %s238_s29, 32 }
 0x196   :  { %p12995_p5 = scmp.lt.s32.totalorder %s238_s29, %s238_s29  ;;  %p12996_p6 = scmp.lt.s32.totalorder %s12994_s28, %s12990_s4 }
 0x198   :  { %p12997_p7 = por %p12996_p6, %p12995_p5 }
 0x19a   :  { %220 = dma.hbm_to_vmem [thread:$0]  %s15147_s20, 384, %s215_s8, [#allocation11], %s13489_s13, %s13489_s13, %s13490_s0  }
 0x19b   :  { %p12998_p8 = pnand %p12997_p7, %p12991_p4 }
 0x19d   :  { %13001 = shalt.err (!%p12998_p8)
}
 0x19e   :  { %s15148_s1 = sld [smem:[#allocation102_spill]]  ;;  %s13516_s2 = smov [#allocation18]  }
 0x19f   :  { %s256_s7 = sshll.u32 %s13516_s2, 4  ;;  %s13517_s3 = smov [#allocation21]   ;;  %s257_s7 = int_to_ptr.vmem [resolvable:$true] %s256_s7 }
 0x1a0   :  { %s281_s14 = sshll.u32 %s13517_s3, 4  ;;  %s13010_s5 = scalar_lea.vmem %s257_s7, 768  ;;  %s282_s14 = int_to_ptr.vmem [resolvable:$true] %s281_s14 }
 0x1a1   :  { %p13011_p9 = scmp.ne.s32.totalorder %s257_s7, %s13010_s5  ;;  %p13015_p10 = scmp.lt.s32.totalorder %s257_s7, %s257_s7 }
 0x1a2   :  { %p13016_p11 = scmp.lt.s32.totalorder %s13010_s5, %s13010_s5 }
 0x1a4   :  { %240 = dma.hbm_to_vmem [thread:$0]  %s15148_s1, 16, %s238_s29, [#allocation14]  }
 0x1a5   :  { %p13017_p12 = por %p13016_p11, %p13015_p10 }
 0x1a7   :  { %p13018_p13 = pnand %p13017_p12, %p13011_p9 }
 0x1a9   :  { %13021 = shalt.err (!%p13018_p13)
}
 0x1aa   :  { %s15149_s12 = sld [smem:[#allocation103_spill]]  ;;  %s13030_s11 = scalar_lea.vmem %s282_s14, 16 }
 0x1ab   :  { %p13031_p0 = scmp.ne.s32.totalorder %s282_s14, %s13030_s11  ;;  %s13034_s16 = scalar_lea.vmem %s282_s14, 32 }
 0x1ac   :  { %p13035_p1 = scmp.lt.s32.totalorder %s282_s14, %s282_s14  ;;  %p13036_p2 = scmp.lt.s32.totalorder %s13034_s16, %s13030_s11 }
 0x1ae   :  { %p13037_p3 = por %p13036_p2, %p13035_p1 }
 0x1b0   :  { %262 = dma.hbm_to_vmem [thread:$0]  %s15149_s12, 768, %s257_s7, [#allocation17], %s13489_s13, %s13489_s13, %s13490_s0  }
 0x1b1   :  { %p13038_p4 = pnand %p13037_p3, %p13031_p0 }
 0x1b3   :  { %13041 = shalt.err (!%p13038_p4)
}
 0x1b4   :  { %s15150_s30 = sld [smem:[#allocation104_spill]]  ;;  %s13518_s24 = smov [#allocation24]  }
 0x1b5   :  { %s301_s19 = sshll.u32 %s13518_s24, 4  ;;  %s13519_s18 = smov [#allocation27]   ;;  %s302_s19 = int_to_ptr.vmem [resolvable:$true] %s301_s19 }
 0x1b6   :  { %s322_s6 = sshll.u32 %s13519_s18, 4  ;;  %s13050_s25 = scalar_lea.vmem %s302_s19, 16  ;;  %s323_s6 = int_to_ptr.vmem [resolvable:$true] %s322_s6 }
 0x1b7   :  { %p13051_p5 = scmp.ne.s32.totalorder %s302_s19, %s13050_s25  ;;  %s13054_s22 = scalar_lea.vmem %s302_s19, 32 }
 0x1b8   :  { %p13055_p6 = scmp.lt.s32.totalorder %s302_s19, %s302_s19  ;;  %p13056_p7 = scmp.lt.s32.totalorder %s13054_s22, %s13050_s25 }
 0x1ba   :  { %284 = dma.hbm_to_vmem [thread:$0]  %s15150_s30, 16, %s282_s14, [#allocation20]  }
 0x1bb   :  { %p13057_p8 = por %p13056_p7, %p13055_p6 }
 0x1bd   :  { %p13058_p9 = pnand %p13057_p8, %p13051_p5 }
 0x1bf   :  { %13061 = shalt.err (!%p13058_p9)
}
 0x1c0   :  { %s15151_s8 = sld [smem:[#allocation105_spill]]  ;;  %s13070_s23 = scalar_lea.vmem %s323_s6, 384 }
 0x1c1   :  { %p13071_p10 = scmp.ne.s32.totalorder %s323_s6, %s13070_s23  ;;  %p13075_p11 = scmp.lt.s32.totalorder %s323_s6, %s323_s6 }
 0x1c2   :  { %p13076_p12 = scmp.lt.s32.totalorder %s13070_s23, %s13070_s23 }
 0x1c4   :  { %p13077_p13 = por %p13076_p12, %p13075_p11 }
 0x1c6   :  { %304 = dma.hbm_to_vmem [thread:$0]  %s15151_s8, 16, %s302_s19, [#allocation23]  }
 0x1c7   :  { %p13078_p0 = pnand %p13077_p13, %p13071_p10 }
 0x1c9   :  { %13081 = shalt.err (!%p13078_p0)
}
 0x1ca   :  { %s15152_s29 = sld [smem:[#allocation106_spill]]  ;;  %s13520_s26 = smov [#allocation30]  }
 0x1cb   :  { %s347_s20 = sshll.u32 %s13520_s26, 4  ;;  %s13521_s4 = smov [#allocation33]   ;;  %s348_s20 = int_to_ptr.vmem [resolvable:$true] %s347_s20 }
 0x1cc   :  { %s367_s28 = sshll.u32 %s13521_s4, 4  ;;  %s13090_s1 = scalar_lea.vmem %s348_s20, 128  ;;  %s368_s28 = int_to_ptr.vmem [resolvable:$true] %s367_s28 }
 0x1cd   :  { %p13091_p1 = scmp.ne.s32.totalorder %s348_s20, %s13090_s1  ;;  %p13095_p2 = scmp.lt.s32.totalorder %s348_s20, %s348_s20 }
 0x1ce   :  { %p13096_p3 = scmp.lt.s32.totalorder %s13090_s1, %s13090_s1 }
 0x1d0   :  { %328 = dma.hbm_to_vmem [thread:$0]  %s15152_s29, 384, %s323_s6, [#allocation26], %s13489_s13, %s13489_s13, %s13490_s0  }
 0x1d1   :  { %p13097_p4 = por %p13096_p3, %p13095_p2 }
 0x1d3   :  { %p13098_p5 = pnand %p13097_p4, %p13091_p1 }
 0x1d5   :  { %13101 = shalt.err (!%p13098_p5)
}
 0x1d6   :  { %s15153_s2 = sld [smem:[#allocation107_spill]]  ;;  %s13110_s7 = scalar_lea.vmem %s368_s28, 16 }
 0x1d7   :  { %p13111_p6 = scmp.ne.s32.totalorder %s368_s28, %s13110_s7  ;;  %s13114_s3 = scalar_lea.vmem %s368_s28, 32 }
 0x1d8   :  { %p13115_p7 = scmp.lt.s32.totalorder %s368_s28, %s368_s28  ;;  %p13116_p8 = scmp.lt.s32.totalorder %s13114_s3, %s13110_s7 }
 0x1da   :  { %p13117_p9 = por %p13116_p8, %p13115_p7 }
 0x1dc   :  { %350 = dma.hbm_to_vmem [thread:$0]  %s15153_s2, 128, %s348_s20, [#allocation29]  }
 0x1dd   :  { %p13118_p10 = pnand %p13117_p9, %p13111_p6 }
 0x1df   :  { %13121 = shalt.err (!%p13118_p10)
}
 0x1e0   :  { %s15154_s14 = sld [smem:[#allocation108_spill]]  ;;  %s13522_s5 = smov [#allocation36]  }
 0x1e1   :  { %s386_s12 = sshll.u32 %s13522_s5, 4  ;;  %s13523_s11 = smov [#allocation39]   ;;  %s387_s12 = int_to_ptr.vmem [resolvable:$true] %s386_s12 }
 0x1e2   :  { %s411_s16 = sshll.u32 %s13523_s11, 4  ;;  %s13130_s30 = scalar_lea.vmem %s387_s12, 384  ;;  %s412_s16 = int_to_ptr.vmem [resolvable:$true] %s411_s16 }
 0x1e3   :  { %p13131_p11 = scmp.ne.s32.totalorder %s387_s12, %s13130_s30  ;;  %p13135_p12 = scmp.lt.s32.totalorder %s387_s12, %s387_s12 }
 0x1e4   :  { %p13136_p13 = scmp.lt.s32.totalorder %s13130_s30, %s13130_s30 }
 0x1e6   :  { %370 = dma.hbm_to_vmem [thread:$0]  %s15154_s14, 16, %s368_s28, [#allocation32]  }
 0x1e7   :  { %p13137_p0 = por %p13136_p13, %p13135_p12 }
 0x1e9   :  { %p13138_p1 = pnand %p13137_p0, %p13131_p11 }
 0x1eb   :  { %13141 = shalt.err (!%p13138_p1)
}
 0x1ec   :  { %s15155_s24 = sld [smem:[#allocation109_spill]]  ;;  %s13150_s19 = scalar_lea.vmem %s412_s16, 16 }
 0x1ed   :  { %p13151_p2 = scmp.ne.s32.totalorder %s412_s16, %s13150_s19  ;;  %s13154_s18 = scalar_lea.vmem %s412_s16, 32 }
 0x1ee   :  { %p13155_p3 = scmp.lt.s32.totalorder %s412_s16, %s412_s16  ;;  %p13156_p4 = scmp.lt.s32.totalorder %s13154_s18, %s13150_s19 }
 0x1f0   :  { %p13157_p5 = por %p13156_p4, %p13155_p3 }
 0x1f2   :  { %392 = dma.hbm_to_vmem [thread:$0]  %s15155_s24, 384, %s387_s12, [#allocation35], %s13489_s13, %s13489_s13, %s13490_s0  }
 0x1f3   :  { %p13158_p6 = pnand %p13157_p5, %p13151_p2 }
 0x1f5   :  { %13161 = shalt.err (!%p13158_p6)
}
 0x1f6   :  { %s15156_s6 = sld [smem:[#allocation110_spill]]  ;;  %s13524_s25 = smov [#allocation42]  }
 0x1f7   :  { %s431_s22 = sshll.u32 %s13524_s25, 4  ;;  %s13525_s8 = smov [#allocation45]   ;;  %s432_s22 = int_to_ptr.vmem [resolvable:$true] %s431_s22 }
 0x1f8   :  { %s450_s23 = sshll.u32 %s13525_s8, 4  ;;  %s13170_s29 = scalar_lea.vmem %s432_s22, 16  ;;  %s451_s23 = int_to_ptr.vmem [resolvable:$true] %s450_s23 }
 0x1f9   :  { %p13171_p7 = scmp.ne.s32.totalorder %s432_s22, %s13170_s29  ;;  %s13174_s26 = scalar_lea.vmem %s432_s22, 32 }
 0x1fa   :  { %p13175_p8 = scmp.lt.s32.totalorder %s432_s22, %s432_s22  ;;  %p13176_p9 = scmp.lt.s32.totalorder %s13174_s26, %s13170_s29 }
 0x1fc   :  { %414 = dma.hbm_to_vmem [thread:$0]  %s15156_s6, 16, %s412_s16, [#allocation38]  }
 0x1fd   :  { %p13177_p10 = por %p13176_p9, %p13175_p8 }
 0x1ff   :  { %p13178_p11 = pnand %p13177_p10, %p13171_p7 }
 0x201   :  { %13181 = shalt.err (!%p13178_p11)
}
 0x202   :  { %s15157_s20 = sld [smem:[#allocation111_spill]]  ;;  %s13190_s4 = scalar_lea.vmem %s451_s23, 768 }
 0x203   :  { %p13191_p12 = scmp.ne.s32.totalorder %s451_s23, %s13190_s4  ;;  %p13195_p13 = scmp.lt.s32.totalorder %s451_s23, %s451_s23 }
 0x204   :  { %p13196_p0 = scmp.lt.s32.totalorder %s13190_s4, %s13190_s4 }
 0x206   :  { %p13197_p1 = por %p13196_p0, %p13195_p13 }
 0x208   :  { %434 = dma.hbm_to_vmem [thread:$0]  %s15157_s20, 16, %s432_s22, [#allocation41]  }
 0x209   :  { %p13198_p2 = pnand %p13197_p1, %p13191_p12 }
 0x20b   :  { %13201 = shalt.err (!%p13198_p2)
}
 0x20c   :  { %s15158_s28 = sld [smem:[#allocation112_spill]]  ;;  %s13526_s1 = smov [#allocation48]  }
 0x20d   :  { %s474_s2 = sshll.u32 %s13526_s1, 4  ;;  %s13527_s7 = smov [#allocation51]   ;;  %s475_s2 = int_to_ptr.vmem [resolvable:$true] %s474_s2 }
 0x20e   :  { %s497_s3 = sshll.u32 %s13527_s7, 4  ;;  %s13210_s14 = scalar_lea.vmem %s475_s2, 256  ;;  %s498_s3 = int_to_ptr.vmem [resolvable:$true] %s497_s3 }
 0x20f   :  { %p13211_p3 = scmp.ne.s32.totalorder %s475_s2, %s13210_s14  ;;  %p13215_p4 = scmp.lt.s32.totalorder %s475_s2, %s475_s2 }
 0x210   :  { %p13216_p5 = scmp.lt.s32.totalorder %s13210_s14, %s13210_s14 }
 0x212   :  { %456 = dma.hbm_to_vmem [thread:$0]  %s15158_s28, 768, %s451_s23, [#allocation44], %s13489_s13, %s13489_s13, %s13490_s0  }
 0x213   :  { %p13217_p6 = por %p13216_p5, %p13215_p4 }
 0x215   :  { %p13218_p7 = pnand %p13217_p6, %p13211_p3 }
 0x217   :  { %13221 = shalt.err (!%p13218_p7)
}
 0x218   :  { %s15159_s5 = sld [smem:[#allocation114_spill]]  ;;  %s13230_s12 = scalar_lea.vmem %s498_s3, 16 }
 0x219   :  { %p13231_p8 = scmp.ne.s32.totalorder %s498_s3, %s13230_s12  ;;  %s13234_s11 = scalar_lea.vmem %s498_s3, 32 }
 0x21a   :  { %p13235_p9 = scmp.lt.s32.totalorder %s498_s3, %s498_s3  ;;  %p13236_p10 = scmp.lt.s32.totalorder %s13234_s11, %s13230_s12 }
 0x21c   :  { %p13237_p11 = por %p13236_p10, %p13235_p9 }
 0x21e   :  { %480 = dma.hbm_to_vmem [thread:$0]  %s15159_s5, 256, %s475_s2, [#allocation47], %s13489_s13, %s13489_s13, %s13490_s0  }
 0x21f   :  { %p13238_p12 = pnand %p13237_p11, %p13231_p8 }
 0x221   :  { %13241 = shalt.err (!%p13238_p12)
}
 0x222   :  { %s15160_s16 = sld [smem:[#allocation116_spill]]  ;;  %s13528_s30 = smov [#allocation54]  }
 0x223   :  { %s516_s24 = sshll.u32 %s13528_s30, 4  ;;  %s13529_s19 = smov [#allocation57]   ;;  %s517_s24 = int_to_ptr.vmem [resolvable:$true] %s516_s24 }
 0x224   :  { %s541_s18 = sshll.u32 %s13529_s19, 4  ;;  %s13250_s6 = scalar_lea.vmem %s517_s24, 192  ;;  %s542_s18 = int_to_ptr.vmem [resolvable:$true] %s541_s18 }
 0x225   :  { %p13251_p13 = scmp.ne.s32.totalorder %s517_s24, %s13250_s6  ;;  %p13255_p0 = scmp.lt.s32.totalorder %s517_s24, %s517_s24 }
 0x226   :  { %p13256_p1 = scmp.lt.s32.totalorder %s13250_s6, %s13250_s6 }
 0x228   :  { %500 = dma.hbm_to_vmem [thread:$0]  %s15160_s16, 16, %s498_s3, [#allocation50]  }
 0x229   :  { %p13257_p2 = por %p13256_p1, %p13255_p0 }
 0x22b   :  { %p13258_p3 = pnand %p13257_p2, %p13251_p13 }
 0x22d   :  { %13261 = shalt.err (!%p13258_p3)
}
 0x22e   :  { %s15161_s25 = sld [smem:[#allocation118_spill]]  ;;  %s13270_s22 = scalar_lea.vmem %s542_s18, 16 }
 0x22f   :  { %p13271_p4 = scmp.ne.s32.totalorder %s542_s18, %s13270_s22  ;;  %s13274_s8 = scalar_lea.vmem %s542_s18, 32 }
 0x230   :  { %p13275_p5 = scmp.lt.s32.totalorder %s542_s18, %s542_s18  ;;  %p13276_p6 = scmp.lt.s32.totalorder %s13274_s8, %s13270_s22 }
 0x232   :  { %p13277_p7 = por %p13276_p6, %p13275_p5 }
 0x234   :  { %522 = dma.hbm_to_vmem [thread:$0]  %s15161_s25, 192, %s517_s24, [#allocation53], %s13506_s10, %s13506_s10, %s13507_s15  }
 0x235   :  { %p13278_p8 = pnand %p13277_p7, %p13271_p4 }
 0x237   :  { %13281 = shalt.err (!%p13278_p8)
}
 0x238   :  { %s15162_s23 = sld [smem:[#allocation120_spill]]  ;;  %s13530_s29 = smov [#allocation60]  }
 0x239   :  { %s561_s26 = sshll.u32 %s13530_s29, 4  ;;  %s13531_s20 = smov [#allocation63]   ;;  %s562_s26 = int_to_ptr.vmem [resolvable:$true] %s561_s26 }
 0x23a   :  { %s580_s4 = sshll.u32 %s13531_s20, 4  ;;  %s13290_s28 = scalar_lea.vmem %s562_s26, 16  ;;  %s581_s4 = int_to_ptr.vmem [resolvable:$true] %s580_s4 }
 0x23b   :  { %p13291_p9 = scmp.ne.s32.totalorder %s562_s26, %s13290_s28  ;;  %s13294_s1 = scalar_lea.vmem %s562_s26, 32 }
 0x23c   :  { %p13295_p10 = scmp.lt.s32.totalorder %s562_s26, %s562_s26  ;;  %p13296_p11 = scmp.lt.s32.totalorder %s13294_s1, %s13290_s28 }
 0x23e   :  { %544 = dma.hbm_to_vmem [thread:$0]  %s15162_s23, 16, %s542_s18, [#allocation56]  }
 0x23f   :  { %p13297_p12 = por %p13296_p11, %p13295_p10 }
 0x241   :  { %p13298_p13 = pnand %p13297_p12, %p13291_p9 }
 0x243   :  { %13301 = shalt.err (!%p13298_p13)
}
 0x244   :  { %s15163_s10 = sld [smem:[#allocation122_spill]]  ;;  %s13310_s15 = scalar_lea.vmem %s581_s4, 1536 }
 0x245   :  { %p13311_p0 = scmp.ne.s32.totalorder %s581_s4, %s13310_s15  ;;  %p13315_p1 = scmp.lt.s32.totalorder %s581_s4, %s581_s4 }
 0x246   :  { %p13316_p2 = scmp.lt.s32.totalorder %s13310_s15, %s13310_s15 }
 0x248   :  { %p13317_p3 = por %p13316_p2, %p13315_p1 }
 0x24a   :  { %564 = dma.hbm_to_vmem [thread:$0]  %s15163_s10, 16, %s562_s26, [#allocation59]  }
 0x24b   :  { %p13318_p4 = pnand %p13317_p3, %p13311_p0 }
 0x24d   :  { %13321 = shalt.err (!%p13318_p4)
}
 0x24e   :  { %s15164_s2 = sld [smem:[#allocation124_spill]]  ;;  %s13532_s7 = smov [#allocation66]  }
 0x24f   :  { %s607_s3 = sshll.u32 %s13532_s7, 4  ;;  %s13533_s14 = smov [#allocation69]   ;;  %s608_s3 = int_to_ptr.vmem [resolvable:$true] %s607_s3 }
 0x250   :  { %s634_s5 = sshll.u32 %s13533_s14, 4  ;;  %s13330_s12 = scalar_lea.vmem %s608_s3, 16  ;;  %s635_s5 = int_to_ptr.vmem [resolvable:$true] %s634_s5 }
 0x251   :  { %p13331_p5 = scmp.ne.s32.totalorder %s608_s3, %s13330_s12  ;;  %s13334_s11 = scalar_lea.vmem %s608_s3, 32 }
 0x252   :  { %p13335_p6 = scmp.lt.s32.totalorder %s608_s3, %s608_s3  ;;  %p13336_p7 = scmp.lt.s32.totalorder %s13334_s11, %s13330_s12 }
 0x254   :  { %586 = dma.hbm_to_vmem [thread:$0]  %s15164_s2, 1536, %s581_s4, [#allocation62], %s13489_s13, %s13489_s13, %s13490_s0  }
 0x255   :  { %p13337_p8 = por %p13336_p7, %p13335_p6 }
 0x257   :  { %p13338_p9 = pnand %p13337_p8, %p13331_p5 }
 0x259   :  { %13341 = shalt.err (!%p13338_p9)
}
 0x25a   :  { %s15165_s16 = sld [smem:[#allocation127_spill]]  ;;  %s13350_s30 = scalar_lea.vmem %s635_s5, 7168 }
 0x25b   :  { %p13351_p10 = scmp.ne.s32.totalorder %s635_s5, %s13350_s30  ;;  %p13355_p11 = scmp.lt.s32.totalorder %s635_s5, %s635_s5 }
 0x25c   :  { %p13356_p12 = scmp.lt.s32.totalorder %s13350_s30, %s13350_s30 }
 0x25e   :  { %p13357_p13 = por %p13356_p12, %p13355_p11 }
 0x260   :  { %610 = dma.hbm_to_vmem [thread:$0]  %s15165_s16, 16, %s608_s3, [#allocation65]  }
 0x261   :  { %p13358_p0 = pnand %p13357_p13, %p13351_p10 }
 0x263   :  { %13361 = shalt.err (!%p13358_p0)
}
 0x264   :  { %s15166_s24 = sld [smem:[#allocation133_spill]]  ;;  %s13534_s19 = smov [#allocation70]  }
 0x265   :  { %s647_s18 = sshll.u32 %s13534_s19, 4  ;;  %s648_s18 = int_to_ptr.vmem [resolvable:$true] %s647_s18 }
 0x266   :  { %s13370_s6 = scalar_lea.vmem %s648_s18, 16  ;;  %s13374_s25 = scalar_lea.vmem %s648_s18, 32 }
 0x267   :  { %p13371_p1 = scmp.ne.s32.totalorder %s648_s18, %s13370_s6  ;;  %p13375_p2 = scmp.lt.s32.totalorder %s648_s18, %s648_s18 }
 0x268   :  { %p13376_p3 = scmp.lt.s32.totalorder %s13374_s25, %s13370_s6 }
 0x26a   :  { %640 = dma.hbm_to_vmem [thread:$0]  %s15166_s24, 7168, %s635_s5, [#allocation68], %s13489_s13, %s13489_s13, %s13490_s0  }
 0x26b   :  { %p13377_p4 = por %p13376_p3, %p13375_p2 }
 0x26d   :  { %p13378_p5 = pnand %p13377_p4, %p13371_p1 }
 0x26f   :  { %13381 = shalt.err (!%p13378_p5)
}
 0x270   :  { %650 = dma.hbm_to_vmem [thread:$0]  %s13812_s27, 16, %s648_s18, [#allocation71]  }
 0x271   :  { %13382 = dma.done.wait [#allocation3], 16  }
 0x272   :  { %13383 = vsyncadd [#allocation3], 4294967280 }
 0x273   :  { %13384 = dma.done.wait [#allocation5], 1552  }
 0x274   :  { %13385 = vsyncadd [#allocation5], 4294965744 }
 0x275   :  { %13386 = dma.done.wait [#allocation8], 32  }
 0x276   :  { %13387 = vsyncadd [#allocation8], 4294967264 }
 0x277   :  { %13388 = dma.done.wait [#allocation11], 768  }
 0x278   :  { %13389 = vsyncadd [#allocation11], 4294966528 }
 0x279   :  { %13390 = dma.done.wait [#allocation14], 32  }
 0x27a   :  { %13391 = vsyncadd [#allocation14], 4294967264 }
 0x27b   :  { %13392 = dma.done.wait [#allocation17], 784  }
 0x27c   :  { %13393 = vsyncadd [#allocation17], 4294966512 }
 0x27d   :  { %13394 = dma.done.wait [#allocation20], 784  }
 0x27e   :  { %13395 = vsyncadd [#allocation20], 4294966512 }
 0x27f   :  { %13396 = dma.done.wait [#allocation23], 32  }
 0x280   :  { %13397 = vsyncadd [#allocation23], 4294967264 }
 0x281   :  { %13398 = dma.done.wait [#allocation26], 640  }
 0x282   :  { %13399 = vsyncadd [#allocation26], 4294966656 }
 0x283   :  { %13400 = dma.done.wait [#allocation29], 896  }
 0x284   :  { %13401 = vsyncadd [#allocation29], 4294966400 }
 0x285   :  { %13402 = dma.done.wait [#allocation32], 32  }
 0x286   :  { %13403 = vsyncadd [#allocation32], 4294967264 }
 0x287   :  { %13404 = dma.done.wait [#allocation35], 400  }
 0x288   :  { %13405 = vsyncadd [#allocation35], 4294966896 }
 0x289   :  { %13406 = dma.done.wait [#allocation38], 400  }
 0x28a   :  { %13407 = vsyncadd [#allocation38], 4294966896 }
 0x28b   :  { %13408 = dma.done.wait [#allocation41], 32  }
 0x28c   :  { %13409 = vsyncadd [#allocation41], 4294967264 }
 0x28d   :  { %13410 = dma.done.wait [#allocation44], 896  }
 0x28e   :  { %13411 = vsyncadd [#allocation44], 4294966400 }
 0x28f   :  { %13412 = dma.done.wait [#allocation47], 1792  }
 0x290   :  { %13413 = vsyncadd [#allocation47], 4294965504 }
 0x291   :  { %13414 = dma.done.wait [#allocation50], 32  }
 0x292   :  { %13415 = vsyncadd [#allocation50], 4294967264 }
 0x293   :  { %13416 = dma.done.wait [#allocation53], 208  }
 0x294   :  { %13417 = vsyncadd [#allocation53], 4294967088 }
 0x295   :  { %13418 = dma.done.wait [#allocation56], 208  }
 0x296   :  { %13419 = vsyncadd [#allocation56], 4294967088 }
 0x297   :  { %13420 = dma.done.wait [#allocation59], 32  }
 0x298   :  { %13421 = vsyncadd [#allocation59], 4294967264 }
 0x299   :  { %13422 = dma.done.wait [#allocation62], 1600  }
 0x29a   :  { %13423 = vsyncadd [#allocation62], 4294965696 }
 0x29b   :  { %13424 = dma.done.wait [#allocation65], 528  }
 0x29c   :  { %13425 = vsyncadd [#allocation65], 4294966768 }
 0x29d   :  { %13426 = dma.done.wait [#allocation68], 7184  }
 0x29e   :  { %13427 = vsyncadd [#allocation68], 4294960112 }
 0x29f   :  { %13428 = dma.done.wait [#allocation71], 16  }
 0x2a0   :  { %13429 = vsyncadd [#allocation71], 4294967280  ;;  %s15167_s27 = sld [smem:[#allocation96_spill]]  ;;  %vm857_vm0 = vcmask 1040384   ;;  %vm808_vm1 = vcmask 7168   ;;  %v1165_v18 = vld [vmem:[#allocation69 + $0x40] sm:$0xff] }
 0x2a1   :  { %v807_v0 = vld [vmem:[%s13817_s9] sm:$0x1]  ;;  %v10061_v1 = vld [vmem:[%s13817_s9 + $0x1] sm:$0x1]  ;;  %v1006_v19 = vld [vmem:[#allocation69] sm:$0xff]  ;;  %vm13536_vm2 = vmmov 0  }
 0x2a2   :  { %11068 = vmatprep.subr.msk.mxu0 %vm857_vm0, %v807_v0  ;;  %11094 = vmatprep.subr.msk.mxu1 %vm857_vm0, %v10061_v1  ;;  %v1166_v52 = vld [vmem:[#allocation69 + $0x48] sm:$0xff]  ;;  %v1167_v54 = vld [vmem:[#allocation69 + $0x50] sm:$0xff]  ;;  %v1168_v57 = vld [vmem:[#allocation69 + $0x58] sm:$0xff]  ;;  %vm2743_vm3 = vcmask 523264   ;;  %s15169_s13 = sld [smem:[#allocation131_spill]]  ;;  %vm3346_vm4 = vcmask 64512  }
 0x2a3   :  { %11069 = vmatpush3.msk.msra.mxu0 %vm857_vm0, %v807_v0  ;;  %11095 = vmatpush3.msk.msra.mxu1 %vm857_vm0, %v10061_v1  ;;  %v1007_v53 = vld [vmem:[#allocation69 + $0x8] sm:$0xff]  ;;  %v1008_v55 = vld [vmem:[#allocation69 + $0x10] sm:$0xff]  ;;  %v1009_v58 = vld [vmem:[#allocation69 + $0x18] sm:$0xff]  ;;  %s15170_s0 = sld [smem:[#allocation98_spill]]  ;;  %vm3540_vm5 = vcmask 261120   ;;  %vm5071_vm6 = vcmask 130048  }
 0x2a4   :  { %v10079_v56 = vld [vmem:[%s13817_s9 + $0x2] sm:$0x1]  ;;  %v1169_v59 = vld [vmem:[#allocation69 + $0x60] sm:$0xff]  ;;  %v10097_v61 = vld [vmem:[%s13817_s9 + $0x3] sm:$0x1]  ;;  %vm8337_vm7 = vcmask 1043456  }
 0x2a5   :  { %v1010_v60 = vld [vmem:[#allocation69 + $0x20] sm:$0xff]  ;;  %v1170_v62 = vld [vmem:[#allocation69 + $0x68] sm:$0xff]  ;;  %v1171_v0 = vld [vmem:[#allocation69 + $0x70] sm:$0xff]  ;;  %vm8333_vm8 = vcmask 31744   ;;  %s15171_s22 = sld [smem:[#allocation125_spill]]  ;;  %vm9950_vm9 = vcmask 1024  }
 0x2a6   :  { %v13932_v2 = vld [vmem:[%s15167_s27] sm:$0xff]  ;;  %v13937_v3 = vld [vmem:[%s15167_s27 + $0x8] sm:$0xff]  ;;  %v13943_v4 = vld [vmem:[%s15167_s27 + $0x10] sm:$0xff]  ;;  %s15172_s8 = sld [smem:[#allocation129_spill]]  ;;  %s13543_s29 = smov 127  }
 0x2a7   :  { %11070 = vmatprep.mubr.msk.f32.mxu0 %vm808_vm1, %v13932_v2  ;;  %11096 = vmatprep.mubr.msk.f32.mxu1 %vm808_vm1, %v13932_v2  ;;  %v13957_v5 = vld [vmem:[%s15167_s27 + $0x18] sm:$0xff]  ;;  %v13960_v6 = vld [vmem:[%s15167_s27 + $0x20] sm:$0xff]  ;;  %v13971_v7 = vld [vmem:[%s15167_s27 + $0x28] sm:$0xff]  ;;  %s15173_s23 = sld [smem:[#allocation128_spill]] }
 0x2a8   :  { %11071 = vmatmul.mubr.msk.f32.vlgmr.msra.gmra.mxu0 %vm808_vm1, %v13937_v3  ;;  %11097 = vmatmul.mubr.msk.f32.vlgmr.msra.gmra.mxu1 %vm808_vm1, %v13937_v3  ;;  %v13974_v8 = vld [vmem:[%s15167_s27 + $0x30] sm:$0xff]  ;;  %v13985_v9 = vld [vmem:[%s15167_s27 + $0x38] sm:$0xff]  ;;  %v13988_v10 = vld [vmem:[%s15167_s27 + $0x40] sm:$0xff] }
 0x2a9   :  { %11073 = vmatprep.mubr.msk.f32.mxu0 %vm808_vm1, %v13943_v4  ;;  %11099 = vmatprep.mubr.msk.f32.mxu1 %vm808_vm1, %v13943_v4  ;;  %v13999_v11 = vld [vmem:[%s15167_s27 + $0x48] sm:$0xff]  ;;  %v14002_v12 = vld [vmem:[%s15167_s27 + $0x50] sm:$0xff]  ;;  %v14013_v13 = vld [vmem:[%s15167_s27 + $0x58] sm:$0xff] }
 0x2aa   :  { %v14016_v14 = vld [vmem:[%s15167_s27 + $0x60] sm:$0xff]  ;;  %v14027_v15 = vld [vmem:[%s15167_s27 + $0x68] sm:$0xff]  ;;  %v14030_v16 = vld [vmem:[%s15167_s27 + $0x70] sm:$0xff] }
 0x2ab   :  { %v14041_v17 = vld [vmem:[%s15167_s27 + $0x78] sm:$0xff]  ;;  %v1012_v1 = vld [vmem:[#allocation69 + $0x30] sm:$0xff] }
 0x2ac   :  { %11074 = vmatmul.mubr.msk.f32.gmra.mxu0 %vm808_vm1, %v13957_v5  ;;  %11100 = vmatmul.mubr.msk.f32.gmra.mxu1 %vm808_vm1, %v13957_v5  ;;  %v1011_v63 = vld [vmem:[#allocation69 + $0x28] sm:$0xff] }
 0x2ad   :  { %11076 = vmatprep.mubr.msk.f32.mxu0 %vm808_vm1, %v13960_v6  ;;  %11102 = vmatprep.mubr.msk.f32.mxu1 %vm808_vm1, %v13960_v6 }
 0x2b0   :  { %11077 = vmatmul.mubr.msk.f32.gmra.mxu0 %vm808_vm1, %v13971_v7  ;;  %11103 = vmatmul.mubr.msk.f32.gmra.mxu1 %vm808_vm1, %v13971_v7 }
 0x2b1   :  { %11079 = vmatprep.mubr.msk.f32.mxu0 %vm808_vm1, %v13974_v8  ;;  %11105 = vmatprep.mubr.msk.f32.mxu1 %vm808_vm1, %v13974_v8 }
 0x2b4   :  { %11080 = vmatmul.mubr.msk.f32.gmra.mxu0 %vm808_vm1, %v13985_v9  ;;  %11106 = vmatmul.mubr.msk.f32.gmra.mxu1 %vm808_vm1, %v13985_v9 }
 0x2b5   :  { %11082 = vmatprep.mubr.msk.f32.mxu0 %vm808_vm1, %v13988_v10  ;;  %11108 = vmatprep.mubr.msk.f32.mxu1 %vm808_vm1, %v13988_v10 }
 0x2b8   :  { %11083 = vmatmul.mubr.msk.f32.gmra.mxu0 %vm808_vm1, %v13999_v11  ;;  %11109 = vmatmul.mubr.msk.f32.gmra.mxu1 %vm808_vm1, %v13999_v11 }
 0x2b9   :  { %11085 = vmatprep.mubr.msk.f32.mxu0 %vm808_vm1, %v14002_v12  ;;  %11111 = vmatprep.mubr.msk.f32.mxu1 %vm808_vm1, %v14002_v12 }
 0x2bc   :  { %11086 = vmatmul.mubr.msk.f32.gmra.mxu0 %vm808_vm1, %v14013_v13  ;;  %11112 = vmatmul.mubr.msk.f32.gmra.mxu1 %vm808_vm1, %v14013_v13 }
 0x2bd   :  { %11088 = vmatprep.mubr.msk.f32.mxu0 %vm808_vm1, %v14016_v14  ;;  %11114 = vmatprep.mubr.msk.f32.mxu1 %vm808_vm1, %v14016_v14 }
 0x2c0   :  { %11089 = vmatmul.mubr.msk.f32.gmra.mxu0 %vm808_vm1, %v14027_v15  ;;  %11115 = vmatmul.mubr.msk.f32.gmra.mxu1 %vm808_vm1, %v14027_v15 }
 0x2c1   :  { %11091 = vmatprep.mubr.msk.f32.mxu0 %vm808_vm1, %v14030_v16  ;;  %11117 = vmatprep.mubr.msk.f32.mxu1 %vm808_vm1, %v14030_v16 }
 0x2c4   :  { %11092 = vmatmul.mubr.msk.f32.gmra.mxu0 %vm808_vm1, %v14041_v17  ;;  %11118 = vmatmul.mubr.msk.f32.gmra.mxu1 %vm808_vm1, %v14041_v17 }
 0x2c5   :  { %11152 = vmatprep.mubr.f32.mxu0 %v1165_v18  ;;  %11196 = vmatprep.mubr.f32.mxu1 %v1006_v19  ;;  %v1172_v18 = vld [vmem:[#allocation69 + $0x78] sm:$0xff] }
 0x2c6   :  { %v1013_v19 = vld [vmem:[#allocation69 + $0x38] sm:$0xff] }
 0x368   :  { %v14047_v20 = vpop.f32.mrf.mxu0  ;;  %v14049_v21 = vpop.f32.mrf.mxu1 }
 0x36a   :  { %v14051_v22 = vpop.f32.mrf.mxu0  ;;  %v14053_v23 = vpop.f32.mrf.mxu1 }
 0x36c   :  { %v14055_v24 = vpop.f32.mrf.mxu0  ;;  %v14057_v25 = vpop.f32.mrf.mxu1 }
 0x36e   :  { %v14059_v26 = vpop.f32.mrf.mxu0  ;;  %v14061_v27 = vpop.f32.mrf.mxu1 }
 0x370   :  { %v14063_v28 = vpop.f32.mrf.mxu0  ;;  %v14065_v29 = vpop.f32.mrf.mxu1 }
 0x372   :  { %v14067_v30 = vpop.f32.mrf.mxu0  ;;  %v14069_v31 = vpop.f32.mrf.mxu1 }
 0x374   :  { %v11081_v32 = vpop.f32.mrf.mxu0  ;;  %v11107_v33 = vpop.f32.mrf.mxu1 }
 0x376   :  { %v957_v34 = vpop.f32.mrf.mxu0  ;;  %v1115_v35 = vpop.f32.mrf.mxu1 }
 0x378   :  { %v11084_v36 = vpop.f32.mrf.mxu0  ;;  %v11110_v37 = vpop.f32.mrf.mxu1 }
 0x37a   :  { %v967_v38 = vpop.f32.mrf.mxu0  ;;  %v1125_v39 = vpop.f32.mrf.mxu1 }
 0x37c   :  { %v11087_v40 = vpop.f32.mrf.mxu0  ;;  %v11113_v41 = vpop.f32.mrf.mxu1 }
 0x37e   :  { %v977_v42 = vpop.f32.mrf.mxu0  ;;  %v1135_v43 = vpop.f32.mrf.mxu1 }
 0x380   :  { %v11090_v44 = vpop.f32.mrf.mxu0  ;;  %v11116_v45 = vpop.f32.mrf.mxu1 }
 0x382   :  { %v987_v46 = vpop.f32.mrf.mxu0  ;;  %v1145_v47 = vpop.f32.mrf.mxu1 }
 0x384   :  { %v11093_v48 = vpop.f32.mrf.mxu0  ;;  %v11119_v49 = vpop.f32.mrf.mxu1 }
 0x385   :  { %11120 = vmatprep.subr.mxu0 %v11119_v49  ;;  %11164 = vmatprep.subr.mxu1 %v11093_v48 }
 0x386   :  { %v997_v50 = vpop.f32.mrf.mxu0  ;;  %v1155_v51 = vpop.f32.mrf.mxu1  ;;  %11121 = vmatpush3.msra.mxu0 %v11119_v49  ;;  %11165 = vmatpush3.msra.mxu1 %v11093_v48 }
 0x387   :  { %11122 = vmatprep.subr.mxu0 %v1155_v51  ;;  %11166 = vmatprep.subr.mxu1 %v997_v50 }
 0x388   :  { %11123 = vmatpush3.msra.mxu0 %v1155_v51  ;;  %11167 = vmatpush3.msra.mxu1 %v997_v50 }
 0x389   :  { %11124 = vmatprep.subr.mxu0 %v11116_v45  ;;  %11168 = vmatprep.subr.mxu1 %v11090_v44 }
 0x38a   :  { %11125 = vmatpush3.msra.mxu0 %v11116_v45  ;;  %11169 = vmatpush3.msra.mxu1 %v11090_v44 }
 0x38b   :  { %11126 = vmatprep.subr.mxu0 %v1145_v47  ;;  %11170 = vmatprep.subr.mxu1 %v987_v46 }
 0x38c   :  { %11127 = vmatpush3.msra.mxu0 %v1145_v47  ;;  %11171 = vmatpush3.msra.mxu1 %v987_v46 }
 0x38d   :  { %11128 = vmatprep.subr.mxu0 %v11113_v41  ;;  %11172 = vmatprep.subr.mxu1 %v11087_v40 }
 0x38e   :  { %11129 = vmatpush3.msra.mxu0 %v11113_v41  ;;  %11173 = vmatpush3.msra.mxu1 %v11087_v40 }
 0x38f   :  { %11130 = vmatprep.subr.mxu0 %v1135_v43  ;;  %11174 = vmatprep.subr.mxu1 %v977_v42 }
 0x390   :  { %11131 = vmatpush3.msra.mxu0 %v1135_v43  ;;  %11175 = vmatpush3.msra.mxu1 %v977_v42 }
 0x391   :  { %11132 = vmatprep.subr.mxu0 %v11110_v37  ;;  %11176 = vmatprep.subr.mxu1 %v11084_v36 }
 0x392   :  { %11133 = vmatpush3.msra.mxu0 %v11110_v37  ;;  %11177 = vmatpush3.msra.mxu1 %v11084_v36 }
 0x393   :  { %11134 = vmatprep.subr.mxu0 %v1125_v39  ;;  %11178 = vmatprep.subr.mxu1 %v967_v38 }
 0x394   :  { %11135 = vmatpush3.msra.mxu0 %v1125_v39  ;;  %11179 = vmatpush3.msra.mxu1 %v967_v38 }
 0x395   :  { %11136 = vmatprep.subr.mxu0 %v11107_v33  ;;  %11180 = vmatprep.subr.mxu1 %v11081_v32 }
 0x396   :  { %11137 = vmatpush3.msra.mxu0 %v11107_v33  ;;  %11181 = vmatpush3.msra.mxu1 %v11081_v32 }
 0x397   :  { %11138 = vmatprep.subr.mxu0 %v1115_v35  ;;  %11182 = vmatprep.subr.mxu1 %v957_v34 }
 0x398   :  { %11139 = vmatpush3.msra.mxu0 %v1115_v35  ;;  %11183 = vmatpush3.msra.mxu1 %v957_v34 }
 0x399   :  { %11140 = vmatprep.subr.mxu0 %v14065_v29  ;;  %11184 = vmatprep.subr.mxu1 %v14063_v28 }
 0x39a   :  { %11141 = vmatpush3.msra.mxu0 %v14065_v29  ;;  %11185 = vmatpush3.msra.mxu1 %v14063_v28 }
 0x39b   :  { %11142 = vmatprep.subr.mxu0 %v14069_v31  ;;  %11186 = vmatprep.subr.mxu1 %v14067_v30 }
 0x39c   :  { %11143 = vmatpush3.msra.mxu0 %v14069_v31  ;;  %11187 = vmatpush3.msra.mxu1 %v14067_v30 }
 0x39d   :  { %11144 = vmatprep.subr.mxu0 %v14057_v25  ;;  %11188 = vmatprep.subr.mxu1 %v14055_v24 }
 0x39e   :  { %11145 = vmatpush3.msra.mxu0 %v14057_v25  ;;  %11189 = vmatpush3.msra.mxu1 %v14055_v24 }
 0x39f   :  { %11146 = vmatprep.subr.mxu0 %v14061_v27  ;;  %11190 = vmatprep.subr.mxu1 %v14059_v26 }
 0x3a0   :  { %11147 = vmatpush3.msra.mxu0 %v14061_v27  ;;  %11191 = vmatpush3.msra.mxu1 %v14059_v26 }
 0x3a1   :  { %11148 = vmatprep.subr.mxu0 %v14049_v21  ;;  %11192 = vmatprep.subr.mxu1 %v14047_v20 }
 0x3a2   :  { %11149 = vmatpush3.msra.mxu0 %v14049_v21  ;;  %11193 = vmatpush3.msra.mxu1 %v14047_v20  ;;  %v10115_v20 = vld [vmem:[%s13817_s9 + $0x4] sm:$0x1]  ;;  %v10133_v21 = vld [vmem:[%s13817_s9 + $0x5] sm:$0x1] }
 0x3a3   :  { %11150 = vmatprep.subr.mxu0 %v14053_v23  ;;  %11194 = vmatprep.subr.mxu1 %v14051_v22 }
 0x3a4   :  { %11151 = vmatpush3.msra.mxu0 %v14053_v23  ;;  %11195 = vmatpush3.msra.mxu1 %v14051_v22  ;;  %v10151_v22 = vld [vmem:[%s13817_s9 + $0x6] sm:$0x1]  ;;  %v1534_v23 = vld [vmem:[#allocation69 + $0x80] sm:$0xff]  ;;  %s15168_s9 = sld [smem:[#allocation130_spill]] }
 0x3a5   :  { %11153 = vmatmul.mubr.f32.vlgmr.msra.gmra.mxu0 %v1166_v52  ;;  %11197 = vmatmul.mubr.f32.vlgmr.msra.gmra.mxu1 %v1007_v53 }
 0x3a6   :  { %11155 = vmatprep.mubr.f32.mxu0 %v1167_v54  ;;  %11199 = vmatprep.mubr.f32.mxu1 %v1008_v55 }
 0x3a7   :  { %11208 = vmatprep.subr.msk.mxu0 %vm857_vm0, %v10079_v56 }
 0x3a8   :  { %11209 = vmatpush3.msk.msra.mxu0 %vm857_vm0, %v10079_v56 }
 0x3a9   :  { %11156 = vmatmul.mubr.f32.gmra.mxu0 %v1168_v57  ;;  %11200 = vmatmul.mubr.f32.gmra.mxu1 %v1009_v58  ;;  %v1535_v57 = vld [vmem:[#allocation69 + $0x88] sm:$0xff]  ;;  %v1536_v58 = vld [vmem:[#allocation69 + $0x90] sm:$0xff] }
 0x3aa   :  { %11158 = vmatprep.mubr.f32.mxu0 %v1169_v59  ;;  %11202 = vmatprep.mubr.f32.mxu1 %v1010_v60 }
 0x3ab   :  { %11278 = vmatprep.subr.msk.mxu0 %vm857_vm0, %v10097_v61 }
 0x3ad   :  { %11159 = vmatmul.mubr.f32.gmra.mxu0 %v1170_v62  ;;  %11203 = vmatmul.mubr.f32.gmra.mxu1 %v1011_v63  ;;  %v1538_v62 = vld [vmem:[#allocation69 + $0xa0] sm:$0xff] }
 0x3ae   :  { %11161 = vmatprep.mubr.f32.mxu0 %v1171_v0  ;;  %11205 = vmatprep.mubr.f32.mxu1 %v1012_v1  ;;  %v1539_v1 = vld [vmem:[#allocation69 + $0xa8] sm:$0xff] }
 0x3b1   :  { %11162 = vmatmul.mubr.f32.gmra.mxu0 %v1172_v18  ;;  %11206 = vmatmul.mubr.f32.gmra.mxu1 %v1013_v19  ;;  %v1540_v18 = vld [vmem:[#allocation69 + $0xb0] sm:$0xff] }
 0x3b2   :  { %11210 = vmatprep.mubr.msk.f32.mxu0 %vm808_vm1, %v13932_v2  ;;  %11266 = vmatprep.mubr.f32.mxu1 %v1534_v23 }
 0x3b5   :  { %11211 = vmatmul.mubr.msk.f32.vlgmr.msra.gmra.mxu0 %vm808_vm1, %v13937_v3 }
 0x3b6   :  { %11213 = vmatprep.mubr.msk.f32.mxu0 %vm808_vm1, %v13943_v4  ;;  %11279 = vmatpush3.msk.msra.mxu0 %vm857_vm0, %v10097_v61  ;;  %v1537_v61 = vld [vmem:[#allocation69 + $0x98] sm:$0xff] }
 0x3b7   :  { %11348 = vmatprep.subr.msk.mxu0 %vm857_vm0, %v10115_v20 }
 0x3b9   :  { %11214 = vmatmul.mubr.msk.f32.gmra.mxu0 %vm808_vm1, %v13957_v5 }
 0x3ba   :  { %11216 = vmatprep.mubr.msk.f32.mxu0 %vm808_vm1, %v13960_v6 }
 0x3bd   :  { %11217 = vmatmul.mubr.msk.f32.gmra.mxu0 %vm808_vm1, %v13971_v7 }
 0x3be   :  { %11219 = vmatprep.mubr.msk.f32.mxu0 %vm808_vm1, %v13974_v8 }
 0x3c1   :  { %11220 = vmatmul.mubr.msk.f32.gmra.mxu0 %vm808_vm1, %v13985_v9 }
 0x3c2   :  { %11222 = vmatprep.mubr.msk.f32.mxu0 %vm808_vm1, %v13988_v10 }
 0x3c5   :  { %11223 = vmatmul.mubr.msk.f32.gmra.mxu0 %vm808_vm1, %v13999_v11 }
 0x3c6   :  { %11225 = vmatprep.mubr.msk.f32.mxu0 %vm808_vm1, %v14002_v12 }
 0x3c9   :  { %11226 = vmatmul.mubr.msk.f32.gmra.mxu0 %vm808_vm1, %v14013_v13 }
 0x3ca   :  { %11228 = vmatprep.mubr.msk.f32.mxu0 %vm808_vm1, %v14016_v14 }
 0x3cd   :  { %11229 = vmatmul.mubr.msk.f32.gmra.mxu0 %vm808_vm1, %v14027_v15 }
 0x3ce   :  { %11231 = vmatprep.mubr.msk.f32.mxu0 %vm808_vm1, %v14030_v16 }
 0x3d1   :  { %11232 = vmatmul.mubr.msk.f32.gmra.mxu0 %vm808_vm1, %v14041_v17 }
 0x3d2   :  { %11280 = vmatprep.mubr.msk.f32.mxu0 %vm808_vm1, %v13932_v2 }
 0x3d5   :  { %11281 = vmatmul.mubr.msk.f32.vlgmr.msra.gmra.mxu0 %vm808_vm1, %v13937_v3 }
 0x3d6   :  { %11283 = vmatprep.mubr.msk.f32.mxu0 %vm808_vm1, %v13943_v4  ;;  %11349 = vmatpush3.msk.msra.mxu0 %vm857_vm0, %v10115_v20 }
 0x3d7   :  { %11418 = vmatprep.subr.msk.mxu0 %vm857_vm0, %v10133_v21 }
 0x3d9   :  { %11284 = vmatmul.mubr.msk.f32.gmra.mxu0 %vm808_vm1, %v13957_v5 }
 0x3da   :  { %11286 = vmatprep.mubr.msk.f32.mxu0 %vm808_vm1, %v13960_v6 }
 0x3dd   :  { %11287 = vmatmul.mubr.msk.f32.gmra.mxu0 %vm808_vm1, %v13971_v7 }
 0x3de   :  { %11289 = vmatprep.mubr.msk.f32.mxu0 %vm808_vm1, %v13974_v8 }
 0x3e1   :  { %11290 = vmatmul.mubr.msk.f32.gmra.mxu0 %vm808_vm1, %v13985_v9 }
 0x3e2   :  { %11292 = vmatprep.mubr.msk.f32.mxu0 %vm808_vm1, %v13988_v10 }
 0x3e5   :  { %11293 = vmatmul.mubr.msk.f32.gmra.mxu0 %vm808_vm1, %v13999_v11 }
 0x3e6   :  { %11295 = vmatprep.mubr.msk.f32.mxu0 %vm808_vm1, %v14002_v12 }
 0x3e9   :  { %11296 = vmatmul.mubr.msk.f32.gmra.mxu0 %vm808_vm1, %v14013_v13 }
 0x3ea   :  { %11298 = vmatprep.mubr.msk.f32.mxu0 %vm808_vm1, %v14016_v14 }
 0x3ed   :  { %11299 = vmatmul.mubr.msk.f32.gmra.mxu0 %vm808_vm1, %v14027_v15 }
 0x3ee   :  { %11301 = vmatprep.mubr.msk.f32.mxu0 %vm808_vm1, %v14030_v16 }
 0x3f1   :  { %11302 = vmatmul.mubr.msk.f32.gmra.mxu0 %vm808_vm1, %v14041_v17 }
 0x3f2   :  { %11350 = vmatprep.mubr.msk.f32.mxu0 %vm808_vm1, %v13932_v2 }
 0x3f5   :  { %11351 = vmatmul.mubr.msk.f32.vlgmr.msra.gmra.mxu0 %vm808_vm1, %v13937_v3 }
 0x3f6   :  { %11353 = vmatprep.mubr.msk.f32.mxu0 %vm808_vm1, %v13943_v4  ;;  %11419 = vmatpush3.msk.msra.mxu0 %vm857_vm0, %v10133_v21  ;;  %v1541_v21 = vld [vmem:[#allocation69 + $0xb8] sm:$0xff] }
 0x3f7   :  { %11488 = vmatprep.subr.msk.mxu0 %vm857_vm0, %v10151_v22 }
 0x3f9   :  { %11354 = vmatmul.mubr.msk.f32.gmra.mxu0 %vm808_vm1, %v13957_v5 }
 0x3fa   :  { %11356 = vmatprep.mubr.msk.f32.mxu0 %vm808_vm1, %v13960_v6 }
 0x3fd   :  { %11357 = vmatmul.mubr.msk.f32.gmra.mxu0 %vm808_vm1, %v13971_v7 }
 0x3fe   :  { %11359 = vmatprep.mubr.msk.f32.mxu0 %vm808_vm1, %v13974_v8 }
 0x401   :  { %11360 = vmatmul.mubr.msk.f32.gmra.mxu0 %vm808_vm1, %v13985_v9 }
 0x402   :  { %11362 = vmatprep.mubr.msk.f32.mxu0 %vm808_vm1, %v13988_v10 }
 0x405   :  { %11363 = vmatmul.mubr.msk.f32.gmra.mxu0 %vm808_vm1, %v13999_v11 }
 0x406   :  { %11365 = vmatprep.mubr.msk.f32.mxu0 %vm808_vm1, %v14002_v12 }
 0x409   :  { %11366 = vmatmul.mubr.msk.f32.gmra.mxu0 %vm808_vm1, %v14013_v13 }
 0x40a   :  { %11368 = vmatprep.mubr.msk.f32.mxu0 %vm808_vm1, %v14016_v14 }
 0x40d   :  { %11369 = vmatmul.mubr.msk.f32.gmra.mxu0 %vm808_vm1, %v14027_v15 }
 0x40e   :  { %11371 = vmatprep.mubr.msk.f32.mxu0 %vm808_vm1, %v14030_v16 }
 0x411   :  { %11372 = vmatmul.mubr.msk.f32.gmra.mxu0 %vm808_vm1, %v14041_v17 }
 0x412   :  { %11420 = vmatprep.mubr.msk.f32.mxu0 %vm808_vm1, %v13932_v2 }
 0x415   :  { %11421 = vmatmul.mubr.msk.f32.vlgmr.msra.gmra.mxu0 %vm808_vm1, %v13937_v3 }
 0x416   :  { %11423 = vmatprep.mubr.msk.f32.mxu0 %vm808_vm1, %v13943_v4  ;;  %11489 = vmatpush3.msk.msra.mxu0 %vm857_vm0, %v10151_v22  ;;  %v1806_v22 = vld [vmem:[#allocation69 + $0xc0] sm:$0xff] }
 0x419   :  { %11424 = vmatmul.mubr.msk.f32.gmra.mxu0 %vm808_vm1, %v13957_v5 }
 0x41a   :  { %11426 = vmatprep.mubr.msk.f32.mxu0 %vm808_vm1, %v13960_v6 }
 0x41d   :  { %11427 = vmatmul.mubr.msk.f32.gmra.mxu0 %vm808_vm1, %v13971_v7 }
 0x41e   :  { %11429 = vmatprep.mubr.msk.f32.mxu0 %vm808_vm1, %v13974_v8 }
 0x421   :  { %11430 = vmatmul.mubr.msk.f32.gmra.mxu0 %vm808_vm1, %v13985_v9 }
 0x422   :  { %11432 = vmatprep.mubr.msk.f32.mxu0 %vm808_vm1, %v13988_v10 }
 0x425   :  { %11433 = vmatmul.mubr.msk.f32.gmra.mxu0 %vm808_vm1, %v13999_v11 }
 0x426   :  { %11435 = vmatprep.mubr.msk.f32.mxu0 %vm808_vm1, %v14002_v12 }
 0x429   :  { %11436 = vmatmul.mubr.msk.f32.gmra.mxu0 %vm808_vm1, %v14013_v13 }
 0x42a   :  { %11438 = vmatprep.mubr.msk.f32.mxu0 %vm808_vm1, %v14016_v14 }
 0x42d   :  { %11439 = vmatmul.mubr.msk.f32.gmra.mxu0 %vm808_vm1, %v14027_v15 }
 0x42e   :  { %11441 = vmatprep.mubr.msk.f32.mxu0 %vm808_vm1, %v14030_v16 }
 0x431   :  { %11442 = vmatmul.mubr.msk.f32.gmra.mxu0 %vm808_vm1, %v14041_v17 }
 0x432   :  { %11490 = vmatprep.mubr.msk.f32.mxu0 %vm808_vm1, %v13932_v2 }
 0x435   :  { %11491 = vmatmul.mubr.msk.f32.vlgmr.msra.gmra.mxu0 %vm808_vm1, %v13937_v3 }
 0x436   :  { %11493 = vmatprep.mubr.msk.f32.mxu0 %vm808_vm1, %v13943_v4 }
 0x439   :  { %11494 = vmatmul.mubr.msk.f32.gmra.mxu0 %vm808_vm1, %v13957_v5 }
 0x43a   :  { %11496 = vmatprep.mubr.msk.f32.mxu0 %vm808_vm1, %v13960_v6 }
 0x43d   :  { %11497 = vmatmul.mubr.msk.f32.gmra.mxu0 %vm808_vm1, %v13971_v7 }
 0x43e   :  { %11499 = vmatprep.mubr.msk.f32.mxu0 %vm808_vm1, %v13974_v8 }
 0x441   :  { %11500 = vmatmul.mubr.msk.f32.gmra.mxu0 %vm808_vm1, %v13985_v9 }
 0x442   :  { %11502 = vmatprep.mubr.msk.f32.mxu0 %vm808_vm1, %v13988_v10 }
 0x445   :  { %11503 = vmatmul.mubr.msk.f32.gmra.mxu0 %vm808_vm1, %v13999_v11 }
 0x446   :  { %11505 = vmatprep.mubr.msk.f32.mxu0 %vm808_vm1, %v14002_v12 }
 0x449   :  { %11506 = vmatmul.mubr.msk.f32.gmra.mxu0 %vm808_vm1, %v14013_v13 }
 0x44a   :  { %11508 = vmatprep.mubr.msk.f32.mxu0 %vm808_vm1, %v14016_v14 }
 0x44d   :  { %11509 = vmatmul.mubr.msk.f32.gmra.mxu0 %vm808_vm1, %v14027_v15 }
 0x44e   :  { %11511 = vmatprep.mubr.msk.f32.mxu0 %vm808_vm1, %v14030_v16 }
 0x451   :  { %11512 = vmatmul.mubr.msk.f32.gmra.mxu0 %vm808_vm1, %v14041_v17 }
 0x465   :  { %v11154_v2 = vpop.f32.mrf.mxu0  ;;  %v11198_v3 = vpop.f32.mrf.mxu1 }
 0x466   :  { %v14270_v4 = vadd.f32 %v11198_v3, %v11154_v2 }
 0x467   :  { %v14272_v5 = vpop.f32.mrf.mxu0  ;;  %v14274_v6 = vpop.f32.mrf.mxu1 }
 0x469   :  { %v11157_v7 = vpop.f32.mrf.mxu0  ;;  %v11201_v8 = vpop.f32.mrf.mxu1 }
 0x46a   :  { %v14276_v9 = vadd.f32 %v11201_v8, %v11157_v7 }
 0x46b   :  { %v14278_v10 = vpop.f32.mrf.mxu0  ;;  %v14280_v11 = vpop.f32.mrf.mxu1 }
 0x46d   :  { %v11160_v12 = vpop.f32.mrf.mxu0  ;;  %v11204_v13 = vpop.f32.mrf.mxu1 }
 0x46e   :  { %v14282_v14 = vadd.f32 %v11204_v13, %v11160_v12 }
 0x46f   :  { %v14284_v15 = vpop.f32.mrf.mxu0  ;;  %v14286_v16 = vpop.f32.mrf.mxu1 }
 0x471   :  { %v11163_v17 = vpop.f32.mrf.mxu0  ;;  %v11207_v24 = vpop.f32.mrf.mxu1 }
 0x472   :  { %v14288_v25 = vadd.f32 %v11207_v24, %v11163_v17 }
 0x473   :  { %v14290_v26 = vpop.f32.mrf.mxu0 }
 0x475   :  { %v11212_v27 = vpop.f32.mrf.mxu0 }
 0x477   :  { %v1454_v28 = vpop.f32.mrf.mxu0 }
 0x479   :  { %v11215_v29 = vpop.f32.mrf.mxu0 }
 0x47b   :  { %v1464_v30 = vpop.f32.mrf.mxu0 }
 0x47d   :  { %v11218_v31 = vpop.f32.mrf.mxu0 }
 0x47f   :  { %v1474_v32 = vpop.f32.mrf.mxu0 }
 0x481   :  { %v11221_v33 = vpop.f32.mrf.mxu0 }
 0x483   :  { %v1484_v34 = vpop.f32.mrf.mxu0 }
 0x485   :  { %v11224_v35 = vpop.f32.mrf.mxu0 }
 0x487   :  { %v1494_v36 = vpop.f32.mrf.mxu0 }
 0x489   :  { %v11227_v37 = vpop.f32.mrf.mxu0 }
 0x48b   :  { %v1504_v38 = vpop.f32.mrf.mxu0 }
 0x48d   :  { %v11230_v39 = vpop.f32.mrf.mxu0 }
 0x48f   :  { %v1514_v40 = vpop.f32.mrf.mxu0 }
 0x491   :  { %v11233_v41 = vpop.f32.mrf.mxu0 }
 0x492   :  { %11234 = vmatprep.subr.mxu1 %v11233_v41 }
 0x493   :  { %v1524_v42 = vpop.f32.mrf.mxu0  ;;  %11235 = vmatpush3.msra.mxu1 %v11233_v41  ;;  %v2078_v41 = vld [vmem:[#allocation69 + $0x100] sm:$0xff] }
 0x494   :  { %11236 = vmatprep.subr.mxu1 %v1524_v42 }
 0x495   :  { %11237 = vmatpush3.msra.mxu1 %v1524_v42  ;;  %v14292_v43 = vpop.f32.mrf.mxu0 }
 0x496   :  { %11238 = vmatprep.subr.mxu1 %v11230_v39 }
 0x497   :  { %11239 = vmatpush3.msra.mxu1 %v11230_v39  ;;  %v14294_v44 = vpop.f32.mrf.mxu0 }
 0x498   :  { %11240 = vmatprep.subr.mxu1 %v1514_v40 }
 0x499   :  { %11241 = vmatpush3.msra.mxu1 %v1514_v40  ;;  %v14296_v45 = vpop.f32.mrf.mxu0  ;;  %v1813_v40 = vld [vmem:[#allocation69 + $0xf8] sm:$0xff] }
 0x49a   :  { %11242 = vmatprep.subr.mxu1 %v11227_v37 }
 0x49b   :  { %11243 = vmatpush3.msra.mxu1 %v11227_v37  ;;  %v14298_v46 = vpop.f32.mrf.mxu0  ;;  %v1812_v37 = vld [vmem:[#allocation69 + $0xf0] sm:$0xff] }
 0x49c   :  { %11244 = vmatprep.subr.mxu1 %v1504_v38 }
 0x49d   :  { %11245 = vmatpush3.msra.mxu1 %v1504_v38  ;;  %v14300_v47 = vpop.f32.mrf.mxu0 }
 0x49e   :  { %11246 = vmatprep.subr.mxu1 %v11224_v35 }
 0x49f   :  { %11247 = vmatpush3.msra.mxu1 %v11224_v35  ;;  %v14302_v48 = vpop.f32.mrf.mxu0 }
 0x4a0   :  { %11248 = vmatprep.subr.mxu1 %v1494_v36 }
 0x4a1   :  { %11249 = vmatpush3.msra.mxu1 %v1494_v36  ;;  %v14304_v49 = vpop.f32.mrf.mxu0  ;;  %v1811_v36 = vld [vmem:[#allocation69 + $0xe8] sm:$0xff] }
 0x4a2   :  { %11250 = vmatprep.subr.mxu1 %v11221_v33 }
 0x4a3   :  { %11251 = vmatpush3.msra.mxu1 %v11221_v33  ;;  %v14306_v50 = vpop.f32.mrf.mxu0  ;;  %v1810_v33 = vld [vmem:[#allocation69 + $0xe0] sm:$0xff] }
 0x4a4   :  { %11252 = vmatprep.subr.mxu1 %v1484_v34 }
 0x4a5   :  { %11253 = vmatpush3.msra.mxu1 %v1484_v34  ;;  %v11294_v51 = vpop.f32.mrf.mxu0 }
 0x4a6   :  { %11254 = vmatprep.subr.mxu1 %v11218_v31 }
 0x4a7   :  { %11255 = vmatpush3.msra.mxu1 %v11218_v31  ;;  %v1766_v52 = vpop.f32.mrf.mxu0 }
 0x4a8   :  { %11256 = vmatprep.subr.mxu1 %v1474_v32 }
 0x4a9   :  { %11257 = vmatpush3.msra.mxu1 %v1474_v32  ;;  %v11297_v53 = vpop.f32.mrf.mxu0  ;;  %v1809_v32 = vld [vmem:[#allocation69 + $0xd8] sm:$0xff] }
 0x4aa   :  { %11258 = vmatprep.subr.mxu1 %v11215_v29 }
 0x4ab   :  { %11259 = vmatpush3.msra.mxu1 %v11215_v29  ;;  %v1776_v54 = vpop.f32.mrf.mxu0  ;;  %v1808_v29 = vld [vmem:[#allocation69 + $0xd0] sm:$0xff] }
 0x4ac   :  { %11260 = vmatprep.subr.mxu1 %v1464_v30 }
 0x4ad   :  { %11261 = vmatpush3.msra.mxu1 %v1464_v30  ;;  %v11300_v55 = vpop.f32.mrf.mxu0 }
 0x4ae   :  { %11262 = vmatprep.subr.mxu1 %v11212_v27 }
 0x4af   :  { %11263 = vmatpush3.msra.mxu1 %v11212_v27  ;;  %v1786_v56 = vpop.f32.mrf.mxu0 }
 0x4b0   :  { %11264 = vmatprep.subr.mxu1 %v1454_v28 }
 0x4b1   :  { %11265 = vmatpush3.msra.mxu1 %v1454_v28  ;;  %v11303_v59 = vpop.f32.mrf.mxu0  ;;  %v1807_v28 = vld [vmem:[#allocation69 + $0xc8] sm:$0xff] }
 0x4b2   :  { %11267 = vmatmul.mubr.f32.vlgmr.msra.gmra.mxu1 %v1535_v57  ;;  %11304 = vmatprep.subr.mxu1 %v11303_v59  ;;  %v2082_v57 = vld [vmem:[#allocation69 + $0x120] sm:$0xff] }
 0x4b3   :  { %v1796_v60 = vpop.f32.mrf.mxu0  ;;  %11305 = vmatpush3.msra.mxu1 %v11303_v59  ;;  %11269 = vmatprep.mubr.f32.mxu1 %v1536_v58 }
 0x4b4   :  { %11306 = vmatprep.subr.mxu1 %v1796_v60 }
 0x4b5   :  { %11307 = vmatpush3.msra.mxu1 %v1796_v60  ;;  %v14308_v63 = vpop.f32.mrf.mxu0  ;;  %v2083_v60 = vld [vmem:[#allocation69 + $0x128] sm:$0xff] }
 0x4b6   :  { %11270 = vmatmul.mubr.f32.gmra.mxu1 %v1537_v61  ;;  %11308 = vmatprep.subr.mxu1 %v11300_v55  ;;  %v2084_v61 = vld [vmem:[#allocation69 + $0x130] sm:$0xff] }
 0x4b7   :  { %11309 = vmatpush3.msra.mxu1 %v11300_v55  ;;  %v14310_v0 = vpop.f32.mrf.mxu0  ;;  %11272 = vmatprep.mubr.f32.mxu1 %v1538_v62 }
 0x4b8   :  { %11310 = vmatprep.subr.mxu1 %v1786_v56 }
 0x4b9   :  { %11311 = vmatpush3.msra.mxu1 %v1786_v56  ;;  %v14312_v19 = vpop.f32.mrf.mxu0  ;;  %v2081_v56 = vld [vmem:[#allocation69 + $0x118] sm:$0xff] }
 0x4ba   :  { %11273 = vmatmul.mubr.f32.gmra.mxu1 %v1539_v1  ;;  %11312 = vmatprep.subr.mxu1 %v11297_v53  ;;  %v2350_v1 = vld [vmem:[#allocation69 + $0x140] sm:$0xff] }
 0x4bb   :  { %11313 = vmatpush3.msra.mxu1 %v11297_v53  ;;  %v14314_v20 = vpop.f32.mrf.mxu0  ;;  %11275 = vmatprep.mubr.f32.mxu1 %v1540_v18  ;;  %v2080_v53 = vld [vmem:[#allocation69 + $0x110] sm:$0xff] }
 0x4bc   :  { %11314 = vmatprep.subr.mxu1 %v1776_v54 }
 0x4bd   :  { %11315 = vmatpush3.msra.mxu1 %v1776_v54  ;;  %v14316_v23 = vpop.f32.mrf.mxu0 }
 0x4be   :  { %11276 = vmatmul.mubr.f32.gmra.mxu1 %v1541_v21  ;;  %11316 = vmatprep.subr.mxu1 %v11294_v51 }
 0x4bf   :  { %11317 = vmatpush3.msra.mxu1 %v11294_v51  ;;  %v14318_v2 = vpop.f32.mrf.mxu0  ;;  %11336 = vmatprep.mubr.f32.mxu1 %v1806_v22 }
 0x4c0   :  { %11318 = vmatprep.subr.mxu1 %v1766_v52 }
 0x4c1   :  { %11319 = vmatpush3.msra.mxu1 %v1766_v52  ;;  %v14320_v3 = vpop.f32.mrf.mxu0  ;;  %v2079_v52 = vld [vmem:[#allocation69 + $0x108] sm:$0xff] }
 0x4c2   :  { %11320 = vmatprep.subr.mxu1 %v14304_v49 }
 0x4c3   :  { %11321 = vmatpush3.msra.mxu1 %v14304_v49  ;;  %v14324_v7 = vpop.f32.mrf.mxu0 }
 0x4c4   :  { %11322 = vmatprep.subr.mxu1 %v14306_v50 }
 0x4c5   :  { %11323 = vmatpush3.msra.mxu1 %v14306_v50  ;;  %v11364_v8 = vpop.f32.mrf.mxu0 }
 0x4c6   :  { %11324 = vmatprep.subr.mxu1 %v14300_v47 }
 0x4c7   :  { %11325 = vmatpush3.msra.mxu1 %v14300_v47  ;;  %v2038_v12 = vpop.f32.mrf.mxu0 }
 0x4c8   :  { %11326 = vmatprep.subr.mxu1 %v14302_v48 }
 0x4c9   :  { %11327 = vmatpush3.msra.mxu1 %v14302_v48  ;;  %v11367_v13 = vpop.f32.mrf.mxu0 }
 0x4ca   :  { %11328 = vmatprep.subr.mxu1 %v14296_v45 }
 0x4cb   :  { %11329 = vmatpush3.msra.mxu1 %v14296_v45  ;;  %v2048_v17 = vpop.f32.mrf.mxu0 }
 0x4cc   :  { %11330 = vmatprep.subr.mxu1 %v14298_v46 }
 0x4cd   :  { %11331 = vmatpush3.msra.mxu1 %v14298_v46  ;;  %v11370_v24 = vpop.f32.mrf.mxu0 }
 0x4ce   :  { %11332 = vmatprep.subr.mxu1 %v14292_v43 }
 0x4cf   :  { %11333 = vmatpush3.msra.mxu1 %v14292_v43  ;;  %v2058_v27 = vpop.f32.mrf.mxu0 }
 0x4d0   :  { %11334 = vmatprep.subr.mxu1 %v14294_v44 }
 0x4d1   :  { %11335 = vmatpush3.msra.mxu1 %v14294_v44  ;;  %v11373_v30 = vpop.f32.mrf.mxu0 }
 0x4d2   :  { %11337 = vmatmul.mubr.f32.vlgmr.msra.gmra.mxu1 %v1807_v28  ;;  %11374 = vmatprep.subr.mxu1 %v11373_v30  ;;  %v2354_v28 = vld [vmem:[#allocation69 + $0x160] sm:$0xff] }
 0x4d3   :  { %v2068_v31 = vpop.f32.mrf.mxu0  ;;  %11375 = vmatpush3.msra.mxu1 %v11373_v30  ;;  %11339 = vmatprep.mubr.f32.mxu1 %v1808_v29  ;;  %v2355_v29 = vld [vmem:[#allocation69 + $0x168] sm:$0xff]  ;;  %v2356_v30 = vld [vmem:[#allocation69 + $0x170] sm:$0xff] }
 0x4d4   :  { %11376 = vmatprep.subr.mxu1 %v2068_v31 }
 0x4d5   :  { %11377 = vmatpush3.msra.mxu1 %v2068_v31  ;;  %v14340_v34 = vpop.f32.mrf.mxu0  ;;  %v2357_v31 = vld [vmem:[#allocation69 + $0x178] sm:$0xff] }
 0x4d6   :  { %11340 = vmatmul.mubr.f32.gmra.mxu1 %v1809_v32  ;;  %11378 = vmatprep.subr.mxu1 %v11370_v24  ;;  %v2622_v32 = vld [vmem:[#allocation69 + $0x180] sm:$0xff] }
 0x4d7   :  { %11379 = vmatpush3.msra.mxu1 %v11370_v24  ;;  %v14342_v35 = vpop.f32.mrf.mxu0  ;;  %11342 = vmatprep.mubr.f32.mxu1 %v1810_v33  ;;  %v2623_v33 = vld [vmem:[#allocation69 + $0x188] sm:$0xff] }
 0x4d8   :  { %11380 = vmatprep.subr.mxu1 %v2058_v27 }
 0x4d9   :  { %11381 = vmatpush3.msra.mxu1 %v2058_v27  ;;  %v14344_v38 = vpop.f32.mrf.mxu0  ;;  %v2353_v27 = vld [vmem:[#allocation69 + $0x158] sm:$0xff] }
 0x4da   :  { %11343 = vmatmul.mubr.f32.gmra.mxu1 %v1811_v36  ;;  %11382 = vmatprep.subr.mxu1 %v11367_v13  ;;  %v2626_v36 = vld [vmem:[#allocation69 + $0x1a0] sm:$0xff] }
 0x4db   :  { %11383 = vmatpush3.msra.mxu1 %v11367_v13  ;;  %v14346_v39 = vpop.f32.mrf.mxu0  ;;  %11345 = vmatprep.mubr.f32.mxu1 %v1812_v37  ;;  %v2352_v13 = vld [vmem:[#allocation69 + $0x150] sm:$0xff]  ;;  %v2627_v37 = vld [vmem:[#allocation69 + $0x1a8] sm:$0xff] }
 0x4dc   :  { %11384 = vmatprep.subr.mxu1 %v2048_v17 }
 0x4dd   :  { %11385 = vmatpush3.msra.mxu1 %v2048_v17  ;;  %v14348_v42 = vpop.f32.mrf.mxu0 }
 0x4de   :  { %11346 = vmatmul.mubr.f32.gmra.mxu1 %v1813_v40  ;;  %11386 = vmatprep.subr.mxu1 %v11364_v8  ;;  %v1374_v40 = vpop.f32.mrf.mxu1 }
 0x4df   :  { %11387 = vmatpush3.msra.mxu1 %v11364_v8  ;;  %v14350_v43 = vpop.f32.mrf.mxu0  ;;  %11406 = vmatprep.mubr.f32.mxu1 %v2078_v41 }
 0x4e0   :  { %11388 = vmatprep.subr.mxu1 %v2038_v12 }
 0x4e1   :  { %11389 = vmatpush3.msra.mxu1 %v2038_v12  ;;  %v14352_v44 = vpop.f32.mrf.mxu0  ;;  %v2351_v12 = vld [vmem:[#allocation69 + $0x148] sm:$0xff] }
 0x4e2   :  { %11390 = vmatprep.subr.mxu1 %v14320_v3 }
 0x4e3   :  { %11391 = vmatpush3.msra.mxu1 %v14320_v3  ;;  %v14356_v45 = vpop.f32.mrf.mxu0 }
 0x4e4   :  { %11392 = vmatprep.subr.mxu1 %v14324_v7 }
 0x4e5   :  { %11393 = vmatpush3.msra.mxu1 %v14324_v7  ;;  %v11434_v46 = vpop.f32.mrf.mxu0 }
 0x4e6   :  { %11394 = vmatprep.subr.mxu1 %v14316_v23 }
 0x4e7   :  { %11395 = vmatpush3.msra.mxu1 %v14316_v23  ;;  %v2310_v47 = vpop.f32.mrf.mxu0 }
 0x4e8   :  { %11396 = vmatprep.subr.mxu1 %v14318_v2 }
 0x4e9   :  { %11397 = vmatpush3.msra.mxu1 %v14318_v2  ;;  %v11437_v48 = vpop.f32.mrf.mxu0 }
 0x4ea   :  { %11398 = vmatprep.subr.mxu1 %v14312_v19 }
 0x4eb   :  { %11399 = vmatpush3.msra.mxu1 %v14312_v19  ;;  %v2320_v49 = vpop.f32.mrf.mxu0 }
 0x4ec   :  { %11400 = vmatprep.subr.mxu1 %v14314_v20 }
 0x4ed   :  { %11401 = vmatpush3.msra.mxu1 %v14314_v20  ;;  %v11440_v50 = vpop.f32.mrf.mxu0 }
 0x4ee   :  { %11402 = vmatprep.subr.mxu1 %v14308_v63 }
 0x4ef   :  { %11403 = vmatpush3.msra.mxu1 %v14308_v63  ;;  %v2330_v51 = vpop.f32.mrf.mxu0 }
 0x4f0   :  { %11404 = vmatprep.subr.mxu1 %v14310_v0 }
 0x4f1   :  { %11405 = vmatpush3.msra.mxu1 %v14310_v0  ;;  %v11443_v54 = vpop.f32.mrf.mxu0  ;;  %v2085_v0 = vld [vmem:[#allocation69 + $0x138] sm:$0xff] }
 0x4f2   :  { %11407 = vmatmul.mubr.f32.vlgmr.msra.gmra.mxu1 %v2079_v52  ;;  %11444 = vmatprep.subr.mxu1 %v11443_v54 }
 0x4f3   :  { %v2340_v55 = vpop.f32.mrf.mxu0  ;;  %11445 = vmatpush3.msra.mxu1 %v11443_v54  ;;  %11409 = vmatprep.mubr.f32.mxu1 %v2080_v53 }
 0x4f4   :  { %11446 = vmatprep.subr.mxu1 %v2340_v55 }
 0x4f5   :  { %11447 = vmatpush3.msra.mxu1 %v2340_v55  ;;  %v14372_v58 = vpop.f32.mrf.mxu0 }
 0x4f6   :  { %11410 = vmatmul.mubr.f32.gmra.mxu1 %v2081_v56  ;;  %11448 = vmatprep.subr.mxu1 %v11440_v50 }
 0x4f7   :  { %11449 = vmatpush3.msra.mxu1 %v11440_v50  ;;  %v14374_v59 = vpop.f32.mrf.mxu0  ;;  %11412 = vmatprep.mubr.f32.mxu1 %v2082_v57 }
 0x4f8   :  { %11450 = vmatprep.subr.mxu1 %v2330_v51 }
 0x4f9   :  { %11451 = vmatpush3.msra.mxu1 %v2330_v51  ;;  %v14376_v62 = vpop.f32.mrf.mxu0 }
 0x4fa   :  { %11413 = vmatmul.mubr.f32.gmra.mxu1 %v2083_v60  ;;  %11452 = vmatprep.subr.mxu1 %v11437_v48 }
 0x4fb   :  { %11453 = vmatpush3.msra.mxu1 %v11437_v48  ;;  %v14378_v63 = vpop.f32.mrf.mxu0  ;;  %11415 = vmatprep.mubr.f32.mxu1 %v2084_v61 }
 0x4fc   :  { %11454 = vmatprep.subr.mxu1 %v2320_v49 }
 0x4fd   :  { %11455 = vmatpush3.msra.mxu1 %v2320_v49  ;;  %v14380_v18 = vpop.f32.mrf.mxu0  ;;  %v13535_v49 = vmov 0.0  }
 0x4fe   :  { %11416 = vmatmul.mubr.f32.gmra.mxu1 %v2085_v0  ;;  %11456 = vmatprep.subr.mxu1 %v11434_v46 }
 0x4ff   :  { %11457 = vmatpush3.msra.mxu1 %v11434_v46  ;;  %v14382_v19 = vpop.f32.mrf.mxu0  ;;  %11476 = vmatprep.mubr.f32.mxu1 %v2350_v1 }
 0x500   :  { %11458 = vmatprep.subr.mxu1 %v2310_v47  ;;  %11558 = vmatprep.subr.mxu0 %v13535_v49 }
 0x501   :  { %11459 = vmatpush3.msra.mxu1 %v2310_v47  ;;  %v11501_v20 = vpop.f32.mrf.mxu0  ;;  %11574 = vmatprep.mubr.msk.f32.mxu0 %vm13536_vm2, %v13535_v49 }
 0x502   :  { %11460 = vmatprep.subr.mxu1 %v14352_v44 }
 0x503   :  { %11461 = vmatpush3.msra.mxu1 %v14352_v44  ;;  %v2572_v21 = vpop.f32.mrf.mxu0 }
 0x504   :  { %11462 = vmatprep.subr.mxu1 %v14356_v45 }
 0x505   :  { %11463 = vmatpush3.msra.mxu1 %v14356_v45  ;;  %v11504_v22 = vpop.f32.mrf.mxu0 }
 0x506   :  { %11464 = vmatprep.subr.mxu1 %v14348_v42 }
 0x507   :  { %11465 = vmatpush3.msra.mxu1 %v14348_v42  ;;  %v2582_v23 = vpop.f32.mrf.mxu0 }
 0x508   :  { %11466 = vmatprep.subr.mxu1 %v14350_v43 }
 0x509   :  { %11467 = vmatpush3.msra.mxu1 %v14350_v43  ;;  %v11507_v2 = vpop.f32.mrf.mxu0 }
 0x50a   :  { %11468 = vmatprep.subr.mxu1 %v14344_v38 }
 0x50b   :  { %11469 = vmatpush3.msra.mxu1 %v14344_v38  ;;  %v2592_v3 = vpop.f32.mrf.mxu0  ;;  %v2628_v38 = vld [vmem:[#allocation69 + $0x1b0] sm:$0xff] }
 0x50c   :  { %11470 = vmatprep.subr.mxu1 %v14346_v39 }
 0x50d   :  { %11471 = vmatpush3.msra.mxu1 %v14346_v39  ;;  %v11510_v7 = vpop.f32.mrf.mxu0  ;;  %v2629_v39 = vld [vmem:[#allocation69 + $0x1b8] sm:$0xff] }
 0x50e   :  { %11472 = vmatprep.subr.mxu1 %v14340_v34 }
 0x50f   :  { %11473 = vmatpush3.msra.mxu1 %v14340_v34  ;;  %v2602_v8 = vpop.f32.mrf.mxu0  ;;  %v2624_v34 = vld [vmem:[#allocation69 + $0x190] sm:$0xff] }
 0x510   :  { %11474 = vmatprep.subr.mxu1 %v14342_v35 }
 0x511   :  { %11475 = vmatpush3.msra.mxu1 %v14342_v35  ;;  %v11513_v17 = vpop.f32.mrf.mxu0  ;;  %v2625_v35 = vld [vmem:[#allocation69 + $0x198] sm:$0xff] }
 0x512   :  { %11477 = vmatmul.mubr.f32.vlgmr.msra.gmra.mxu1 %v2351_v12  ;;  %11514 = vmatprep.subr.mxu1 %v11513_v17 }
 0x513   :  { %v2612_v24 = vpop.f32.mrf.mxu0  ;;  %11515 = vmatpush3.msra.mxu1 %v11513_v17  ;;  %11479 = vmatprep.mubr.f32.mxu1 %v2352_v13  ;;  %v1375_v17 = vadd.f32 %v1374_v40, %v14290_v26 }
 0x514   :  { %11516 = vmatprep.subr.mxu1 %v2612_v24 }
 0x515   :  { %11517 = vmatpush3.msra.mxu1 %v2612_v24 }
 0x516   :  { %11480 = vmatmul.mubr.f32.gmra.mxu1 %v2353_v27  ;;  %11518 = vmatprep.subr.mxu1 %v11510_v7 }
 0x517   :  { %11519 = vmatpush3.msra.mxu1 %v11510_v7  ;;  %11482 = vmatprep.mubr.f32.mxu1 %v2354_v28 }
 0x518   :  { %11520 = vmatprep.subr.mxu1 %v2602_v8 }
 0x519   :  { %11521 = vmatpush3.msra.mxu1 %v2602_v8 }
 0x51a   :  { %11483 = vmatmul.mubr.f32.gmra.mxu1 %v2355_v29  ;;  %11522 = vmatprep.subr.mxu1 %v11507_v2 }
 0x51b   :  { %11523 = vmatpush3.msra.mxu1 %v11507_v2  ;;  %11485 = vmatprep.mubr.f32.mxu1 %v2356_v30 }
 0x51c   :  { %11524 = vmatprep.subr.mxu1 %v2592_v3 }
 0x51d   :  { %11525 = vmatpush3.msra.mxu1 %v2592_v3 }
 0x51e   :  { %11486 = vmatmul.mubr.f32.gmra.mxu1 %v2357_v31  ;;  %11526 = vmatprep.subr.mxu1 %v11504_v22  ;;  %v1365_v31 = vadd.f32 %v14286_v16, %v14284_v15 }
 0x51f   :  { %11527 = vmatpush3.msra.mxu1 %v11504_v22  ;;  %11546 = vmatprep.mubr.f32.mxu1 %v2622_v32 }
 0x520   :  { %11528 = vmatprep.subr.mxu1 %v2582_v23 }
 0x521   :  { %11529 = vmatpush3.msra.mxu1 %v2582_v23 }
 0x522   :  { %11530 = vmatprep.subr.mxu1 %v11501_v20 }
 0x523   :  { %11531 = vmatpush3.msra.mxu1 %v11501_v20 }
 0x524   :  { %11532 = vmatprep.subr.mxu1 %v2572_v21 }
 0x525   :  { %11533 = vmatpush3.msra.mxu1 %v2572_v21 }
 0x526   :  { %11534 = vmatprep.subr.mxu1 %v14380_v18 }
 0x527   :  { %11535 = vmatpush3.msra.mxu1 %v14380_v18 }
 0x528   :  { %11536 = vmatprep.subr.mxu1 %v14382_v19 }
 0x529   :  { %11537 = vmatpush3.msra.mxu1 %v14382_v19 }
 0x52a   :  { %11538 = vmatprep.subr.mxu1 %v14376_v62 }
 0x52b   :  { %11539 = vmatpush3.msra.mxu1 %v14376_v62 }
 0x52c   :  { %11540 = vmatprep.subr.mxu1 %v14378_v63 }
 0x52d   :  { %11541 = vmatpush3.msra.mxu1 %v14378_v63 }
 0x52e   :  { %11542 = vmatprep.subr.mxu1 %v14372_v58 }
 0x52f   :  { %11543 = vmatpush3.msra.mxu1 %v14372_v58 }
 0x530   :  { %11544 = vmatprep.subr.mxu1 %v14374_v59 }
 0x531   :  { %11545 = vmatpush3.msra.mxu1 %v14374_v59 }
 0x532   :  { %11547 = vmatmul.mubr.f32.vlgmr.msra.gmra.mxu1 %v2623_v33  ;;  %11577 = vmatprep.subr.mxu1 %v13535_v49 }
 0x533   :  { %11549 = vmatprep.mubr.f32.mxu1 %v2624_v34 }
 0x536   :  { %11550 = vmatmul.mubr.f32.gmra.mxu1 %v2625_v35 }
 0x537   :  { %11552 = vmatprep.mubr.f32.mxu1 %v2626_v36 }
 0x53a   :  { %11553 = vmatmul.mubr.f32.gmra.mxu1 %v2627_v37 }
 0x53b   :  { %11555 = vmatprep.mubr.f32.mxu1 %v2628_v38 }
 0x53e   :  { %11556 = vmatmul.mubr.f32.gmra.mxu1 %v2629_v39  ;;  %v1355_v39 = vadd.f32 %v14280_v11, %v14278_v10 }
 0x53f   :  { %11593 = vmatprep.mubr.msk.f32.mxu1 %vm13536_vm2, %v13535_v49 }
 0x572   :  { %v11268_v41 = vpop.f32.mrf.mxu1 }
 0x573   :  { %v1648_v42 = vadd.f32 %v11268_v41, %v14270_v4 }
 0x574   :  { %v14413_v43 = vpop.f32.mrf.mxu1 }
 0x576   :  { %v11271_v44 = vpop.f32.mrf.mxu1 }
 0x577   :  { %v14416_v45 = vadd.f32 %v11271_v44, %v14276_v9 }
 0x578   :  { %v1618_v46 = vpop.f32.mrf.mxu1 }
 0x579   :  { %v1649_v44 = vadd.f32 %v1618_v46, %v1355_v39  ;;  %v2964_v39 = vld [vmem:[%s15169_s13 + $0x10] sm:$0xff] }
 0x57a   :  { %v11274_v47 = vpop.f32.mrf.mxu1 }
 0x57b   :  { %v1652_v48 = vadd.f32 %v11274_v47, %v14282_v14 }
 0x57c   :  { %v1628_v50 = vpop.f32.mrf.mxu1 }
 0x57d   :  { %v1651_v35 = vadd.f32 %v1628_v50, %v1365_v31  ;;  %v10177_v31 = vld [vmem:[%s15168_s9 + $0x20] sm:$0xff] }
 0x57e   :  { %v11277_v51 = vpop.f32.mrf.mxu1 }
 0x57f   :  { %v1654_v24 = vadd.f32 %v11277_v51, %v14288_v25 }
 0x580   :  { %v1638_v4 = vpop.f32.mrf.mxu1 }
 0x581   :  { %v1653_v28 = vadd.f32 %v1638_v4, %v1375_v17 }
 0x592   :  { %v11338_v9 = vpop.f32.mrf.mxu1 }
 0x593   :  { %v14425_v52 = vadd.f32 %v11338_v9, %v1648_v42 }
 0x594   :  { %v14427_v53 = vpop.f32.mrf.mxu1 }
 0x596   :  { %v11341_v14 = vpop.f32.mrf.mxu1 }
 0x597   :  { %v1922_v51 = vadd.f32 %v11341_v14, %v14416_v45 }
 0x598   :  { %v1890_v54 = vpop.f32.mrf.mxu1 }
 0x599   :  { %v1921_v50 = vadd.f32 %v1890_v54, %v1649_v44 }
 0x59a   :  { %v11344_v55 = vpop.f32.mrf.mxu1 }
 0x59b   :  { %v1924_v36 = vadd.f32 %v11344_v55, %v1652_v48  ;;  %v1345_v48 = vadd.f32 %v14274_v6, %v14272_v5 }
 0x59c   :  { %v1900_v56 = vpop.f32.mrf.mxu1 }
 0x59d   :  { %v1923_v40 = vadd.f32 %v1900_v56, %v1651_v35  ;;  %v1647_v46 = vadd.f32 %v14413_v43, %v1345_v48  ;;  %v10181_v35 = vld [vmem:[%s15169_s13 + $0x20] sm:$0xff] }
 0x59e   :  { %v11347_v57 = vpop.f32.mrf.mxu1 }
 0x59f   :  { %v1926_v29 = vadd.f32 %v11347_v57, %v1654_v24  ;;  %v1919_v56 = vadd.f32 %v14427_v53, %v1647_v46 }
 0x5a0   :  { %v1910_v58 = vpop.f32.mrf.mxu1 }
 0x5a1   :  { %v1925_v32 = vadd.f32 %v1910_v58, %v1653_v28 }
 0x5b2   :  { %v11408_v59 = vpop.f32.mrf.mxu1 }
 0x5b3   :  { %v2192_v5 = vadd.f32 %v11408_v59, %v14425_v52  ;;  %v13537_v52 = vmov 0.015625   ;;  %v2817_v59 = vlaneseq }
 0x5b4   :  { %v14429_v60 = vpop.f32.mrf.mxu1 }
 0x5b5   :  { %v2191_v57 = vadd.f32 %v14429_v60, %v1919_v56  ;;  %v2818_v60 = vshrl.u32 %v2817_v59, 7 }
 0x5b6   :  { %v11411_v61 = vpop.f32.mrf.mxu1 }
 0x5b7   :  { %v2194_v10 = vadd.f32 %v11411_v61, %v1922_v51 }
 0x5b8   :  { %v2162_v62 = vpop.f32.mrf.mxu1 }
 0x5b9   :  { %v2193_v55 = vadd.f32 %v2162_v62, %v1921_v50 }
 0x5ba   :  { %v11414_v63 = vpop.f32.mrf.mxu1 }
 0x5bb   :  { %v2196_v25 = vadd.f32 %v11414_v63, %v1924_v36  ;;  %v14452_v63 = vsub.s32 0, %v2818_v60  ;;  %v10182_v36 = vld [vmem:[%s15169_s13 + $0x28] sm:$0xff] }
 0x5bc   :  { %v2172_v0 = vpop.f32.mrf.mxu1 }
 0x5bd   :  { %v2195_v15 = vadd.f32 %v2172_v0, %v1923_v40  ;;  %v2965_v40 = vld [vmem:[%s15169_s13 + $0x18] sm:$0xff] }
 0x5be   :  { %v11417_v1 = vpop.f32.mrf.mxu1 }
 0x5bf   :  { %v2198_v33 = vadd.f32 %v11417_v1, %v1926_v29 }
 0x5c0   :  { %v2182_v18 = vpop.f32.mrf.mxu1 }
 0x5c1   :  { %v2197_v37 = vadd.f32 %v2182_v18, %v1925_v32  ;;  %v2962_v32 = vld [vmem:[%s15169_s13] sm:$0xff] }
 0x5d2   :  { %v11478_v19 = vpop.f32.mrf.mxu1 }
 0x5d3   :  { %v2464_v58 = vadd.f32 %v11478_v19, %v2192_v5 }
 0x5d4   :  { %v2424_v20 = vpop.f32.mrf.mxu1 }
 0x5d5   :  { %v2463_v43 = vadd.f32 %v2424_v20, %v2191_v57 }
 0x5d6   :  { %v11481_v21 = vpop.f32.mrf.mxu1 }
 0x5d7   :  { %v2466_v45 = vadd.f32 %v11481_v21, %v2194_v10 }
 0x5d8   :  { %v2434_v22 = vpop.f32.mrf.mxu1 }
 0x5d9   :  { %v2465_v6 = vadd.f32 %v2434_v22, %v2193_v55 }
 0x5da   :  { %v11484_v23 = vpop.f32.mrf.mxu1 }
 0x5db   :  { %v2468_v16 = vadd.f32 %v11484_v23, %v2196_v25  ;;  %v10184_v25 = vld [vmem:[%s15169_s13 + $0x38] sm:$0xff] }
 0x5dc   :  { %v2444_v2 = vpop.f32.mrf.mxu1 }
 0x5dd   :  { %v2467_v11 = vadd.f32 %v2444_v2, %v2195_v15 }
 0x5de   :  { %v11487_v3 = vpop.f32.mrf.mxu1 }
 0x5df   :  { %v2470_v38 = vadd.f32 %v11487_v3, %v2198_v33  ;;  %v2963_v33 = vld [vmem:[%s15169_s13 + $0x8] sm:$0xff] }
 0x5e0   :  { %v2454_v7 = vpop.f32.mrf.mxu1 }
 0x5e1   :  { %v2469_v41 = vadd.f32 %v2454_v7, %v2197_v37  ;;  %v10193_v37 = vld [vmem:[%s15169_s13 + $0x40] sm:$0xff] }
 0x5f2   :  { %v11548_v8 = vpop.f32.mrf.mxu1 }
 0x5f3   :  { %v2736_v62 = vadd.f32 %v11548_v8, %v2464_v58 }
 0x5f4   :  { %v2696_v12 = vpop.f32.mrf.mxu1 }
 0x5f5   :  { %v2735_v53 = vadd.f32 %v2696_v12, %v2463_v43 }
 0x5f6   :  { %v11551_v13 = vpop.f32.mrf.mxu1 }
 0x5f7   :  { %v2738_v54 = vadd.f32 %v11551_v13, %v2466_v45 }
 0x5f8   :  { %v2706_v27 = vpop.f32.mrf.mxu1 }
 0x5f9   :  { %v2737_v61 = vadd.f32 %v2706_v27, %v2465_v6 }
 0x5fa   :  { %v11554_v30 = vpop.f32.mrf.mxu1 }
 0x5fb   :  { %v2740_v9 = vadd.f32 %v11554_v30, %v2468_v16  ;;  %v2958_v30 = vld [vmem:[%s15168_s9] sm:$0xff] }
 0x5fc   :  { %v2716_v34 = vpop.f32.mrf.mxu1 }
 0x5fd   :  { %v2739_v14 = vadd.f32 %v2716_v34, %v2467_v11  ;;  %v13538_v34 = vmov 0  }
 0x5fe   :  { %v11557_v26 = vpop.f32.mrf.mxu1  ;;  %12436 = vset.pattern.permute.xlu0 %v13538_v34  ;;  %12437 = vset.pattern.permute.xlu1 %v13538_v34 }
 0x5ff   :  { %v2742_v42 = vadd.f32 %v11557_v26, %v2470_v38  ;;  %2968 = vperm.xlu0 %12436, %v2962_v32   ;;  %2973 = vperm.xlu1 %12437, %v2963_v33   ;;  %v10194_v38 = vld [vmem:[%s15169_s13 + $0x48] sm:$0xff]  ;;  %v10183_v26 = vld [vmem:[%s15169_s13 + $0x30] sm:$0xff] }
 0x600   :  { %v2726_v47 = vpop.f32.mrf.mxu1  ;;  %v3345_v32 = vld [vmem:[#allocation10] sm:$0xff]  ;;  %v3449_v33 = vld [vmem:[#allocation10 + $0x8] sm:$0xff] }
 0x601   :  { %v2741_v4 = vadd.f32 %v2726_v47, %v2469_v41  ;;  %11559 = vmatpush3.msra.mxu0 %v2742_v42  ;;  %v10195_v41 = vld [vmem:[%s15169_s13 + $0x50] sm:$0xff] }
 0x602   :  { %11560 = vmatprep.subr.mxu0 %v13535_v49 }
 0x603   :  { %11561 = vmatpush3.msra.mxu0 %v2741_v4  ;;  %3095 = vperm.xlu0 %12436, %v10181_v35  }
 0x604   :  { %11562 = vmatprep.subr.mxu0 %v13535_v49  ;;  %3100 = vperm.xlu1 %12437, %v10182_v36  }
 0x605   :  { %11563 = vmatpush3.msra.mxu0 %v2740_v9 }
 0x606   :  { %11564 = vmatprep.subr.mxu0 %v13535_v49 }
 0x607   :  { %11565 = vmatpush3.msra.mxu0 %v2739_v14  ;;  %3226 = vperm.xlu0 %12436, %v10193_v37  }
 0x608   :  { %11566 = vmatprep.subr.mxu0 %v13535_v49  ;;  %3231 = vperm.xlu1 %12437, %v10194_v38  }
 0x609   :  { %11567 = vmatpush3.msra.mxu0 %v2738_v54 }
 0x60a   :  { %11568 = vmatprep.subr.mxu0 %v13535_v49 }
 0x60b   :  { %11569 = vmatpush3.msra.mxu0 %v2737_v61  ;;  %2978 = vperm.xlu0 %12436, %v2964_v39  }
 0x60c   :  { %11570 = vmatprep.subr.mxu0 %v13535_v49  ;;  %3105 = vperm.xlu1 %12437, %v10183_v26  }
 0x60d   :  { %11571 = vmatpush3.msra.mxu0 %v2736_v62 }
 0x60e   :  { %11572 = vmatprep.subr.mxu0 %v13535_v49 }
 0x60f   :  { %11573 = vmatpush3.msra.mxu0 %v2735_v53  ;;  %2983 = vperm.xlu0 %12436, %v2965_v40  }
 0x610   :  { %11575 = vmatmul.mubr.msk.f32.vlgmr.msra.gmra.mxu0 %vm2743_vm3, %v13537_v52  ;;  %3110 = vperm.xlu1 %12437, %v10184_v25  }
 0x611   :  { %11612 = vmatprep.mubr.msk.f32.mxu0 %vm2743_vm3, %v2958_v30  ;;  %v10191_v30 = vld [vmem:[%s15168_s9 + $0x50] sm:$0xff] }
 0x613   :  { %3236 = vperm.xlu0 %12436, %v10195_v41  }
 0x67a   :  { %v2969_v34 = vpop.permute.xlu0 %2968  ;;  %v2974_v35 = vpop.permute.xlu1 %2973 }
 0x67e   :  { %v3096_v36 = vpop.permute.xlu0 %3095 }
 0x67f   :  { %v3101_v37 = vpop.permute.xlu1 %3100 }
 0x682   :  { %v3227_v39 = vpop.permute.xlu0 %3226 }
 0x683   :  { %v3232_v26 = vpop.permute.xlu1 %3231 }
 0x6d0   :  { %v2813_v0 = vpop.f32.mrf.mxu0 }
 0x6d1   :  { %v2820_v1 = vrot.slane %v2813_v0, %v14452_v63 }
 0x6d2   :  { %v11576_v18 = vpop.f32.mrf.mxu0 }
 0x6d3   :  { %v14455_v19 = vsub.f32 %v2742_v42, %v2820_v1  ;;  %v14457_v20 = vsub.f32 %v2741_v4, %v2820_v1  ;;  %v14461_v22 = vsub.f32 %v2740_v9, %v2820_v1  ;;  %v14465_v2 = vsub.f32 %v2739_v14, %v2820_v1  ;;  %v10196_v42 = vld [vmem:[%s15169_s13 + $0x58] sm:$0xff]  ;;  %v10171_v4 = vld [vmem:[#allocation70] ss:$0 sm:$0xff]  ;;  %v10172_v9 = vld [vmem:[#allocation67] ss:$0 sm:$0xff] }
 0x6d4   :  { %v14470_v7 = vsub.f32 %v2738_v54, %v2820_v1  ;;  %v14475_v12 = vsub.f32 %v2737_v61, %v2820_v1  ;;  %v14480_v17 = vsub.f32 %v2736_v62, %v2820_v1  ;;  %v14485_v27 = vsub.f32 %v2735_v53, %v2820_v1  ;;  %3241 = vperm.xlu1 %12437, %v10196_v42   ;;  %v2979_v42 = vpop.permute.xlu0 %2978 }
 0x6d5   :  { %v2836_v21 = vmul.f32 %v14455_v19, %v14455_v19  ;;  %v2835_v23 = vmul.f32 %v14457_v20, %v14457_v20  ;;  %v2834_v3 = vmul.f32 %v14461_v22, %v14461_v22  ;;  %v2833_v8 = vmul.f32 %v14465_v2, %v14465_v2 }
 0x6d6   :  { %v2832_v13 = vmul.f32 %v14470_v7, %v14470_v7  ;;  %v2831_v24 = vmul.f32 %v14475_v12, %v14475_v12  ;;  %v2830_v28 = vmul.f32 %v14480_v17, %v14480_v17  ;;  %v2829_v29 = vmul.f32 %v14485_v27, %v14485_v27 }
 0x6d7   :  { %11578 = vmatpush3.msra.mxu1 %v2836_v21 }
 0x6d8   :  { %11579 = vmatprep.subr.mxu1 %v13535_v49 }
 0x6d9   :  { %11580 = vmatpush3.msra.mxu1 %v2835_v23 }
 0x6da   :  { %11581 = vmatprep.subr.mxu1 %v13535_v49 }
 0x6db   :  { %11582 = vmatpush3.msra.mxu1 %v2834_v3 }
 0x6dc   :  { %11583 = vmatprep.subr.mxu1 %v13535_v49 }
 0x6dd   :  { %11584 = vmatpush3.msra.mxu1 %v2833_v8  ;;  %v2959_v8 = vld [vmem:[%s15168_s9 + $0x8] sm:$0xff] }
 0x6de   :  { %11585 = vmatprep.subr.mxu1 %v13535_v49 }
 0x6df   :  { %11586 = vmatpush3.msra.mxu1 %v2832_v13  ;;  %v2960_v13 = vld [vmem:[%s15168_s9 + $0x10] sm:$0xff] }
 0x6e0   :  { %11587 = vmatprep.subr.mxu1 %v13535_v49 }
 0x6e1   :  { %11588 = vmatpush3.msra.mxu1 %v2831_v24  ;;  %v2961_v24 = vld [vmem:[%s15168_s9 + $0x18] sm:$0xff] }
 0x6e2   :  { %11589 = vmatprep.subr.mxu1 %v13535_v49 }
 0x6e3   :  { %11590 = vmatpush3.msra.mxu1 %v2830_v28  ;;  %v10189_v28 = vld [vmem:[%s15168_s9 + $0x40] sm:$0xff] }
 0x6e4   :  { %11591 = vmatprep.subr.mxu1 %v13535_v49 }
 0x6e5   :  { %11592 = vmatpush3.msra.mxu1 %v2829_v29  ;;  %v10190_v29 = vld [vmem:[%s15168_s9 + $0x48] sm:$0xff] }
 0x6e6   :  { %11594 = vmatmul.mubr.msk.f32.vlgmr.msra.gmra.mxu1 %vm2743_vm3, %v13537_v52 }
 0x6e7   :  { %11634 = vmatprep.mubr.msk.f32.mxu1 %vm2743_vm3, %v10177_v31  ;;  %v10192_v31 = vld [vmem:[%s15168_s9 + $0x58] sm:$0xff] }
 0x7a6   :  { %v2903_v44 = vpop.f32.mrf.mxu1 }
 0x7a7   :  { %v2904_v47 = vadd.f32 1e-05, %v2903_v44  ;;  %v3106_v44 = vpop.permute.xlu1 %3105 }
 0x7a8   :  { %v11595_v51 = vpop.f32.mrf.mxu1 }
 0x7a9   :  { %12438 = vrsqrt.f32 %v2904_v47 }
 0x7b6   :  { %v12439_v15 = vpop.eup %12438 }
 0x7b7   :  { %v2911_v16 = vrot.slane %v12439_v15, %v14452_v63 }
 0x7b9   :  { %v2919_v48 = vmul.f32 %v2911_v16, %v14455_v19  ;;  %v2918_v50 = vmul.f32 %v2911_v16, %v14457_v20  ;;  %v2917_v10 = vmul.f32 %v2911_v16, %v14461_v22  ;;  %v2916_v11 = vmul.f32 %v2911_v16, %v14465_v2 }
 0x7ba   :  { %v2915_v14 = vmul.f32 %v2911_v16, %v14470_v7  ;;  %v2914_v54 = vmul.f32 %v2911_v16, %v14475_v12  ;;  %v2913_v43 = vmul.f32 %v2911_v16, %v14480_v17  ;;  %v2912_v59 = vmul.f32 %v2911_v16, %v14485_v27  ;;  %v10178_v12 = vld [vmem:[%s15168_s9 + $0x28] sm:$0xff]  ;;  %v10179_v17 = vld [vmem:[%s15168_s9 + $0x30] sm:$0xff]  ;;  %v10180_v27 = vld [vmem:[%s15168_s9 + $0x38] sm:$0xff]  ;;  %v2984_v16 = vpop.permute.xlu0 %2983 }
 0x7bb   :  { %v2934_v46 = vmul.f32 %v10171_v4, %v2919_v48  ;;  %v2933_v55 = vmul.f32 %v10171_v4, %v2918_v50  ;;  %v2932_v45 = vmul.f32 %v10171_v4, %v2917_v10  ;;  %v2931_v6 = vmul.f32 %v10171_v4, %v2916_v11  ;;  %v3111_v50 = vpop.permute.xlu1 %3110 }
 0x7bc   :  { %v2930_v61 = vmul.f32 %v10171_v4, %v2915_v14  ;;  %v2929_v52 = vmul.f32 %v10171_v4, %v2914_v54  ;;  %v2928_v1 = vmul.f32 %v10171_v4, %v2913_v43  ;;  %v2927_v20 = vmul.f32 %v10171_v4, %v2912_v59 }
 0x7bd   :  { %v2949_v56 = vadd.f32 %v10172_v9, %v2934_v46  ;;  %v2948_v5 = vadd.f32 %v10172_v9, %v2933_v55  ;;  %v2947_v58 = vadd.f32 %v10172_v9, %v2932_v45  ;;  %v2946_v53 = vadd.f32 %v10172_v9, %v2931_v6 }
 0x7be   :  { %v2945_v0 = vadd.f32 %v10172_v9, %v2930_v61  ;;  %v2944_v19 = vadd.f32 %v10172_v9, %v2929_v52  ;;  %v2943_v22 = vadd.f32 %v10172_v9, %v2928_v1  ;;  %v2942_v2 = vadd.f32 %v10172_v9, %v2927_v20 }
 0x7bf   :  { %v2957_v57 = vmax.f32 %v2949_v56, 0.0  ;;  %v2956_v62 = vmax.f32 %v2948_v5, 0.0  ;;  %v2955_v60 = vmax.f32 %v2947_v58, 0.0  ;;  %v2954_v18 = vmax.f32 %v2946_v53, 0.0  ;;  %v3242_v43 = vpop.permute.xlu1 %3241  ;;  %v3237_v53 = vpop.permute.xlu0 %3236 }
 0x7c0   :  { %v2953_v21 = vmax.f32 %v2945_v0, 0.0  ;;  %v2952_v23 = vmax.f32 %v2944_v19, 0.0  ;;  %v2951_v3 = vmax.f32 %v2943_v22, 0.0  ;;  %v2950_v7 = vmax.f32 %v2942_v2, 0.0  ;;  %v3444_v22 = vld [vmem:[%s15170_s0] sm:$0xff] }
 0x7c1   :  { %11596 = vmatprep.subr.mxu0 %v2957_v57  ;;  %11618 = vmatprep.subr.mxu1 %v2957_v57 }
 0x7c2   :  { %11597 = vmatpush3.msra.mxu0 %v2957_v57  ;;  %11619 = vmatpush3.msra.mxu1 %v2957_v57 }
 0x7c3   :  { %11598 = vmatprep.subr.mxu0 %v2956_v62  ;;  %11620 = vmatprep.subr.mxu1 %v2956_v62 }
 0x7c4   :  { %11599 = vmatpush3.msra.mxu0 %v2956_v62  ;;  %11621 = vmatpush3.msra.mxu1 %v2956_v62 }
 0x7c5   :  { %11600 = vmatprep.subr.mxu0 %v2955_v60  ;;  %11622 = vmatprep.subr.mxu1 %v2955_v60 }
 0x7c6   :  { %11601 = vmatpush3.msra.mxu0 %v2955_v60  ;;  %11623 = vmatpush3.msra.mxu1 %v2955_v60 }
 0x7c7   :  { %11602 = vmatprep.subr.mxu0 %v2954_v18  ;;  %11624 = vmatprep.subr.mxu1 %v2954_v18 }
 0x7c8   :  { %11603 = vmatpush3.msra.mxu0 %v2954_v18  ;;  %11625 = vmatpush3.msra.mxu1 %v2954_v18 }
 0x7c9   :  { %11604 = vmatprep.subr.mxu0 %v2953_v21  ;;  %11626 = vmatprep.subr.mxu1 %v2953_v21 }
 0x7ca   :  { %11605 = vmatpush3.msra.mxu0 %v2953_v21  ;;  %11627 = vmatpush3.msra.mxu1 %v2953_v21 }
 0x7cb   :  { %11606 = vmatprep.subr.mxu0 %v2952_v23  ;;  %11628 = vmatprep.subr.mxu1 %v2952_v23 }
 0x7cc   :  { %11607 = vmatpush3.msra.mxu0 %v2952_v23  ;;  %11629 = vmatpush3.msra.mxu1 %v2952_v23 }
 0x7cd   :  { %11608 = vmatprep.subr.mxu0 %v2951_v3  ;;  %11630 = vmatprep.subr.mxu1 %v2951_v3 }
 0x7ce   :  { %11609 = vmatpush3.msra.mxu0 %v2951_v3  ;;  %11631 = vmatpush3.msra.mxu1 %v2951_v3 }
 0x7cf   :  { %11610 = vmatprep.subr.mxu0 %v2950_v7  ;;  %11632 = vmatprep.subr.mxu1 %v2950_v7 }
 0x7d0   :  { %11611 = vmatpush3.msra.mxu0 %v2950_v7  ;;  %11633 = vmatpush3.msra.mxu1 %v2950_v7 }
 0x7d1   :  { %11640 = vmatprep.subr.mxu0 %v2957_v57  ;;  %11613 = vmatmul.mubr.msk.f32.vlgmr.msra.gmra.mxu0 %vm2743_vm3, %v2959_v8 }
 0x7d2   :  { %11641 = vmatpush3.msra.mxu0 %v2957_v57  ;;  %11635 = vmatmul.mubr.msk.f32.vlgmr.msra.gmra.mxu1 %vm2743_vm3, %v10178_v12 }
 0x7d3   :  { %11642 = vmatprep.subr.mxu0 %v2956_v62  ;;  %11615 = vmatprep.mubr.msk.f32.mxu0 %vm2743_vm3, %v2960_v13  ;;  %v3445_v13 = vld [vmem:[%s15170_s0 + $0x8] sm:$0xff] }
 0x7d4   :  { %11643 = vmatpush3.msra.mxu0 %v2956_v62  ;;  %11637 = vmatprep.mubr.msk.f32.mxu1 %vm2743_vm3, %v10179_v17  ;;  %v3446_v17 = vld [vmem:[%s15170_s0 + $0x10] sm:$0xff] }
 0x7d5   :  { %11644 = vmatprep.subr.mxu0 %v2955_v60  ;;  %11616 = vmatmul.mubr.msk.f32.gmra.mxu0 %vm2743_vm3, %v2961_v24 }
 0x7d6   :  { %11645 = vmatpush3.msra.mxu0 %v2955_v60  ;;  %11638 = vmatmul.mubr.msk.f32.gmra.mxu1 %vm2743_vm3, %v10180_v27 }
 0x7d7   :  { %11646 = vmatprep.subr.mxu0 %v2954_v18  ;;  %11656 = vmatprep.mubr.msk.f32.mxu0 %vm2743_vm3, %v10189_v28  ;;  %v3447_v28 = vld [vmem:[%s15170_s0 + $0x18] sm:$0xff] }
 0x7d8   :  { %11647 = vmatpush3.msra.mxu0 %v2954_v18  ;;  %11662 = vmatprep.subr.mxu1 %v3345_v32 }
 0x7d9   :  { %11648 = vmatprep.subr.mxu0 %v2953_v21  ;;  %11663 = vmatpush3.msra.mxu1 %v3345_v32  ;;  %v10212_v32 = vld [vmem:[%s15170_s0 + $0x38] sm:$0xff] }
 0x7da   :  { %11649 = vmatpush3.msra.mxu0 %v2953_v21  ;;  %11670 = vmatprep.subr.mxu1 %v3449_v33  ;;  %v10209_v21 = vld [vmem:[%s15170_s0 + $0x20] sm:$0xff] }
 0x7db   :  { %11650 = vmatprep.subr.mxu0 %v2952_v23 }
 0x7dc   :  { %11651 = vmatpush3.msra.mxu0 %v2952_v23 }
 0x7dd   :  { %11652 = vmatprep.subr.mxu0 %v2951_v3 }
 0x7de   :  { %11653 = vmatpush3.msra.mxu0 %v2951_v3 }
 0x7df   :  { %11654 = vmatprep.subr.mxu0 %v2950_v7 }
 0x7e0   :  { %11655 = vmatpush3.msra.mxu0 %v2950_v7 }
 0x7e1   :  { %11657 = vmatmul.mubr.msk.f32.vlgmr.msra.gmra.mxu0 %vm2743_vm3, %v10190_v29  ;;  %v10210_v29 = vld [vmem:[%s15170_s0 + $0x28] sm:$0xff] }
 0x7e2   :  { %11659 = vmatprep.mubr.msk.f32.mxu0 %vm2743_vm3, %v10191_v30  ;;  %v3736_v30 = vld [vmem:[#allocation10 + $0x10] sm:$0xff] }
 0x7e5   :  { %11660 = vmatmul.mubr.msk.f32.gmra.mxu0 %vm2743_vm3, %v10192_v31  ;;  %v10211_v31 = vld [vmem:[%s15170_s0 + $0x30] sm:$0xff] }
 0x7e6   :  { %11686 = vmatprep.mubr.msk.f32.mxu0 %vm3540_vm5, %v10209_v21  ;;  %v4221_v21 = vld [vmem:[#allocation12 + $0x8] sm:$0xff] }
 0x891   :  { %v11614_v38 = vpop.f32.mrf.mxu0 }
 0x892   :  { %v11636_v40 = vpop.f32.mrf.mxu1  ;;  %v3070_v10 = vadd.f32 %v11614_v38, %v2974_v35 }
 0x893   :  { %v3064_v25 = vpop.f32.mrf.mxu0  ;;  %v3197_v11 = vadd.f32 %v11636_v40, %v3101_v37 }
 0x894   :  { %v3191_v41 = vpop.f32.mrf.mxu1  ;;  %v3065_v4 = vadd.f32 %v3064_v25, %v2969_v34  ;;  %v10226_v25 = vld [vmem:[%s15170_s0 + $0x48] sm:$0xff] }
 0x895   :  { %v11617_v47 = vpop.f32.mrf.mxu0  ;;  %v3192_v48 = vadd.f32 %v3191_v41, %v3096_v36  ;;  %v3211_v54 = vmax.f32 %v3070_v10, %v3197_v11  ;;  %v10227_v41 = vld [vmem:[%s15170_s0 + $0x50] sm:$0xff] }
 0x896   :  { %v11639_v51 = vpop.f32.mrf.mxu1  ;;  %v3080_v57 = vadd.f32 %v11617_v47, %v2984_v16 }
 0x897   :  { %v3074_v15 = vpop.f32.mrf.mxu0  ;;  %v3210_v14 = vmax.f32 %v3065_v4, %v3192_v48  ;;  %v3207_v58 = vadd.f32 %v11639_v51, %v3111_v50 }
 0x898   :  { %v3201_v9 = vpop.f32.mrf.mxu1  ;;  %v3075_v56 = vadd.f32 %v3074_v15, %v2979_v42  ;;  %v10228_v42 = vld [vmem:[%s15170_s0 + $0x58] sm:$0xff] }
 0x899   :  { %v3202_v5 = vadd.f32 %v3201_v9, %v3106_v44  ;;  %v3213_v18 = vmax.f32 %v3080_v57, %v3207_v58 }
 0x89b   :  { %v3212_v0 = vmax.f32 %v3075_v56, %v3202_v5  ;;  %v13539_v5 = vmov 0.03125  }
 0x8a1   :  { %v11658_v46 = vpop.f32.mrf.mxu0 }
 0x8a2   :  { %v3328_v55 = vadd.f32 %v11658_v46, %v3232_v26 }
 0x8a3   :  { %v3322_v45 = vpop.f32.mrf.mxu0 }
 0x8a4   :  { %v3323_v6 = vadd.f32 %v3322_v45, %v3227_v39  ;;  %v14542_v52 = vmax.f32 %v3211_v54, %v3328_v55 }
 0x8a5   :  { %v11661_v61 = vpop.f32.mrf.mxu0 }
 0x8a6   :  { %v14540_v62 = vmax.f32 %v3210_v14, %v3323_v6  ;;  %v3338_v59 = vadd.f32 %v11661_v61, %v3242_v43 }
 0x8a7   :  { %v3332_v60 = vpop.f32.mrf.mxu0 }
 0x8a8   :  { %v3333_v1 = vadd.f32 %v3332_v60, %v3237_v53  ;;  %11664 = vmatprep.mubr.msk.f32.mxu1 %vm3346_vm4, %v14540_v62  ;;  %v14550_v20 = vmax.f32 %v3213_v18, %v3338_v59  ;;  %v4118_v18 = vld [vmem:[#allocation12] sm:$0xff] }
 0x8a9   :  { %11665 = vmatmul.mubr.msk.f32.vlgmr.msra.gmra.mxu1 %vm3346_vm4, %v14542_v52 }
 0x8aa   :  { %v14548_v19 = vmax.f32 %v3212_v0, %v3333_v1  ;;  %11671 = vmatpush3.msra.mxu1 %v3449_v33  ;;  %v10225_v33 = vld [vmem:[%s15170_s0 + $0x40] sm:$0xff] }
 0x8ac   :  { %11667 = vmatprep.mubr.msk.f32.mxu1 %vm3346_vm4, %v14548_v19 }
 0x8ad   :  { %11668 = vmatmul.mubr.msk.f32.gmra.mxu1 %vm3346_vm4, %v14550_v20 }
 0x8ae   :  { %11672 = vmatprep.mubr.msk.f32.mxu1 %vm3346_vm4, %v14540_v62 }
 0x8b1   :  { %11673 = vmatmul.mubr.msk.f32.vlgmr.msra.gmra.mxu1 %vm3346_vm4, %v14542_v52 }
 0x8b2   :  { %11675 = vmatprep.mubr.msk.f32.mxu1 %vm3346_vm4, %v14548_v19 }
 0x8b5   :  { %11676 = vmatmul.mubr.msk.f32.gmra.mxu1 %vm3346_vm4, %v14550_v20 }
 0x8b6   :  { %11700 = vmatprep.mubr.msk.f32.mxu1 %vm3540_vm5, %v3444_v22 }
 0x969   :  { %v11666_v23 = vpop.f32.mrf.mxu1 }
 0x96b   :  { %v3425_v2 = vpop.f32.mrf.mxu1 }
 0x96d   :  { %v11669_v3 = vpop.f32.mrf.mxu1 }
 0x96e   :  { %11692 = vmatprep.subr.mxu1 %v11669_v3 }
 0x96f   :  { %v3435_v7 = vpop.f32.mrf.mxu1  ;;  %11693 = vmatpush3.msra.mxu1 %v11669_v3 }
 0x970   :  { %11694 = vmatprep.subr.mxu1 %v3435_v7 }
 0x971   :  { %v11674_v8 = vpop.f32.mrf.mxu1  ;;  %11695 = vmatpush3.msra.mxu1 %v3435_v7 }
 0x972   :  { %11696 = vmatprep.subr.mxu1 %v11666_v23 }
 0x973   :  { %v3516_v12 = vpop.f32.mrf.mxu1  ;;  %11697 = vmatpush3.msra.mxu1 %v11666_v23 }
 0x974   :  { %11698 = vmatprep.subr.mxu1 %v3425_v2 }
 0x975   :  { %v11677_v24 = vpop.f32.mrf.mxu1  ;;  %11699 = vmatpush3.msra.mxu1 %v3425_v2 }
 0x976   :  { %11678 = vmatprep.subr.mxu0 %v11677_v24  ;;  %11701 = vmatmul.mubr.msk.f32.vlgmr.msra.gmra.mxu1 %vm3540_vm5, %v3445_v13 }
 0x977   :  { %v3526_v27 = vpop.f32.mrf.mxu1  ;;  %11679 = vmatpush3.msra.mxu0 %v11677_v24  ;;  %11703 = vmatprep.mubr.msk.f32.mxu1 %vm3540_vm5, %v3446_v17 }
 0x978   :  { %11680 = vmatprep.subr.mxu0 %v3526_v27 }
 0x979   :  { %11681 = vmatpush3.msra.mxu0 %v3526_v27  ;;  %v10236_v27 = vld [vmem:[#allocation2] ss:$0 sm:$0xff] }
 0x97a   :  { %11682 = vmatprep.subr.mxu0 %v11674_v8  ;;  %11704 = vmatmul.mubr.msk.f32.gmra.mxu1 %vm3540_vm5, %v3447_v28 }
 0x97b   :  { %11683 = vmatpush3.msra.mxu0 %v11674_v8  ;;  %11722 = vmatprep.mubr.msk.f32.mxu1 %vm3540_vm5, %v10225_v33  ;;  %v10235_v8 = vld [vmem:[#allocation7] ss:$0 sm:$0xff] }
 0x97c   :  { %11684 = vmatprep.subr.mxu0 %v3516_v12 }
 0x97d   :  { %11685 = vmatpush3.msra.mxu0 %v3516_v12 }
 0x97e   :  { %11687 = vmatmul.mubr.msk.f32.vlgmr.msra.gmra.mxu0 %vm3540_vm5, %v10210_v29  ;;  %11706 = vmatprep.subr.mxu0 %v3736_v30 }
 0x97f   :  { %11689 = vmatprep.mubr.msk.f32.mxu0 %vm3540_vm5, %v10211_v31  ;;  %11707 = vmatpush3.msra.mxu0 %v3736_v30 }
 0x980   :  { %11728 = vmatprep.subr.mxu0 %v13535_v49 }
 0x982   :  { %11690 = vmatmul.mubr.msk.f32.gmra.mxu0 %vm3540_vm5, %v10212_v32 }
 0x983   :  { %11708 = vmatprep.mubr.msk.f32.mxu0 %vm3346_vm4, %v14540_v62 }
 0x986   :  { %11709 = vmatmul.mubr.msk.f32.vlgmr.msra.gmra.mxu0 %vm3346_vm4, %v14542_v52 }
 0x987   :  { %11711 = vmatprep.mubr.msk.f32.mxu0 %vm3346_vm4, %v14548_v19 }
 0x98a   :  { %11712 = vmatmul.mubr.msk.f32.gmra.mxu0 %vm3346_vm4, %v14550_v20 }
 0x98b   :  { %11736 = vmatprep.mubr.msk.f32.mxu0 %vm13536_vm2, %v13535_v49 }
 0xa36   :  { %v11702_v44 = vpop.f32.mrf.mxu1 }
 0xa38   :  { %v3716_v47 = vpop.f32.mrf.mxu1 }
 0xa3a   :  { %v11705_v51 = vpop.f32.mrf.mxu1 }
 0xa3c   :  { %v3726_v15 = vpop.f32.mrf.mxu1 }
 0xa3e   :  { %v11688_v34 = vpop.f32.mrf.mxu0 }
 0xa3f   :  { %v3722_v46 = vadd.f32 %v11702_v44, %v11688_v34 }
 0xa40   :  { %v3619_v35 = vpop.f32.mrf.mxu0 }
 0xa41   :  { %v3717_v45 = vadd.f32 %v3716_v47, %v3619_v35 }
 0xa42   :  { %v11691_v36 = vpop.f32.mrf.mxu0 }
 0xa43   :  { %v3732_v48 = vadd.f32 %v11705_v51, %v11691_v36 }
 0xa44   :  { %v3629_v37 = vpop.f32.mrf.mxu0 }
 0xa45   :  { %v3727_v10 = vadd.f32 %v3726_v15, %v3629_v37 }
 0xa46   :  { %v11710_v38 = vpop.f32.mrf.mxu0 }
 0xa48   :  { %v3803_v39 = vpop.f32.mrf.mxu0 }
 0xa4a   :  { %v11713_v26 = vpop.f32.mrf.mxu0 }
 0xa4b   :  { %11714 = vmatprep.subr.mxu1 %v11713_v26 }
 0xa4c   :  { %v3813_v40 = vpop.f32.mrf.mxu0  ;;  %11715 = vmatpush3.msra.mxu1 %v11713_v26  ;;  %v4308_v26 = vld [vmem:[#allocation6 + $0x20] sm:$0xff] }
 0xa4d   :  { %11716 = vmatprep.subr.mxu1 %v3813_v40 }
 0xa4e   :  { %11717 = vmatpush3.msra.mxu1 %v3813_v40  ;;  %v4216_v40 = vld [vmem:[#allocation6] sm:$0xff] }
 0xa4f   :  { %11718 = vmatprep.subr.mxu1 %v11710_v38 }
 0xa50   :  { %11719 = vmatpush3.msra.mxu1 %v11710_v38 }
 0xa51   :  { %11720 = vmatprep.subr.mxu1 %v3803_v39 }
 0xa52   :  { %11721 = vmatpush3.msra.mxu1 %v3803_v39 }
 0xa53   :  { %11723 = vmatmul.mubr.msk.f32.vlgmr.msra.gmra.mxu1 %vm3540_vm5, %v10226_v25  ;;  %11739 = vmatprep.subr.mxu1 %v13535_v49 }
 0xa54   :  { %11725 = vmatprep.mubr.msk.f32.mxu1 %vm3540_vm5, %v10227_v41 }
 0xa57   :  { %11726 = vmatmul.mubr.msk.f32.gmra.mxu1 %vm3540_vm5, %v10228_v42 }
 0xa58   :  { %11747 = vmatprep.mubr.msk.f32.mxu1 %vm13536_vm2, %v13535_v49 }
 0xb13   :  { %v11724_v16 = vpop.f32.mrf.mxu1 }
 0xb14   :  { %v3925_v14 = vadd.f32 %v11724_v16, %v3722_v46  ;;  %v4219_v46 = vld [vmem:[#allocation6 + $0x18] sm:$0xff] }
 0xb15   :  { %v3905_v4 = vpop.f32.mrf.mxu1 }
 0xb16   :  { %v3924_v56 = vadd.f32 %v3905_v4, %v3717_v45  ;;  %v4309_v4 = vld [vmem:[#allocation6 + $0x28] sm:$0xff] }
 0xb17   :  { %v11727_v50 = vpop.f32.mrf.mxu1 }
 0xb18   :  { %v3927_v11 = vadd.f32 %v11727_v50, %v3732_v48  ;;  %v4507_v48 = vld [vmem:[#allocation12 + $0x10] sm:$0xff] }
 0xb19   :  { %v3915_v9 = vpop.f32.mrf.mxu1  ;;  %v4310_v50 = vld [vmem:[#allocation6 + $0x30] sm:$0xff] }
 0xb1a   :  { %v3926_v55 = vadd.f32 %v3915_v9, %v3727_v10  ;;  %11729 = vmatpush3.msra.mxu0 %v3927_v11  ;;  %v4217_v10 = vld [vmem:[#allocation6 + $0x8] sm:$0xff]  ;;  %v4311_v9 = vld [vmem:[#allocation6 + $0x38] sm:$0xff] }
 0xb1b   :  { %11730 = vmatprep.subr.mxu0 %v13535_v49 }
 0xb1c   :  { %11731 = vmatpush3.msra.mxu0 %v3926_v55 }
 0xb1d   :  { %11732 = vmatprep.subr.mxu0 %v13535_v49 }
 0xb1e   :  { %11733 = vmatpush3.msra.mxu0 %v3925_v14 }
 0xb1f   :  { %11734 = vmatprep.subr.mxu0 %v13535_v49 }
 0xb20   :  { %11735 = vmatpush3.msra.mxu0 %v3924_v56 }
 0xb21   :  { %11737 = vmatmul.mubr.msk.f32.vlgmr.msra.gmra.mxu0 %vm3540_vm5, %v13539_v5  ;;  %11750 = vmatprep.subr.mxu0 %v4118_v18 }
 0xb22   :  { %11751 = vmatpush3.msra.mxu0 %v4118_v18 }
 0xbe1   :  { %v3997_v6 = vpop.f32.mrf.mxu0 }
 0xbe2   :  { %v4004_v54 = vrot.slane %v3997_v6, %v14452_v63 }
 0xbe3   :  { %v11738_v57 = vpop.f32.mrf.mxu0 }
 0xbe4   :  { %v4007_v58 = vsub.f32 %v3926_v55, %v4004_v54  ;;  %v4008_v61 = vsub.f32 %v3927_v11, %v4004_v54  ;;  %v4006_v43 = vsub.f32 %v3925_v14, %v4004_v54  ;;  %v4005_v59 = vsub.f32 %v3924_v56, %v4004_v54  ;;  %v4218_v11 = vld [vmem:[#allocation6 + $0x10] sm:$0xff]  ;;  %v4594_v55 = vld [vmem:[#allocation6 + $0x40] sm:$0xff] }
 0xbe6   :  { %v4012_v53 = vmul.f32 %v4008_v61, %v4008_v61  ;;  %v4011_v60 = vmul.f32 %v4007_v58, %v4007_v58  ;;  %v4010_v0 = vmul.f32 %v4006_v43, %v4006_v43  ;;  %v4009_v1 = vmul.f32 %v4005_v59, %v4005_v59 }
 0xbe8   :  { %11740 = vmatpush3.msra.mxu1 %v4012_v53  ;;  %v4596_v53 = vld [vmem:[#allocation6 + $0x50] sm:$0xff] }
 0xbe9   :  { %11741 = vmatprep.subr.mxu1 %v13535_v49 }
 0xbea   :  { %11742 = vmatpush3.msra.mxu1 %v4011_v60 }
 0xbeb   :  { %11743 = vmatprep.subr.mxu1 %v13535_v49 }
 0xbec   :  { %11744 = vmatpush3.msra.mxu1 %v4010_v0 }
 0xbed   :  { %11745 = vmatprep.subr.mxu1 %v13535_v49 }
 0xbee   :  { %11746 = vmatpush3.msra.mxu1 %v4009_v1 }
 0xbef   :  { %11748 = vmatmul.mubr.msk.f32.vlgmr.msra.gmra.mxu1 %vm3540_vm5, %v13539_v5  ;;  %11758 = vmatprep.subr.mxu1 %v4221_v21 }
 0xbf0   :  { %11759 = vmatpush3.msra.mxu1 %v4221_v21 }
 0xcaf   :  { %v4079_v22 = vpop.f32.mrf.mxu1 }
 0xcb0   :  { %v4080_v23 = vadd.f32 1e-05, %v4079_v22 }
 0xcb1   :  { %v11749_v2 = vpop.f32.mrf.mxu1 }
 0xcb2   :  { %12440 = vrsqrt.f32 %v4080_v23 }
 0xcbf   :  { %v12441_v3 = vpop.eup %12440 }
 0xcc0   :  { %v4087_v7 = vrot.slane %v12441_v3, %v14452_v63 }
 0xcc2   :  { %v4088_v12 = vmul.f32 %v4087_v7, %v4005_v59  ;;  %v4089_v13 = vmul.f32 %v4087_v7, %v4006_v43  ;;  %v4090_v17 = vmul.f32 %v4087_v7, %v4007_v58  ;;  %v4091_v24 = vmul.f32 %v4087_v7, %v4008_v61  ;;  %v4595_v43 = vld [vmem:[#allocation6 + $0x48] sm:$0xff]  ;;  %v4597_v59 = vld [vmem:[#allocation6 + $0x58] sm:$0xff] }
 0xcc4   :  { %v4099_v28 = vmul.f32 %v10235_v8, %v4088_v12  ;;  %v4100_v29 = vmul.f32 %v10235_v8, %v4089_v13  ;;  %v4101_v30 = vmul.f32 %v10235_v8, %v4090_v17  ;;  %v4102_v31 = vmul.f32 %v10235_v8, %v4091_v24 }
 0xcc6   :  { %v4110_v32 = vadd.f32 %v10236_v27, %v4099_v28  ;;  %v4111_v33 = vadd.f32 %v10236_v27, %v4100_v29  ;;  %v4112_v34 = vadd.f32 %v10236_v27, %v4101_v30  ;;  %v4113_v37 = vadd.f32 %v10236_v27, %v4102_v31 }
 0xcc8   :  { %v4114_v35 = vmax.f32 %v4110_v32, 0.0  ;;  %v4115_v36 = vmax.f32 %v4111_v33, 0.0  ;;  %v4116_v38 = vmax.f32 %v4112_v34, 0.0  ;;  %v4117_v39 = vmax.f32 %v4113_v37, 0.0 }
 0xcca   :  { %11752 = vmatprep.mubr.msk.f32.mxu0 %vm3346_vm4, %v4114_v35  ;;  %11760 = vmatprep.mubr.msk.f32.mxu1 %vm3346_vm4, %v4114_v35 }
 0xccb   :  { %11753 = vmatmul.mubr.msk.f32.vlgmr.msra.gmra.mxu0 %vm3346_vm4, %v4115_v36  ;;  %11761 = vmatmul.mubr.msk.f32.vlgmr.msra.gmra.mxu1 %vm3346_vm4, %v4115_v36 }
 0xccc   :  { %11755 = vmatprep.mubr.msk.f32.mxu0 %vm3346_vm4, %v4116_v38  ;;  %11763 = vmatprep.mubr.msk.f32.mxu1 %vm3346_vm4, %v4116_v38 }
 0xccf   :  { %11756 = vmatmul.mubr.msk.f32.gmra.mxu0 %vm3346_vm4, %v4117_v39  ;;  %11764 = vmatmul.mubr.msk.f32.gmra.mxu1 %vm3346_vm4, %v4117_v39 }
 0xcd0   :  { %11774 = vmatprep.mubr.msk.f32.mxu0 %vm3540_vm5, %v4308_v26  ;;  %11788 = vmatprep.mubr.msk.f32.mxu1 %vm3540_vm5, %v4216_v40 }
 0xd8b   :  { %v11754_v25 = vpop.f32.mrf.mxu0  ;;  %v11762_v41 = vpop.f32.mrf.mxu1 }
 0xd8d   :  { %v4197_v42 = vpop.f32.mrf.mxu0  ;;  %v4288_v44 = vpop.f32.mrf.mxu1 }
 0xd8f   :  { %v11757_v47 = vpop.f32.mrf.mxu0  ;;  %v11765_v51 = vpop.f32.mrf.mxu1 }
 0xd90   :  { %11766 = vmatprep.subr.mxu0 %v11765_v51  ;;  %11780 = vmatprep.subr.mxu1 %v11757_v47 }
 0xd91   :  { %v4207_v15 = vpop.f32.mrf.mxu0  ;;  %v4298_v16 = vpop.f32.mrf.mxu1  ;;  %11767 = vmatpush3.msra.mxu0 %v11765_v51  ;;  %11781 = vmatpush3.msra.mxu1 %v11757_v47 }
 0xd92   :  { %11768 = vmatprep.subr.mxu0 %v4298_v16  ;;  %11782 = vmatprep.subr.mxu1 %v4207_v15 }
 0xd93   :  { %11769 = vmatpush3.msra.mxu0 %v4298_v16  ;;  %11783 = vmatpush3.msra.mxu1 %v4207_v15  ;;  %v10264_v16 = vld [vmem:[#allocation4] ss:$0 sm:$0xff] }
 0xd94   :  { %11770 = vmatprep.subr.mxu0 %v11762_v41  ;;  %11784 = vmatprep.subr.mxu1 %v11754_v25 }
 0xd95   :  { %11771 = vmatpush3.msra.mxu0 %v11762_v41  ;;  %11785 = vmatpush3.msra.mxu1 %v11754_v25 }
 0xd96   :  { %11772 = vmatprep.subr.mxu0 %v4288_v44  ;;  %11786 = vmatprep.subr.mxu1 %v4197_v42 }
 0xd97   :  { %11773 = vmatpush3.msra.mxu0 %v4288_v44  ;;  %11787 = vmatpush3.msra.mxu1 %v4197_v42  ;;  %v10263_v44 = vld [vmem:[#allocation9] ss:$0 sm:$0xff] }
 0xd98   :  { %11775 = vmatmul.mubr.msk.f32.vlgmr.msra.gmra.mxu0 %vm3540_vm5, %v4309_v4  ;;  %11794 = vmatprep.subr.mxu0 %v4507_v48 }
 0xd99   :  { %11777 = vmatprep.mubr.msk.f32.mxu0 %vm3540_vm5, %v4310_v50  ;;  %11795 = vmatpush3.msra.mxu0 %v4507_v48 }
 0xd9a   :  { %11789 = vmatmul.mubr.msk.f32.vlgmr.msra.gmra.mxu1 %vm3540_vm5, %v4217_v10  ;;  %11816 = vmatprep.subr.mxu0 %v13535_v49 }
 0xd9b   :  { %11791 = vmatprep.mubr.msk.f32.mxu1 %vm3540_vm5, %v4218_v11 }
 0xd9c   :  { %11778 = vmatmul.mubr.msk.f32.gmra.mxu0 %vm3540_vm5, %v4311_v9 }
 0xd9d   :  { %11796 = vmatprep.mubr.msk.f32.mxu0 %vm3346_vm4, %v4114_v35 }
 0xd9e   :  { %11792 = vmatmul.mubr.msk.f32.gmra.mxu1 %vm3540_vm5, %v4219_v46 }
 0xd9f   :  { %11810 = vmatprep.mubr.msk.f32.mxu1 %vm3540_vm5, %v4594_v55 }
 0xda0   :  { %11797 = vmatmul.mubr.msk.f32.vlgmr.msra.gmra.mxu0 %vm3346_vm4, %v4115_v36 }
 0xda1   :  { %11799 = vmatprep.mubr.msk.f32.mxu0 %vm3346_vm4, %v4116_v38 }
 0xda4   :  { %11800 = vmatmul.mubr.msk.f32.gmra.mxu0 %vm3346_vm4, %v4117_v39  ;;  %v4890_v39 = vld [vmem:[#allocation30] sm:$0xff] }
 0xda5   :  { %11824 = vmatprep.mubr.msk.f32.mxu0 %vm13536_vm2, %v13535_v49 }
 0xe58   :  { %v11776_v45 = vpop.f32.mrf.mxu0 }
 0xe5a   :  { %v4390_v14 = vpop.f32.mrf.mxu0  ;;  %v11790_v60 = vpop.f32.mrf.mxu1 }
 0xe5b   :  { %v4493_v12 = vadd.f32 %v11790_v60, %v11776_v45  ;;  %v5248_v60 = vld [vmem:[#allocation27] sm:$0xff] }
 0xe5c   :  { %v11779_v56 = vpop.f32.mrf.mxu0  ;;  %v4487_v0 = vpop.f32.mrf.mxu1 }
 0xe5d   :  { %v4488_v17 = vadd.f32 %v4487_v0, %v4390_v14 }
 0xe5e   :  { %v4400_v6 = vpop.f32.mrf.mxu0  ;;  %v11793_v1 = vpop.f32.mrf.mxu1 }
 0xe5f   :  { %v4503_v23 = vadd.f32 %v11793_v1, %v11779_v56  ;;  %v13540_v1 = vmov 0.0625  }
 0xe60   :  { %v11798_v54 = vpop.f32.mrf.mxu0  ;;  %v4497_v18 = vpop.f32.mrf.mxu1 }
 0xe61   :  { %v4498_v3 = vadd.f32 %v4497_v18, %v4400_v6 }
 0xe62   :  { %v4574_v57 = vpop.f32.mrf.mxu0 }
 0xe64   :  { %v11801_v58 = vpop.f32.mrf.mxu0 }
 0xe65   :  { %11802 = vmatprep.subr.mxu1 %v11801_v58 }
 0xe66   :  { %v4584_v61 = vpop.f32.mrf.mxu0  ;;  %11803 = vmatpush3.msra.mxu1 %v11801_v58 }
 0xe67   :  { %11804 = vmatprep.subr.mxu1 %v4584_v61 }
 0xe68   :  { %11805 = vmatpush3.msra.mxu1 %v4584_v61 }
 0xe69   :  { %11806 = vmatprep.subr.mxu1 %v11798_v54 }
 0xe6a   :  { %11807 = vmatpush3.msra.mxu1 %v11798_v54 }
 0xe6b   :  { %11808 = vmatprep.subr.mxu1 %v4574_v57 }
 0xe6c   :  { %11809 = vmatpush3.msra.mxu1 %v4574_v57 }
 0xe6d   :  { %11811 = vmatmul.mubr.msk.f32.vlgmr.msra.gmra.mxu1 %vm3540_vm5, %v4595_v43  ;;  %11827 = vmatprep.subr.mxu1 %v13535_v49 }
 0xe6e   :  { %11813 = vmatprep.mubr.msk.f32.mxu1 %vm3540_vm5, %v4596_v53  ;;  %v4989_v53 = vld [vmem:[#allocation25 + $0x8] sm:$0xff] }
 0xe71   :  { %11814 = vmatmul.mubr.msk.f32.gmra.mxu1 %vm3540_vm5, %v4597_v59 }
 0xe72   :  { %11835 = vmatprep.mubr.msk.f32.mxu1 %vm13536_vm2, %v13535_v49 }
 0xf2d   :  { %v11812_v21 = vpop.f32.mrf.mxu1 }
 0xf2e   :  { %v4696_v24 = vadd.f32 %v11812_v21, %v4493_v12 }
 0xf2f   :  { %v4676_v22 = vpop.f32.mrf.mxu1 }
 0xf30   :  { %v4695_v27 = vadd.f32 %v4676_v22, %v4488_v17 }
 0xf31   :  { %v11815_v2 = vpop.f32.mrf.mxu1 }
 0xf32   :  { %v4698_v7 = vadd.f32 %v11815_v2, %v4503_v23 }
 0xf33   :  { %v4686_v8 = vpop.f32.mrf.mxu1 }
 0xf34   :  { %v4697_v13 = vadd.f32 %v4686_v8, %v4498_v3  ;;  %11817 = vmatpush3.msra.mxu0 %v4698_v7 }
 0xf35   :  { %11818 = vmatprep.subr.mxu0 %v13535_v49 }
 0xf36   :  { %11819 = vmatpush3.msra.mxu0 %v4697_v13 }
 0xf37   :  { %11820 = vmatprep.subr.mxu0 %v13535_v49 }
 0xf38   :  { %11821 = vmatpush3.msra.mxu0 %v4696_v24 }
 0xf39   :  { %11822 = vmatprep.subr.mxu0 %v13535_v49 }
 0xf3a   :  { %11823 = vmatpush3.msra.mxu0 %v4695_v27 }
 0xf3b   :  { %11825 = vmatmul.mubr.msk.f32.vlgmr.msra.gmra.mxu0 %vm3540_vm5, %v13539_v5  ;;  %11838 = vmatprep.subr.mxu0 %v4890_v39 }
 0xf3c   :  { %11839 = vmatpush3.msra.mxu0 %v4890_v39 }
 0xffb   :  { %v4765_v28 = vpop.f32.mrf.mxu0 }
 0xffc   :  { %v4772_v29 = vrot.slane %v4765_v28, %v14452_v63  ;;  %v5334_v28 = vld [vmem:[#allocation18] sm:$0xff] }
 0xffd   :  { %v11826_v30 = vpop.f32.mrf.mxu0 }
 0xffe   :  { %v4775_v31 = vsub.f32 %v4697_v13, %v4772_v29  ;;  %v4776_v32 = vsub.f32 %v4698_v7, %v4772_v29  ;;  %v4774_v33 = vsub.f32 %v4696_v24, %v4772_v29  ;;  %v4773_v35 = vsub.f32 %v4695_v27, %v4772_v29  ;;  %v5337_v13 = vld [vmem:[#allocation27 + $0x8] sm:$0xff]  ;;  %v5424_v27 = vld [vmem:[#allocation18 + $0x10] sm:$0xff]  ;;  %v5335_v29 = vld [vmem:[#allocation18 + $0x8] sm:$0xff] }
0x1000   :  { %v4780_v34 = vmul.f32 %v4776_v32, %v4776_v32  ;;  %v4779_v36 = vmul.f32 %v4775_v31, %v4775_v31  ;;  %v4778_v37 = vmul.f32 %v4774_v33, %v4774_v33  ;;  %v4777_v38 = vmul.f32 %v4773_v35, %v4773_v35 }
0x1002   :  { %11828 = vmatpush3.msra.mxu1 %v4780_v34 }
0x1003   :  { %11829 = vmatprep.subr.mxu1 %v13535_v49 }
0x1004   :  { %11830 = vmatpush3.msra.mxu1 %v4779_v36  ;;  %v5425_v36 = vld [vmem:[#allocation18 + $0x18] sm:$0xff] }
0x1005   :  { %11831 = vmatprep.subr.mxu1 %v13535_v49 }
0x1006   :  { %11832 = vmatpush3.msra.mxu1 %v4778_v37  ;;  %v5589_v37 = vld [vmem:[#allocation27 + $0x10] sm:$0xff] }
0x1007   :  { %11833 = vmatprep.subr.mxu1 %v13535_v49 }
0x1008   :  { %11834 = vmatpush3.msra.mxu1 %v4777_v38  ;;  %v5676_v38 = vld [vmem:[#allocation18 + $0x20] sm:$0xff] }
0x1009   :  { %11836 = vmatmul.mubr.msk.f32.vlgmr.msra.gmra.mxu1 %vm3540_vm5, %v13539_v5  ;;  %11864 = vmatprep.subr.mxu1 %v13535_v49 }
0x100a   :  { %11868 = vmatprep.mubr.msk.f32.mxu1 %vm13536_vm2, %v13535_v49 }
0x10c9   :  { %v4847_v26 = vpop.f32.mrf.mxu1 }
0x10ca   :  { %v4848_v40 = vadd.f32 1e-05, %v4847_v26 }
0x10cb   :  { %v11837_v25 = vpop.f32.mrf.mxu1 }
0x10cc   :  { %12442 = vrsqrt.f32 %v4848_v40 }
0x10d9   :  { %v12443_v41 = vpop.eup %12442 }
0x10da   :  { %v4855_v42 = vrot.slane %v12443_v41, %v14452_v63 }
0x10dc   :  { %v4856_v47 = vmul.f32 %v4855_v42, %v4773_v35  ;;  %v4857_v51 = vmul.f32 %v4855_v42, %v4774_v33  ;;  %v4858_v15 = vmul.f32 %v4855_v42, %v4775_v31  ;;  %v4859_v5 = vmul.f32 %v4855_v42, %v4776_v32 }
0x10de   :  { %v4867_v4 = vmul.f32 %v10263_v44, %v4856_v47  ;;  %v4868_v48 = vmul.f32 %v10263_v44, %v4857_v51  ;;  %v4869_v50 = vmul.f32 %v10263_v44, %v4858_v15  ;;  %v4870_v10 = vmul.f32 %v10263_v44, %v4859_v5  ;;  %v5677_v44 = vld [vmem:[#allocation18 + $0x28] sm:$0xff] }
0x10e0   :  { %v4878_v11 = vadd.f32 %v10264_v16, %v4867_v4  ;;  %v4879_v9 = vadd.f32 %v10264_v16, %v4868_v48  ;;  %v4880_v46 = vadd.f32 %v10264_v16, %v4869_v50  ;;  %v4881_v55 = vadd.f32 %v10264_v16, %v4870_v10 }
0x10e2   :  { %v4882_v45 = vadd.f32 %v4878_v11, %v14540_v62  ;;  %v4883_v14 = vadd.f32 %v4879_v9, %v14542_v52  ;;  %v4884_v56 = vadd.f32 %v4880_v46, %v14548_v19  ;;  %v4885_v57 = vadd.f32 %v4881_v55, %v14550_v20  ;;  %v4988_v52 = vld [vmem:[#allocation25] sm:$0xff] }
0x10e4   :  { %v14662_v6 = vmax.f32 %v4882_v45, 0.0  ;;  %v14664_v54 = vmax.f32 %v4883_v14, 0.0  ;;  %v14669_v58 = vmax.f32 %v4884_v56, 0.0  ;;  %v14675_v62 = vmax.f32 %v4885_v57, 0.0  ;;  %v5937_v56 = vld [vmem:[#allocation28 + $0x8] sm:$0xff]  ;;  %v6022_v57 = vld [vmem:[#allocation28 + $0x10] sm:$0xff] }
0x10e6   :  { %11840 = vmatprep.mubr.msk.f32.mxu0 %vm3346_vm4, %v14662_v6 }
0x10e7   :  { %11841 = vmatmul.mubr.msk.f32.vlgmr.msra.gmra.mxu0 %vm3346_vm4, %v14664_v54 }
0x10e8   :  { %11843 = vmatprep.mubr.msk.f32.mxu0 %vm3346_vm4, %v14669_v58 }
0x10eb   :  { %11844 = vmatmul.mubr.msk.f32.gmra.mxu0 %vm3346_vm4, %v14675_v62 }
0x10ec   :  { %11854 = vmatprep.mubr.msk.f32.mxu0 %vm3540_vm5, %v4988_v52 }
0x11a7   :  { %v11842_v19 = vpop.f32.mrf.mxu0 }
0x11a9   :  { %v4969_v20 = vpop.f32.mrf.mxu0 }
0x11ab   :  { %v11845_v61 = vpop.f32.mrf.mxu0 }
0x11ac   :  { %11846 = vmatprep.subr.mxu0 %v11845_v61 }
0x11ad   :  { %v4979_v43 = vpop.f32.mrf.mxu0  ;;  %11847 = vmatpush3.msra.mxu0 %v11845_v61  ;;  %v10295_v61 = vld [vmem:[#allocation21] ss:$0 sm:$0xff] }
0x11ae   :  { %11848 = vmatprep.subr.mxu0 %v4979_v43 }
0x11af   :  { %11849 = vmatpush3.msra.mxu0 %v4979_v43 }
0x11b0   :  { %11850 = vmatprep.subr.mxu0 %v11842_v19 }
0x11b1   :  { %11851 = vmatpush3.msra.mxu0 %v11842_v19 }
0x11b2   :  { %11852 = vmatprep.subr.mxu0 %v4969_v20 }
0x11b3   :  { %11853 = vmatpush3.msra.mxu0 %v4969_v20 }
0x11b4   :  { %11855 = vmatmul.mubr.msk.f32.vlgmr.msra.gmra.mxu0 %vm3540_vm5, %v4989_v53  ;;  %11857 = vmatprep.subr.mxu0 %v13535_v49 }
0x11b5   :  { %11861 = vmatprep.mubr.msk.f32.mxu0 %vm13536_vm2, %v13535_v49 }
0x1274   :  { %v11856_v59 = vpop.f32.mrf.mxu0 }
0x1275   :  { %11858 = vmatpush3.msra.mxu0 %v11856_v59 }
0x1276   :  { %v5062_v0 = vpop.f32.mrf.mxu0  ;;  %11859 = vmatprep.subr.mxu0 %v13535_v49 }
0x1277   :  { %11860 = vmatpush3.msra.mxu0 %v5062_v0 }
0x1278   :  { %11862 = vmatmul.mubr.msk.f32.vlgmr.msra.gmra.mxu0 %vm5071_vm6, %v13540_v1  ;;  %11871 = vmatprep.subr.mxu0 %v5248_v60 }
0x1279   :  { %11873 = vmatprep.mubr.msk.f32.mxu0 %vm3346_vm4, %v14662_v6  ;;  %11872 = vmatpush3.msra.mxu0 %v5248_v60 }
0x127c   :  { %11874 = vmatmul.mubr.msk.f32.vlgmr.msra.gmra.mxu0 %vm3346_vm4, %v14664_v54 }
0x127d   :  { %11876 = vmatprep.mubr.msk.f32.mxu0 %vm3346_vm4, %v14669_v58 }
0x1280   :  { %11877 = vmatmul.mubr.msk.f32.gmra.mxu0 %vm3346_vm4, %v14675_v62 }
0x1281   :  { %11895 = vmatprep.mubr.msk.f32.mxu0 %vm3540_vm5, %v5424_v27  ;;  %v6101_v27 = vld [vmem:[#allocation19 + $0x18] sm:$0xff] }
0x1338   :  { %v5141_v18 = vpop.f32.mrf.mxu0 }
0x1339   :  { %v5148_v21 = vrot.slane %v5141_v18, %v14452_v63 }
0x133a   :  { %v11863_v22 = vpop.f32.mrf.mxu0 }
0x133b   :  { %v14696_v23 = vsub.f32 %v5062_v0, %v5148_v21  ;;  %v14698_v2 = vsub.f32 %v11856_v59, %v5148_v21  ;;  %v10296_v59 = vld [vmem:[#allocation13] ss:$0 sm:$0xff] }
0x133c   :  { %v11875_v3 = vpop.f32.mrf.mxu0 }
0x133d   :  { %v5152_v7 = vmul.f32 %v14698_v2, %v14698_v2  ;;  %v5151_v8 = vmul.f32 %v14696_v23, %v14696_v23 }
0x133e   :  { %v5315_v12 = vpop.f32.mrf.mxu0 }
0x133f   :  { %11865 = vmatpush3.msra.mxu1 %v5152_v7  ;;  %v6100_v7 = vld [vmem:[#allocation19 + $0x10] sm:$0xff] }
0x1340   :  { %11866 = vmatprep.subr.mxu1 %v13535_v49  ;;  %v11878_v17 = vpop.f32.mrf.mxu0 }
0x1341   :  { %11867 = vmatpush3.msra.mxu1 %v5151_v8  ;;  %v6019_v8 = vld [vmem:[#allocation19] sm:$0xff] }
0x1342   :  { %11869 = vmatmul.mubr.msk.f32.vlgmr.msra.gmra.mxu1 %vm5071_vm6, %v13540_v1  ;;  %11879 = vmatprep.subr.mxu1 %v5337_v13  ;;  %v5325_v24 = vpop.f32.mrf.mxu0 }
0x1343   :  { %11880 = vmatpush3.msra.mxu1 %v5337_v13  ;;  %11881 = vmatprep.mubr.msk.f32.mxu1 %vm3346_vm4, %v14662_v6 }
0x1344   :  { %11898 = vmatprep.subr.mxu1 %v11878_v17 }
0x1346   :  { %11882 = vmatmul.mubr.msk.f32.vlgmr.msra.gmra.mxu1 %vm3346_vm4, %v14664_v54 }
0x1347   :  { %11899 = vmatpush3.msra.mxu1 %v11878_v17  ;;  %11884 = vmatprep.mubr.msk.f32.mxu1 %vm3346_vm4, %v14669_v58 }
0x1348   :  { %11900 = vmatprep.subr.mxu1 %v5325_v24 }
0x1349   :  { %11901 = vmatpush3.msra.mxu1 %v5325_v24 }
0x134a   :  { %11902 = vmatprep.subr.mxu1 %v11875_v3  ;;  %11885 = vmatmul.mubr.msk.f32.gmra.mxu1 %vm3346_vm4, %v14675_v62 }
0x134b   :  { %11903 = vmatpush3.msra.mxu1 %v11875_v3  ;;  %11906 = vmatprep.mubr.msk.f32.mxu1 %vm3540_vm5, %v5334_v28  ;;  %v6266_v28 = vld [vmem:[#allocation28 + $0x28] sm:$0xff] }
0x134c   :  { %11904 = vmatprep.subr.mxu1 %v5315_v12 }
0x134d   :  { %11905 = vmatpush3.msra.mxu1 %v5315_v12 }
0x134e   :  { %11907 = vmatmul.mubr.msk.f32.vlgmr.msra.gmra.mxu1 %vm3540_vm5, %v5335_v29  ;;  %v6265_v29 = vld [vmem:[#allocation28 + $0x20] sm:$0xff] }
0x134f   :  { %11925 = vmatprep.mubr.msk.f32.mxu1 %vm3540_vm5, %v5676_v38 }
0x1402   :  { %v14718_v30 = vpop.f32.mrf.mxu1 }
0x1404   :  { %v11870_v31 = vpop.f32.mrf.mxu1 }
0x1405   :  { %v6020_v31 = vld [vmem:[#allocation19 + $0x8] sm:$0xff] }
0x1406   :  { %v11883_v32 = vpop.f32.mrf.mxu1 }
0x1408   :  { %v5404_v33 = vpop.f32.mrf.mxu1 }
0x140a   :  { %v11886_v34 = vpop.f32.mrf.mxu1 }
0x140b   :  { %11887 = vmatprep.subr.mxu0 %v11886_v34 }
0x140c   :  { %v5414_v35 = vpop.f32.mrf.mxu1  ;;  %11888 = vmatpush3.msra.mxu0 %v11886_v34 }
0x140d   :  { %11889 = vmatprep.subr.mxu0 %v5414_v35 }
0x140e   :  { %11890 = vmatpush3.msra.mxu0 %v5414_v35  ;;  %v11908_v47 = vpop.f32.mrf.mxu1 }
0x140f   :  { %11891 = vmatprep.subr.mxu0 %v11883_v32 }
0x1410   :  { %11892 = vmatpush3.msra.mxu0 %v11883_v32  ;;  %v5579_v51 = vpop.f32.mrf.mxu1  ;;  %v6343_v32 = vld [vmem:[#allocation19 + $0x20] sm:$0xff] }
0x1411   :  { %11893 = vmatprep.subr.mxu0 %v5404_v33 }
0x1412   :  { %11894 = vmatpush3.msra.mxu0 %v5404_v33 }
0x1413   :  { %11896 = vmatmul.mubr.msk.f32.vlgmr.msra.gmra.mxu0 %vm3540_vm5, %v5425_v36  ;;  %11909 = vmatprep.subr.mxu0 %v5589_v37 }
0x1414   :  { %11911 = vmatprep.mubr.msk.f32.mxu0 %vm3346_vm4, %v14662_v6  ;;  %11910 = vmatpush3.msra.mxu0 %v5589_v37  ;;  %v6023_v6 = vld [vmem:[#allocation28 + $0x18] sm:$0xff]  ;;  %v6344_v37 = vld [vmem:[#allocation19 + $0x28] sm:$0xff] }
0x1415   :  { %11928 = vmatprep.subr.mxu0 %v13535_v49 }
0x1417   :  { %11912 = vmatmul.mubr.msk.f32.vlgmr.msra.gmra.mxu0 %vm3346_vm4, %v14664_v54  ;;  %v5936_v54 = vld [vmem:[#allocation28] sm:$0xff] }
0x1418   :  { %11914 = vmatprep.mubr.msk.f32.mxu0 %vm3346_vm4, %v14669_v58 }
0x141b   :  { %11915 = vmatmul.mubr.msk.f32.gmra.mxu0 %vm3346_vm4, %v14675_v62 }
0x141c   :  { %11932 = vmatprep.mubr.msk.f32.mxu0 %vm13536_vm2, %v13535_v49 }
0x14d3   :  { %v11897_v39 = vpop.f32.mrf.mxu0 }
0x14d4   :  { %v5585_v15 = vadd.f32 %v11908_v47, %v11897_v39 }
0x14d5   :  { %v5498_v26 = vpop.f32.mrf.mxu0 }
0x14d6   :  { %v5580_v16 = vadd.f32 %v5579_v51, %v5498_v26 }
0x14d7   :  { %v11913_v40 = vpop.f32.mrf.mxu0 }
0x14d9   :  { %v5656_v25 = vpop.f32.mrf.mxu0 }
0x14db   :  { %v11916_v41 = vpop.f32.mrf.mxu0 }
0x14dc   :  { %11917 = vmatprep.subr.mxu1 %v11916_v41 }
0x14dd   :  { %v5666_v42 = vpop.f32.mrf.mxu0  ;;  %11918 = vmatpush3.msra.mxu1 %v11916_v41 }
0x14de   :  { %11919 = vmatprep.subr.mxu1 %v5666_v42 }
0x14df   :  { %11920 = vmatpush3.msra.mxu1 %v5666_v42 }
0x14e0   :  { %11921 = vmatprep.subr.mxu1 %v11913_v40 }
0x14e1   :  { %11922 = vmatpush3.msra.mxu1 %v11913_v40 }
0x14e2   :  { %11923 = vmatprep.subr.mxu1 %v5656_v25 }
0x14e3   :  { %11924 = vmatpush3.msra.mxu1 %v5656_v25 }
0x14e4   :  { %11926 = vmatmul.mubr.msk.f32.vlgmr.msra.gmra.mxu1 %vm3540_vm5, %v5677_v44  ;;  %11935 = vmatprep.subr.mxu1 %v13535_v49 }
0x14e5   :  { %11939 = vmatprep.mubr.msk.f32.mxu1 %vm13536_vm2, %v13535_v49 }
0x15a4   :  { %v11927_v5 = vpop.f32.mrf.mxu1 }
0x15a5   :  { %v5760_v4 = vadd.f32 %v11927_v5, %v5585_v15 }
0x15a6   :  { %v5750_v48 = vpop.f32.mrf.mxu1 }
0x15a7   :  { %v5759_v50 = vadd.f32 %v5750_v48, %v5580_v16  ;;  %11929 = vmatpush3.msra.mxu0 %v5760_v4 }
0x15a8   :  { %11930 = vmatprep.subr.mxu0 %v13535_v49 }
0x15a9   :  { %11931 = vmatpush3.msra.mxu0 %v5759_v50 }
0x15aa   :  { %11933 = vmatmul.mubr.msk.f32.vlgmr.msra.gmra.mxu0 %vm5071_vm6, %v13540_v1  ;;  %11942 = vmatprep.subr.mxu0 %v5937_v56 }
0x15ab   :  { %11943 = vmatpush3.msra.mxu0 %v5937_v56 }
0x15ac   :  { %11944 = vmatprep.subr.mxu0 %v5936_v54 }
0x15ad   :  { %11945 = vmatpush3.msra.mxu0 %v5936_v54  ;;  %v10273_v54 = vld [vmem:[#allocation24] ss:$0 sm:$0xff] }
0x166a   :  { %v5827_v10 = vpop.f32.mrf.mxu0 }
0x166b   :  { %v5834_v11 = vrot.slane %v5827_v10, %v14452_v63  ;;  %v6605_v10 = vld [vmem:[#allocation48] sm:$0xff] }
0x166c   :  { %v11934_v9 = vpop.f32.mrf.mxu0 }
0x166d   :  { %v5835_v46 = vsub.f32 %v5759_v50, %v5834_v11  ;;  %v5836_v55 = vsub.f32 %v5760_v4, %v5834_v11  ;;  %v6606_v50 = vld [vmem:[#allocation48 + $0x8] sm:$0xff]  ;;  %v5220_v11 = vadd.f32 1e-05, %v14718_v30 }
0x166f   :  { %v5838_v45 = vmul.f32 %v5836_v55, %v5836_v55  ;;  %v5837_v14 = vmul.f32 %v5835_v46, %v5835_v46 }
0x1671   :  { %11936 = vmatpush3.msra.mxu1 %v5838_v45 }
0x1672   :  { %11937 = vmatprep.subr.mxu1 %v13535_v49 }
0x1673   :  { %11938 = vmatpush3.msra.mxu1 %v5837_v14 }
0x1674   :  { %11940 = vmatmul.mubr.msk.f32.vlgmr.msra.gmra.mxu1 %vm5071_vm6, %v13540_v1  ;;  %11949 = vmatprep.subr.mxu1 %v6023_v6 }
0x1675   :  { %11950 = vmatpush3.msra.mxu1 %v6023_v6 }
0x1676   :  { %11951 = vmatprep.subr.mxu1 %v6022_v57 }
0x1677   :  { %11952 = vmatpush3.msra.mxu1 %v6022_v57 }
0x1734   :  { %v5905_v58 = vpop.f32.mrf.mxu1 }
0x1735   :  { %v5906_v62 = vadd.f32 1e-05, %v5905_v58  ;;  %v10311_v58 = vld [vmem:[#allocation22] ss:$0 sm:$0xff] }
0x1736   :  { %v11941_v52 = vpop.f32.mrf.mxu1 }
0x1737   :  { %12444 = vrsqrt.f32 %v5906_v62 }
0x1738   :  { %12446 = vrsqrt.f32 %v5220_v11 }
0x1744   :  { %v12445_v19 = vpop.eup %12444 }
0x1745   :  { %v5913_v20 = vrot.slane %v12445_v19, %v14452_v63 }
0x1747   :  { %v5914_v43 = vmul.f32 %v5913_v20, %v5835_v46  ;;  %v5915_v53 = vmul.f32 %v5913_v20, %v5836_v55  ;;  %v10274_v20 = vld [vmem:[#allocation16] ss:$0 sm:$0xff] }
0x1749   :  { %v5923_v60 = vmul.f32 %v10295_v61, %v5914_v43  ;;  %v5924_v0 = vmul.f32 %v10295_v61, %v5915_v53  ;;  %v10312_v61 = vld [vmem:[#allocation15] ss:$0 sm:$0xff] }
0x174b   :  { %v5932_v18 = vadd.f32 %v10296_v59, %v5923_v60  ;;  %v5933_v21 = vadd.f32 %v10296_v59, %v5924_v0 }
0x174d   :  { %v5934_v22 = vmax.f32 %v5932_v18, 0.0  ;;  %v5935_v3 = vmax.f32 %v5933_v21, 0.0 }
0x174f   :  { %11946 = vmatprep.mubr.msk.f32.mxu0 %vm5071_vm6, %v5934_v22  ;;  %11953 = vmatprep.mubr.msk.f32.mxu1 %vm5071_vm6, %v5934_v22 }
0x1750   :  { %11947 = vmatmul.mubr.msk.f32.vlgmr.msra.gmra.mxu0 %vm5071_vm6, %v5935_v3  ;;  %11954 = vmatmul.mubr.msk.f32.vlgmr.msra.gmra.mxu1 %vm5071_vm6, %v5935_v3 }
0x1751   :  { %11960 = vmatprep.mubr.msk.f32.mxu0 %vm5071_vm6, %v6100_v7  ;;  %11967 = vmatprep.mubr.msk.f32.mxu1 %vm5071_vm6, %v6019_v8  ;;  %v6688_v7 = vld [vmem:[#allocation43] sm:$0xff] }
0x1810   :  { %v11948_v12 = vpop.f32.mrf.mxu0  ;;  %v11955_v13 = vpop.f32.mrf.mxu1 }
0x1811   :  { %11956 = vmatprep.subr.mxu0 %v11955_v13  ;;  %11963 = vmatprep.subr.mxu1 %v11948_v12 }
0x1812   :  { %v6010_v17 = vpop.f32.mrf.mxu0  ;;  %v6090_v24 = vpop.f32.mrf.mxu1  ;;  %11957 = vmatpush3.msra.mxu0 %v11955_v13  ;;  %11964 = vmatpush3.msra.mxu1 %v11948_v12  ;;  %v6934_v12 = vld [vmem:[#allocation45 + $0x8] sm:$0xff] }
0x1813   :  { %11958 = vmatprep.subr.mxu0 %v6090_v24  ;;  %11965 = vmatprep.subr.mxu1 %v6010_v17 }
0x1814   :  { %11959 = vmatpush3.msra.mxu0 %v6090_v24  ;;  %11966 = vmatpush3.msra.mxu1 %v6010_v17  ;;  %v6933_v17 = vld [vmem:[#allocation45] sm:$0xff]  ;;  %v13541_v24 = vmov 0.125  }
0x1815   :  { %11961 = vmatmul.mubr.msk.f32.vlgmr.msra.gmra.mxu0 %vm5071_vm6, %v6101_v27  ;;  %11970 = vmatprep.subr.mxu0 %v6266_v28 }
0x1816   :  { %11971 = vmatpush3.msra.mxu0 %v6266_v28  ;;  %11974 = vmatprep.mubr.msk.f32.mxu0 %vm5071_vm6, %v5934_v22 }
0x1817   :  { %11972 = vmatprep.subr.mxu0 %v6265_v29  ;;  %11968 = vmatmul.mubr.msk.f32.vlgmr.msra.gmra.mxu1 %vm5071_vm6, %v6020_v31 }
0x1818   :  { %11973 = vmatpush3.msra.mxu0 %v6265_v29  ;;  %11981 = vmatprep.mubr.msk.f32.mxu1 %vm5071_vm6, %v6343_v32 }
0x1819   :  { %11975 = vmatmul.mubr.msk.f32.vlgmr.msra.gmra.mxu0 %vm5071_vm6, %v5935_v3  ;;  %11984 = vmatprep.subr.mxu0 %v13535_v49 }
0x181a   :  { %11988 = vmatprep.mubr.msk.f32.mxu0 %vm13536_vm2, %v13535_v49 }
0x18d5   :  { %v11962_v33 = vpop.f32.mrf.mxu0 }
0x18d7   :  { %v6174_v34 = vpop.f32.mrf.mxu0  ;;  %v11969_v38 = vpop.f32.mrf.mxu1 }
0x18d8   :  { %v6261_v26 = vadd.f32 %v11969_v38, %v11962_v33  ;;  %v7010_v38 = vld [vmem:[#allocation36] sm:$0xff] }
0x18d9   :  { %v11976_v35 = vpop.f32.mrf.mxu0  ;;  %v6255_v39 = vpop.f32.mrf.mxu1 }
0x18da   :  { %11977 = vmatprep.subr.mxu1 %v11976_v35  ;;  %v6256_v25 = vadd.f32 %v6255_v39, %v6174_v34  ;;  %v7013_v34 = vld [vmem:[#allocation45 + $0x18] sm:$0xff] }
0x18db   :  { %v6333_v36 = vpop.f32.mrf.mxu0  ;;  %11978 = vmatpush3.msra.mxu1 %v11976_v35  ;;  %v7012_v35 = vld [vmem:[#allocation45 + $0x10] sm:$0xff] }
0x18dc   :  { %11979 = vmatprep.subr.mxu1 %v6333_v36 }
0x18dd   :  { %11980 = vmatpush3.msra.mxu1 %v6333_v36 }
0x18de   :  { %11982 = vmatmul.mubr.msk.f32.vlgmr.msra.gmra.mxu1 %vm5071_vm6, %v6344_v37  ;;  %11991 = vmatprep.subr.mxu1 %v13535_v49 }
0x18df   :  { %11995 = vmatprep.mubr.msk.f32.mxu1 %vm13536_vm2, %v13535_v49 }
0x199e   :  { %v11983_v40 = vpop.f32.mrf.mxu1 }
0x199f   :  { %v6427_v41 = vadd.f32 %v11983_v40, %v6261_v26 }
0x19a0   :  { %v6417_v42 = vpop.f32.mrf.mxu1 }
0x19a1   :  { %v6426_v44 = vadd.f32 %v6417_v42, %v6256_v25  ;;  %11985 = vmatpush3.msra.mxu0 %v6427_v41  ;;  %v7090_v25 = vld [vmem:[#allocation36 + $0x8] sm:$0xff] }
0x19a2   :  { %11986 = vmatprep.subr.mxu0 %v13535_v49 }
0x19a3   :  { %11987 = vmatpush3.msra.mxu0 %v6426_v44 }
0x19a4   :  { %11989 = vmatmul.mubr.msk.f32.vlgmr.msra.gmra.mxu0 %vm5071_vm6, %v13540_v1  ;;  %11998 = vmatprep.subr.mxu0 %v6606_v50 }
0x19a5   :  { %11999 = vmatpush3.msra.mxu0 %v6606_v50 }
0x19a6   :  { %12000 = vmatprep.subr.mxu0 %v6605_v10 }
0x19a7   :  { %12001 = vmatpush3.msra.mxu0 %v6605_v10 }
0x19a8   :  { %12012 = vmatprep.subr.mxu0 %v13535_v49 }
0x1a64   :  { %v6494_v47 = vpop.f32.mrf.mxu0 }
0x1a65   :  { %v6501_v51 = vrot.slane %v6494_v47, %v14452_v63 }
0x1a66   :  { %v11990_v15 = vpop.f32.mrf.mxu0 }
0x1a67   :  { %v6502_v5 = vsub.f32 %v6426_v44, %v6501_v51  ;;  %v6503_v16 = vsub.f32 %v6427_v41, %v6501_v51  ;;  %v7239_v41 = vld [vmem:[#allocation45 + $0x28] sm:$0xff]  ;;  %v7238_v44 = vld [vmem:[#allocation45 + $0x20] sm:$0xff] }
0x1a69   :  { %v6505_v4 = vmul.f32 %v6503_v16, %v6503_v16  ;;  %v6504_v48 = vmul.f32 %v6502_v5, %v6502_v5 }
0x1a6b   :  { %11992 = vmatpush3.msra.mxu1 %v6505_v4  ;;  %v7316_v4 = vld [vmem:[#allocation36 + $0x10] sm:$0xff] }
0x1a6c   :  { %11993 = vmatprep.subr.mxu1 %v13535_v49 }
0x1a6d   :  { %11994 = vmatpush3.msra.mxu1 %v6504_v48 }
0x1a6e   :  { %11996 = vmatmul.mubr.msk.f32.vlgmr.msra.gmra.mxu1 %vm5071_vm6, %v13540_v1  ;;  %12005 = vmatprep.subr.mxu1 %v13535_v49  ;;  %v12447_v1 = vpop.eup %12446 }
0x1a6f   :  { %12009 = vmatprep.mubr.msk.f32.mxu1 %vm13536_vm2, %v13535_v49  ;;  %v5227_v45 = vrot.slane %v12447_v1, %v14452_v63 }
0x1a71   :  { %v5228_v14 = vmul.f32 %v5227_v45, %v14696_v23  ;;  %v5229_v56 = vmul.f32 %v5227_v45, %v14698_v2 }
0x1a73   :  { %v5237_v62 = vmul.f32 %v10273_v54, %v5228_v14  ;;  %v5238_v52 = vmul.f32 %v10273_v54, %v5229_v56  ;;  %v7563_v56 = vld [vmem:[#allocation46 + $0x18] sm:$0xff]  ;;  %v7562_v54 = vld [vmem:[#allocation46 + $0x10] sm:$0xff] }
0x1a75   :  { %v5246_v59 = vadd.f32 %v10274_v20, %v5237_v62  ;;  %v5247_v60 = vadd.f32 %v10274_v20, %v5238_v52  ;;  %v7640_v62 = vld [vmem:[#allocation46 + $0x28] sm:$0xff]  ;;  %v7560_v52 = vld [vmem:[#allocation46] sm:$0xff] }
0x1b2e   :  { %v6572_v9 = vpop.f32.mrf.mxu1 }
0x1b2f   :  { %v6573_v46 = vadd.f32 1e-05, %v6572_v9 }
0x1b30   :  { %v11997_v55 = vpop.f32.mrf.mxu1 }
0x1b31   :  { %12448 = vrsqrt.f32 %v6573_v46 }
0x1b3e   :  { %v12449_v6 = vpop.eup %12448 }
0x1b3f   :  { %v6580_v57 = vrot.slane %v12449_v6, %v14452_v63  ;;  %v7642_v6 = vld [vmem:[#allocation46 + $0x38] sm:$0xff] }
0x1b41   :  { %v6581_v30 = vmul.f32 %v6580_v57, %v6502_v5  ;;  %v6582_v19 = vmul.f32 %v6580_v57, %v6503_v16  ;;  %v7641_v57 = vld [vmem:[#allocation46 + $0x30] sm:$0xff] }
0x1b43   :  { %v6590_v43 = vmul.f32 %v10311_v58, %v6581_v30  ;;  %v6591_v53 = vmul.f32 %v10311_v58, %v6582_v19  ;;  %v7561_v58 = vld [vmem:[#allocation46 + $0x8] sm:$0xff]  ;;  %v7639_v30 = vld [vmem:[#allocation46 + $0x20] sm:$0xff] }
0x1b45   :  { %v6599_v0 = vadd.f32 %v10312_v61, %v6590_v43  ;;  %v6600_v18 = vadd.f32 %v10312_v61, %v6591_v53 }
0x1b47   :  { %v6601_v23 = vadd.f32 %v6599_v0, %v5246_v59  ;;  %v6602_v21 = vadd.f32 %v6600_v18, %v5247_v60  ;;  %v10331_v59 = vld [vmem:[#allocation39] ss:$0 sm:$0xff]  ;;  %v10332_v0 = vld [vmem:[#allocation31] ss:$0 sm:$0xff] }
0x1b49   :  { %v14779_v2 = vmax.f32 %v6601_v23, 0.0  ;;  %v14781_v22 = vmax.f32 %v6602_v21, 0.0 }
0x1b4b   :  { %12002 = vmatprep.mubr.msk.f32.mxu0 %vm5071_vm6, %v14779_v2 }
0x1b4c   :  { %12003 = vmatmul.mubr.msk.f32.vlgmr.msra.gmra.mxu0 %vm5071_vm6, %v14781_v22 }
0x1b4d   :  { %12014 = vmatprep.mubr.msk.f32.mxu0 %vm13536_vm2, %v13535_v49 }
0x1c0c   :  { %v12004_v3 = vpop.f32.mrf.mxu0 }
0x1c0d   :  { %12006 = vmatpush3.msra.mxu1 %v12004_v3 }
0x1c0e   :  { %v6679_v8 = vpop.f32.mrf.mxu0  ;;  %12007 = vmatprep.subr.mxu1 %v13535_v49 }
0x1c0f   :  { %12008 = vmatpush3.msra.mxu1 %v6679_v8  ;;  %v7637_v8 = vld [vmem:[#allocation37] sm:$0xff] }
0x1c10   :  { %12010 = vmatmul.mubr.msk.f32.vlgmr.msra.gmra.mxu1 %vm5071_vm6, %v6688_v7  ;;  %12017 = vmatprep.subr.mxu1 %v13535_v49  ;;  %v7865_v7 = vld [vmem:[#allocation46 + $0x58] sm:$0xff] }
0x1c11   :  { %12019 = vmatprep.mubr.msk.f32.mxu1 %vm13536_vm2, %v13535_v49 }
0x1cd0   :  { %v6758_v13 = vpop.f32.mrf.mxu1 }
0x1cd1   :  { %12013 = vmatpush3.msra.mxu0 %v6758_v13 }
0x1cd2   :  { %12015 = vmatmul.mubr.msk.f32.vlgmr.msra.gmra.mxu0 %vm3346_vm4, %v13541_v24  ;;  %12022 = vmatprep.subr.mxu0 %v6934_v12  ;;  %v12011_v27 = vpop.f32.mrf.mxu1 }
0x1cd3   :  { %12023 = vmatpush3.msra.mxu0 %v6934_v12  ;;  %12026 = vmatprep.mubr.msk.f32.mxu0 %vm5071_vm6, %v14779_v2  ;;  %v7863_v27 = vld [vmem:[#allocation46 + $0x48] sm:$0xff] }
0x1cd4   :  { %12024 = vmatprep.subr.mxu0 %v6933_v17 }
0x1cd5   :  { %12025 = vmatpush3.msra.mxu0 %v6933_v17  ;;  %v7864_v17 = vld [vmem:[#allocation46 + $0x50] sm:$0xff] }
0x1cd6   :  { %12027 = vmatmul.mubr.msk.f32.vlgmr.msra.gmra.mxu0 %vm5071_vm6, %v14781_v22  ;;  %12036 = vmatprep.subr.mxu0 %v13535_v49 }
0x1cd7   :  { %12040 = vmatprep.mubr.msk.f32.mxu0 %vm13536_vm2, %v13535_v49 }
0x1d92   :  { %v6831_v28 = vpop.f32.mrf.mxu0 }
0x1d93   :  { %v6838_v29 = vrot.slane %v6831_v28, %v14452_v63  ;;  %v7862_v28 = vld [vmem:[#allocation46 + $0x40] sm:$0xff] }
0x1d94   :  { %v12016_v31 = vpop.f32.mrf.mxu0 }
0x1d95   :  { %v14804_v32 = vsub.f32 %v6758_v13, %v6838_v29 }
0x1d96   :  { %v12028_v36 = vpop.f32.mrf.mxu0 }
0x1d97   :  { %v6840_v33 = vmul.f32 %v14804_v32, %v14804_v32 }
0x1d98   :  { %v7001_v37 = vpop.f32.mrf.mxu0 }
0x1d99   :  { %12018 = vmatpush3.msra.mxu1 %v6840_v33 }
0x1d9a   :  { %12020 = vmatmul.mubr.msk.f32.vlgmr.msra.gmra.mxu1 %vm3346_vm4, %v13541_v24  ;;  %12029 = vmatprep.subr.mxu1 %v7013_v34 }
0x1d9b   :  { %12030 = vmatpush3.msra.mxu1 %v7013_v34  ;;  %12033 = vmatprep.mubr.msk.f32.mxu1 %vm5071_vm6, %v14779_v2 }
0x1d9c   :  { %12031 = vmatprep.subr.mxu1 %v7012_v35 }
0x1d9d   :  { %12032 = vmatpush3.msra.mxu1 %v7012_v35 }
0x1d9e   :  { %12034 = vmatmul.mubr.msk.f32.vlgmr.msra.gmra.mxu1 %vm5071_vm6, %v14781_v22  ;;  %12043 = vmatprep.subr.mxu1 %v13535_v49 }
0x1d9f   :  { %12044 = vmatpush3.msra.mxu1 %v12028_v36  ;;  %12047 = vmatprep.mubr.msk.f32.mxu1 %vm13536_vm2, %v13535_v49  ;;  %v7937_v36 = vld [vmem:[#allocation37 + $0x10] sm:$0xff] }
0x1da0   :  { %12045 = vmatprep.subr.mxu1 %v13535_v49 }
0x1da1   :  { %12046 = vmatpush3.msra.mxu1 %v7001_v37 }
0x1da2   :  { %12057 = vmatprep.subr.mxu1 %v13535_v49  ;;  %12048 = vmatmul.mubr.msk.f32.vlgmr.msra.gmra.mxu1 %vm5071_vm6, %v7010_v38 }
0x1da3   :  { %12061 = vmatprep.mubr.msk.f32.mxu1 %vm13536_vm2, %v13535_v49 }
0x1e5a   :  { %v14822_v39 = vpop.f32.mrf.mxu1 }
0x1e5c   :  { %v12021_v26 = vpop.f32.mrf.mxu1 }
0x1e5e   :  { %v12035_v40 = vpop.f32.mrf.mxu1 }
0x1e5f   :  { %12037 = vmatpush3.msra.mxu0 %v12035_v40 }
0x1e60   :  { %v7080_v42 = vpop.f32.mrf.mxu1  ;;  %12038 = vmatprep.subr.mxu0 %v13535_v49 }
0x1e61   :  { %12039 = vmatpush3.msra.mxu0 %v7080_v42 }
0x1e62   :  { %12041 = vmatmul.mubr.msk.f32.vlgmr.msra.gmra.mxu0 %vm5071_vm6, %v7090_v25  ;;  %12050 = vmatprep.subr.mxu0 %v7239_v41  ;;  %v7233_v47 = vpop.f32.mrf.mxu1 }
0x1e63   :  { %12051 = vmatpush3.msra.mxu0 %v7239_v41  ;;  %12054 = vmatprep.mubr.msk.f32.mxu0 %vm5071_vm6, %v14779_v2  ;;  %v7714_v2 = vld [vmem:[#allocation37 + $0x8] sm:$0xff] }
0x1e64   :  { %12052 = vmatprep.subr.mxu0 %v7238_v44  ;;  %v12049_v51 = vpop.f32.mrf.mxu1 }
0x1e65   :  { %12053 = vmatpush3.msra.mxu0 %v7238_v44 }
0x1e66   :  { %12055 = vmatmul.mubr.msk.f32.vlgmr.msra.gmra.mxu0 %vm5071_vm6, %v14781_v22  ;;  %12064 = vmatprep.subr.mxu0 %v13535_v49 }
0x1e67   :  { %12066 = vmatprep.mubr.msk.f32.mxu0 %vm13536_vm2, %v13535_v49 }
0x1f22   :  { %v7160_v15 = vpop.f32.mrf.mxu0 }
0x1f23   :  { %v7234_v50 = vadd.f32 %v7233_v47, %v7160_v15  ;;  %v8185_v15 = vld [vmem:[#allocation64 + $0x18] sm:$0xff] }
0x1f24   :  { %v12042_v5 = vpop.f32.mrf.mxu0 }
0x1f25   :  { %v8184_v5 = vld [vmem:[#allocation64 + $0x10] sm:$0xff] }
0x1f26   :  { %v12056_v16 = vpop.f32.mrf.mxu0 }
0x1f27   :  { %12058 = vmatpush3.msra.mxu1 %v12056_v16  ;;  %v8183_v16 = vld [vmem:[#allocation64 + $0x8] sm:$0xff] }
0x1f28   :  { %v7306_v48 = vpop.f32.mrf.mxu0  ;;  %12059 = vmatprep.subr.mxu1 %v13535_v49 }
0x1f29   :  { %12060 = vmatpush3.msra.mxu1 %v7306_v48 }
0x1f2a   :  { %12062 = vmatmul.mubr.msk.f32.vlgmr.msra.gmra.mxu1 %vm5071_vm6, %v7316_v4  ;;  %12069 = vmatprep.subr.mxu1 %v13535_v49  ;;  %v8182_v4 = vld [vmem:[#allocation64] sm:$0xff] }
0x1f2b   :  { %12071 = vmatprep.mubr.msk.f32.mxu1 %vm13536_vm2, %v13535_v49 }
0x1fea   :  { %v7386_v10 = vpop.f32.mrf.mxu1 }
0x1feb   :  { %v7390_v11 = vadd.f32 %v7386_v10, %v7234_v50 }
0x1fec   :  { %v12063_v9 = vpop.f32.mrf.mxu1 }
0x1fed   :  { %12065 = vmatpush3.msra.mxu0 %v7390_v11 }
0x1fee   :  { %12067 = vmatmul.mubr.msk.f32.vlgmr.msra.gmra.mxu0 %vm3346_vm4, %v13541_v24  ;;  %12074 = vmatprep.subr.mxu0 %v13535_v49 }
0x1fef   :  { %12082 = vmatprep.mubr.msk.f32.mxu0 %vm13536_vm2, %v13535_v49  ;;  %12075 = vmatpush3.msra.mxu0 %v7563_v56 }
0x1ff0   :  { %12076 = vmatprep.subr.mxu0 %v13535_v49 }
0x1ff1   :  { %12077 = vmatpush3.msra.mxu0 %v7562_v54  ;;  %v10319_v54 = vld [vmem:[#allocation34] ss:$0 sm:$0xff] }
0x1ff2   :  { %12078 = vmatprep.subr.mxu0 %v13535_v49 }
0x1ff3   :  { %12079 = vmatpush3.msra.mxu0 %v7561_v58 }
0x1ff4   :  { %12080 = vmatprep.subr.mxu0 %v13535_v49 }
0x1ff5   :  { %12081 = vmatpush3.msra.mxu0 %v7560_v52 }
0x1ff6   :  { %12096 = vmatprep.subr.mxu0 %v13535_v49 }
0x20ae   :  { %v7457_v46 = vpop.f32.mrf.mxu0 }
0x20af   :  { %v7464_v55 = vrot.slane %v7457_v46, %v14452_v63 }
0x20b0   :  { %v12068_v1 = vpop.f32.mrf.mxu0 }
0x20b1   :  { %v7465_v45 = vsub.f32 %v7390_v11, %v7464_v55  ;;  %v10318_v1 = vld [vmem:[#allocation42] ss:$0 sm:$0xff] }
0x20b3   :  { %v7466_v14 = vmul.f32 %v7465_v45, %v7465_v45 }
0x20b5   :  { %12070 = vmatpush3.msra.mxu1 %v7466_v14  ;;  %v10341_v14 = vld [vmem:[#allocation40] ss:$0 sm:$0xff] }
0x20b6   :  { %12072 = vmatmul.mubr.msk.f32.vlgmr.msra.gmra.mxu1 %vm3346_vm4, %v13541_v24  ;;  %12085 = vmatprep.subr.mxu1 %v13535_v49 }
0x20b7   :  { %12093 = vmatprep.mubr.msk.f32.mxu1 %vm13536_vm2, %v13535_v49  ;;  %12086 = vmatpush3.msra.mxu1 %v7642_v6 }
0x20b8   :  { %12087 = vmatprep.subr.mxu1 %v13535_v49 }
0x20b9   :  { %12088 = vmatpush3.msra.mxu1 %v7641_v57  ;;  %v10342_v57 = vld [vmem:[#allocation33] ss:$0 sm:$0xff] }
0x20ba   :  { %12089 = vmatprep.subr.mxu1 %v13535_v49 }
0x20bb   :  { %12090 = vmatpush3.msra.mxu1 %v7640_v62 }
0x20bc   :  { %12091 = vmatprep.subr.mxu1 %v13535_v49 }
0x20bd   :  { %12092 = vmatpush3.msra.mxu1 %v7639_v30 }
0x20be   :  { %12101 = vmatprep.subr.mxu1 %v13535_v49 }
0x2176   :  { %v7533_v19 = vpop.f32.mrf.mxu1 }
0x2177   :  { %v7534_v20 = vadd.f32 1e-05, %v7533_v19 }
0x2178   :  { %v12073_v61 = vpop.f32.mrf.mxu1 }
0x2179   :  { %12450 = vrsqrt.f32 %v7534_v20 }
0x2186   :  { %v12451_v43 = vpop.eup %12450 }
0x2187   :  { %v7541_v53 = vrot.slane %v12451_v43, %v14452_v63  ;;  %v8515_v43 = vld [vmem:[#allocation63 + $0x18] sm:$0xff] }
0x2189   :  { %v7542_v60 = vmul.f32 %v7541_v53, %v7465_v45  ;;  %v13542_v53 = vmov 0.25  }
0x218b   :  { %v7550_v18 = vmul.f32 %v10331_v59, %v7542_v60  ;;  %v8514_v59 = vld [vmem:[#allocation63 + $0x10] sm:$0xff] }
0x218d   :  { %v7558_v23 = vadd.f32 %v10332_v0, %v7550_v18  ;;  %v8513_v0 = vld [vmem:[#allocation63 + $0x8] sm:$0xff]  ;;  %v8512_v18 = vld [vmem:[#allocation63] sm:$0xff] }
0x218f   :  { %v7559_v21 = vmax.f32 %v7558_v23, 0.0 }
0x2191   :  { %12083 = vmatmul.mubr.msk.f32.vlgmr.msra.gmra.mxu0 %vm3540_vm5, %v7559_v21  ;;  %12094 = vmatmul.mubr.msk.f32.vlgmr.msra.gmra.mxu1 %vm3540_vm5, %v7559_v21 }
0x2192   :  { %12098 = vmatprep.mubr.msk.f32.mxu0 %vm13536_vm2, %v13535_v49  ;;  %12103 = vmatprep.mubr.msk.f32.mxu1 %vm13536_vm2, %v13535_v49 }
0x2251   :  { %v7633_v22 = vpop.f32.mrf.mxu0  ;;  %v7709_v3 = vpop.f32.mrf.mxu1 }
0x2252   :  { %12097 = vmatpush3.msra.mxu0 %v7709_v3  ;;  %12102 = vmatpush3.msra.mxu1 %v7633_v22 }
0x2253   :  { %v12084_v12 = vpop.f32.mrf.mxu0  ;;  %v12095_v13 = vpop.f32.mrf.mxu1  ;;  %12106 = vmatprep.subr.mxu0 %v13535_v49  ;;  %12099 = vmatmul.mubr.msk.f32.vlgmr.msra.gmra.mxu0 %vm3346_vm4, %v7714_v2 }
0x2254   :  { %12107 = vmatpush3.msra.mxu0 %v7865_v7  ;;  %12114 = vmatprep.mubr.msk.f32.mxu0 %vm13536_vm2, %v13535_v49  ;;  %v8591_v7 = vld [vmem:[#allocation63 + $0x38] sm:$0xff]  ;;  %v8590_v12 = vld [vmem:[#allocation63 + $0x30] sm:$0xff] }
0x2255   :  { %12108 = vmatprep.subr.mxu0 %v13535_v49  ;;  %12104 = vmatmul.mubr.msk.f32.vlgmr.msra.gmra.mxu1 %vm3346_vm4, %v7637_v8 }
0x2256   :  { %12109 = vmatpush3.msra.mxu0 %v7864_v17  ;;  %12117 = vmatprep.subr.mxu1 %v13535_v49  ;;  %v8589_v17 = vld [vmem:[#allocation63 + $0x28] sm:$0xff] }
0x2257   :  { %12110 = vmatprep.subr.mxu0 %v13535_v49  ;;  %12119 = vmatprep.mubr.msk.f32.mxu1 %vm13536_vm2, %v13535_v49 }
0x2258   :  { %12111 = vmatpush3.msra.mxu0 %v7863_v27  ;;  %v8588_v27 = vld [vmem:[#allocation63 + $0x20] sm:$0xff] }
0x2259   :  { %12112 = vmatprep.subr.mxu0 %v13535_v49 }
0x225a   :  { %12113 = vmatpush3.msra.mxu0 %v7862_v28  ;;  %v8586_v28 = vld [vmem:[#allocation54] sm:$0xf] }
0x225b   :  { %12115 = vmatmul.mubr.msk.f32.vlgmr.msra.gmra.mxu0 %vm3540_vm5, %v7559_v21  ;;  %12127 = vmatprep.subr.mxu0 %v13535_v49 }
0x225c   :  { %12129 = vmatprep.mubr.msk.f32.mxu0 %vm13536_vm2, %v13535_v49 }
0x2313   :  { %v7784_v29 = vpop.f32.mrf.mxu0 }
0x2315   :  { %v12100_v31 = vpop.f32.mrf.mxu0  ;;  %v7857_v33 = vpop.f32.mrf.mxu1 }
0x2316   :  { %v7858_v34 = vadd.f32 %v7857_v33, %v7784_v29  ;;  %v8663_v33 = vld [vmem:[#allocation54 + $0x4] sm:$0xf] }
0x2317   :  { %v12105_v35 = vpop.f32.mrf.mxu1 }
0x2318   :  { %v8814_v35 = vld [vmem:[#allocation63 + $0x58] sm:$0xff] }
0x231b   :  { %v7932_v37 = vpop.f32.mrf.mxu0 }
0x231c   :  { %12118 = vmatpush3.msra.mxu1 %v7932_v37  ;;  %v8813_v37 = vld [vmem:[#allocation63 + $0x50] sm:$0xff] }
0x231d   :  { %v12116_v38 = vpop.f32.mrf.mxu0  ;;  %12120 = vmatmul.mubr.msk.f32.vlgmr.msra.gmra.mxu1 %vm3346_vm4, %v7937_v36  ;;  %12122 = vmatprep.subr.mxu1 %v13535_v49 }
0x231e   :  { %12124 = vmatprep.mubr.msk.f32.mxu1 %vm13536_vm2, %v13535_v49  ;;  %v8812_v38 = vld [vmem:[#allocation63 + $0x48] sm:$0xff] }
0x23dd   :  { %v8007_v26 = vpop.f32.mrf.mxu1 }
0x23de   :  { %v8011_v40 = vadd.f32 %v8007_v26, %v7858_v34  ;;  %v8811_v26 = vld [vmem:[#allocation63 + $0x40] sm:$0xff] }
0x23df   :  { %v12121_v25 = vpop.f32.mrf.mxu1 }
0x23e0   :  { %12123 = vmatpush3.msra.mxu1 %v8011_v40 }
0x23e1   :  { %12125 = vmatmul.mubr.msk.f32.vlgmr.msra.gmra.mxu1 %vm3346_vm4, %v13541_v24  ;;  %12132 = vmatprep.subr.mxu1 %v13535_v49 }
0x23e2   :  { %12140 = vmatprep.mubr.msk.f32.mxu1 %vm13536_vm2, %v13535_v49  ;;  %12133 = vmatpush3.msra.mxu1 %v8185_v15 }
0x23e3   :  { %12134 = vmatprep.subr.mxu1 %v13535_v49 }
0x23e4   :  { %12135 = vmatpush3.msra.mxu1 %v8184_v5 }
0x23e5   :  { %12136 = vmatprep.subr.mxu1 %v13535_v49 }
0x23e6   :  { %12137 = vmatpush3.msra.mxu1 %v8183_v16 }
0x23e7   :  { %12138 = vmatprep.subr.mxu1 %v13535_v49 }
0x23e8   :  { %12139 = vmatpush3.msra.mxu1 %v8182_v4 }
0x23e9   :  { %12153 = vmatprep.subr.mxu1 %v13535_v49 }
0x24a1   :  { %v8078_v41 = vpop.f32.mrf.mxu1 }
0x24a2   :  { %v8085_v42 = vrot.slane %v8078_v41, %v14452_v63 }
0x24a3   :  { %v12126_v44 = vpop.f32.mrf.mxu1 }
0x24a4   :  { %v8086_v47 = vsub.f32 %v8011_v40, %v8085_v42  ;;  %v8886_v44 = vld [vmem:[#allocation54 + $0x8] sm:$0xf] }
0x24a6   :  { %v8087_v51 = vmul.f32 %v8086_v47, %v8086_v47 }
0x24a8   :  { %12128 = vmatpush3.msra.mxu0 %v8087_v51 }
0x24a9   :  { %12130 = vmatmul.mubr.msk.f32.vlgmr.msra.gmra.mxu0 %vm3346_vm4, %v13541_v24  ;;  %12143 = vmatprep.subr.mxu0 %v13535_v49  ;;  %v6908_v24 = vadd.f32 1e-05, %v14822_v39 }
0x24aa   :  { %12145 = vmatprep.mubr.msk.f32.mxu0 %vm13536_vm2, %v13535_v49 }
0x24ab   :  { %12452 = vrsqrt.f32 %v6908_v24 }
0x24b8   :  { %v12453_v11 = vpop.eup %12452 }
0x24b9   :  { %v6915_v9 = vrot.slane %v12453_v11, %v14452_v63 }
0x24bb   :  { %v6916_v46 = vmul.f32 %v6915_v9, %v14804_v32  ;;  %v8259_v32 = vld [vmem:[#allocation61] sm:$0xf]  ;;  %v9143_v9 = vld [vmem:[%s15171_s22 + $0x38] sm:$0xff] }
0x24bd   :  { %v6924_v56 = vmul.f32 %v10318_v1, %v6916_v46  ;;  %v10371_v46 = vld [vmem:[%s15171_s22 + $0x78] sm:$0xff]  ;;  %v10370_v1 = vld [vmem:[%s15171_s22 + $0x70] sm:$0xff] }
0x24bf   :  { %v6932_v58 = vadd.f32 %v10319_v54, %v6924_v56  ;;  %v9140_v56 = vld [vmem:[%s15171_s22 + $0x20] sm:$0xff]  ;;  %v9139_v54 = vld [vmem:[%s15171_s22 + $0x18] sm:$0xff] }
0x2569   :  { %v8154_v48 = vpop.f32.mrf.mxu0 }
0x256a   :  { %v8155_v50 = vadd.f32 1e-05, %v8154_v48 }
0x256b   :  { %v12131_v10 = vpop.f32.mrf.mxu0 }
0x256c   :  { %12454 = vrsqrt.f32 %v8155_v50 }
0x2579   :  { %v12455_v55 = vpop.eup %12454 }
0x257a   :  { %v8162_v45 = vrot.slane %v12455_v55, %v14452_v63  ;;  %v9142_v55 = vld [vmem:[%s15171_s22 + $0x30] sm:$0xff] }
0x257c   :  { %v8163_v6 = vmul.f32 %v8162_v45, %v8086_v47  ;;  %v9141_v45 = vld [vmem:[%s15171_s22 + $0x28] sm:$0xff] }
0x257e   :  { %v8171_v39 = vmul.f32 %v10341_v14, %v8163_v6  ;;  %v10369_v14 = vld [vmem:[%s15171_s22 + $0x68] sm:$0xff]  ;;  %v10368_v6 = vld [vmem:[%s15171_s22 + $0x60] sm:$0xff] }
0x2580   :  { %v8179_v62 = vadd.f32 %v10342_v57, %v8171_v39  ;;  %v10367_v57 = vld [vmem:[%s15171_s22 + $0x58] sm:$0xff]  ;;  %v9138_v39 = vld [vmem:[%s15171_s22 + $0x10] sm:$0xff] }
0x2582   :  { %v8180_v52 = vadd.f32 %v8179_v62, %v6932_v58  ;;  %v10366_v58 = vld [vmem:[%s15171_s22 + $0x50] sm:$0xff]  ;;  %v9137_v62 = vld [vmem:[%s15171_s22 + $0x8] sm:$0xff] }
0x2584   :  { %v14902_v30 = vmax.f32 %v8180_v52, 0.0  ;;  %v10365_v52 = vld [vmem:[%s15171_s22 + $0x48] sm:$0xff] }
0x2586   :  { %12141 = vmatmul.mubr.msk.f32.vlgmr.msra.gmra.mxu1 %vm3540_vm5, %v14902_v30 }
0x2587   :  { %12155 = vmatprep.mubr.msk.f32.mxu1 %vm13536_vm2, %v13535_v49 }
0x2646   :  { %v8255_v19 = vpop.f32.mrf.mxu1 }
0x2647   :  { %12144 = vmatpush3.msra.mxu0 %v8255_v19 }
0x2648   :  { %v12142_v20 = vpop.f32.mrf.mxu1  ;;  %12146 = vmatmul.mubr.msk.f32.vlgmr.msra.gmra.mxu0 %vm3346_vm4, %v8259_v32  ;;  %12148 = vmatprep.subr.mxu0 %v13535_v49  ;;  %v10364_v32 = vld [vmem:[%s15171_s22 + $0x40] sm:$0xff] }
0x2649   :  { %12150 = vmatprep.mubr.msk.f32.mxu0 %vm13536_vm2, %v13535_v49 }
0x2708   :  { %v8329_v61 = vpop.f32.mrf.mxu0 }
0x2709   :  { %12149 = vmatpush3.msk.msra.mxu0 %vm8337_vm7, %v8329_v61 }
0x270a   :  { %12151 = vmatmul.mubr.msk.f32.vlgmr.msra.gmra.mxu0 %vm8333_vm8, %v13542_v53  ;;  %12158 = vmatprep.subr.mxu0 %v13535_v49  ;;  %v12147_v60 = vpop.f32.mrf.mxu0 }
0x270b   :  { %12159 = vmatpush3.msra.mxu0 %v8515_v43  ;;  %12166 = vmatprep.mubr.msk.f32.mxu0 %vm13536_vm2, %v13535_v49  ;;  %v10361_v60 = vld [vmem:[#allocation57] ss:$0 sm:$0xff] }
0x270c   :  { %12160 = vmatprep.subr.mxu0 %v13535_v49 }
0x270d   :  { %12161 = vmatpush3.msra.mxu0 %v8514_v59 }
0x270e   :  { %12162 = vmatprep.subr.mxu0 %v13535_v49 }
0x270f   :  { %12163 = vmatpush3.msra.mxu0 %v8513_v0 }
0x2710   :  { %12164 = vmatprep.subr.mxu0 %v13535_v49 }
0x2711   :  { %12165 = vmatpush3.msra.mxu0 %v8512_v18  ;;  %v10362_v18 = vld [vmem:[#allocation49] ss:$0 sm:$0xff] }
0x2712   :  { %12167 = vmatmul.mubr.msk.f32.vlgmr.msra.gmra.mxu0 %vm3540_vm5, %v14902_v30  ;;  %12180 = vmatprep.subr.mxu0 %v13535_v49 }
0x2713   :  { %12182 = vmatprep.mubr.msk.f32.mxu0 %vm13536_vm2, %v13535_v49 }
0x27ca   :  { %v8407_v23 = vpop.f32.mrf.mxu0 }
0x27cb   :  { %v8414_v21 = vrot.slane %v8407_v23, %v14452_v63 }
0x27cc   :  { %v12152_v2 = vpop.f32.mrf.mxu0 }
0x27cd   :  { %v14927_v22 = vsub.f32 %v8329_v61, %v8414_v21 }
0x27cf   :  { %v8416_v3 = vmul.f32 %v14927_v22, %v14927_v22 }
0x27d1   :  { %12154 = vmatpush3.msk.msra.mxu1 %vm8337_vm7, %v8416_v3  ;;  %v9298_v3 = vld [vmem:[#allocation55 + $0x4] sm:$0xf] }
0x27d2   :  { %12156 = vmatmul.mubr.msk.f32.vlgmr.msra.gmra.mxu1 %vm8333_vm8, %v13542_v53  ;;  %v8582_v8 = vpop.f32.mrf.mxu0  ;;  %12169 = vmatprep.subr.mxu1 %v13535_v49 }
0x27d3   :  { %12170 = vmatpush3.msra.mxu1 %v8591_v7  ;;  %12177 = vmatprep.mubr.msk.f32.mxu1 %vm13536_vm2, %v13535_v49 }
0x27d4   :  { %v12168_v13 = vpop.f32.mrf.mxu0  ;;  %12171 = vmatprep.subr.mxu1 %v13535_v49 }
0x27d5   :  { %12172 = vmatpush3.msra.mxu1 %v8590_v12  ;;  %v10384_v12 = vld [vmem:[%s15171_s22 + $0xb8] sm:$0xff] }
0x27d6   :  { %12173 = vmatprep.subr.mxu1 %v13535_v49  ;;  %v9217_v13 = vld [vmem:[#allocation55] sm:$0xf] }
0x27d7   :  { %12174 = vmatpush3.msra.mxu1 %v8589_v17 }
0x27d8   :  { %12175 = vmatprep.subr.mxu1 %v13535_v49 }
0x27d9   :  { %12176 = vmatpush3.msra.mxu1 %v8588_v27 }
0x27da   :  { %12178 = vmatmul.mubr.msk.f32.vlgmr.msra.gmra.mxu1 %vm3540_vm5, %v14902_v30  ;;  %12185 = vmatprep.subr.mxu1 %v13535_v49 }
0x27db   :  { %12186 = vmatpush3.msra.mxu1 %v8582_v8  ;;  %12187 = vmatprep.mubr.msk.f32.mxu1 %vm13536_vm2, %v13535_v49 }
0x27dc   :  { %12201 = vmatprep.subr.mxu1 %v13535_v49 }
0x27de   :  { %12188 = vmatmul.mubr.msk.f32.vlgmr.msra.gmra.mxu1 %vm3346_vm4, %v8586_v28  ;;  %v10383_v28 = vld [vmem:[%s15171_s22 + $0xb0] sm:$0xff] }
0x27df   :  { %12203 = vmatprep.mubr.msk.f32.mxu1 %vm13536_vm2, %v13535_v49 }
0x2892   :  { %v14949_v29 = vpop.f32.mrf.mxu1 }
0x2894   :  { %v12157_v31 = vpop.f32.mrf.mxu1 }
0x2895   :  { %v10382_v31 = vld [vmem:[%s15171_s22 + $0xa8] sm:$0xff] }
0x289a   :  { %v8658_v34 = vpop.f32.mrf.mxu1 }
0x289b   :  { %12181 = vmatpush3.msra.mxu0 %v8658_v34  ;;  %v10380_v34 = vld [vmem:[%s15171_s22 + $0x98] sm:$0xff] }
0x289c   :  { %v12179_v36 = vpop.f32.mrf.mxu1  ;;  %12190 = vmatprep.subr.mxu0 %v13535_v49  ;;  %12183 = vmatmul.mubr.msk.f32.vlgmr.msra.gmra.mxu0 %vm3346_vm4, %v8663_v33  ;;  %v10381_v33 = vld [vmem:[%s15171_s22 + $0xa0] sm:$0xff] }
0x289d   :  { %12191 = vmatpush3.msra.mxu0 %v8814_v35  ;;  %12198 = vmatprep.mubr.msk.f32.mxu0 %vm13536_vm2, %v13535_v49  ;;  %v10379_v35 = vld [vmem:[%s15171_s22 + $0x90] sm:$0xff]  ;;  %v10378_v36 = vld [vmem:[%s15171_s22 + $0x88] sm:$0xff] }
0x289e   :  { %12192 = vmatprep.subr.mxu0 %v13535_v49  ;;  %v8806_v40 = vpop.f32.mrf.mxu1 }
0x289f   :  { %12193 = vmatpush3.msra.mxu0 %v8813_v37  ;;  %v10377_v37 = vld [vmem:[%s15171_s22 + $0x80] sm:$0xff] }
0x28a0   :  { %12194 = vmatprep.subr.mxu0 %v13535_v49  ;;  %v12189_v25 = vpop.f32.mrf.mxu1 }
0x28a1   :  { %12195 = vmatpush3.msra.mxu0 %v8812_v38 }
0x28a2   :  { %12196 = vmatprep.subr.mxu0 %v13535_v49 }
0x28a3   :  { %12197 = vmatpush3.msra.mxu0 %v8811_v26 }
0x28a4   :  { %12199 = vmatmul.mubr.msk.f32.vlgmr.msra.gmra.mxu0 %vm3540_vm5, %v14902_v30  ;;  %12211 = vmatprep.subr.mxu0 %v13535_v49  ;;  %v9136_v30 = vld [vmem:[%s15171_s22] sm:$0xff] }
0x28a5   :  { %12213 = vmatprep.mubr.msk.f32.mxu0 %vm13536_vm2, %v13535_v49 }
0x295c   :  { %v8733_v41 = vpop.f32.mrf.mxu0 }
0x295d   :  { %v8807_v15 = vadd.f32 %v8806_v40, %v8733_v41 }
0x295e   :  { %v12184_v42 = vpop.f32.mrf.mxu0 }
0x295f   :  { %v9531_v42 = vld [vmem:[#allocation55 + $0x8] sm:$0xf] }
0x2964   :  { %v8881_v47 = vpop.f32.mrf.mxu0 }
0x2965   :  { %12202 = vmatpush3.msra.mxu1 %v8881_v47 }
0x2966   :  { %v12200_v51 = vpop.f32.mrf.mxu0  ;;  %12204 = vmatmul.mubr.msk.f32.vlgmr.msra.gmra.mxu1 %vm3346_vm4, %v8886_v44  ;;  %12206 = vmatprep.subr.mxu1 %v13535_v49 }
0x2967   :  { %12208 = vmatprep.mubr.msk.f32.mxu1 %vm13536_vm2, %v13535_v49 }
0x2a26   :  { %v8956_v5 = vpop.f32.mrf.mxu1 }
0x2a27   :  { %v8960_v16 = vadd.f32 %v8956_v5, %v8807_v15 }
0x2a28   :  { %v12205_v4 = vpop.f32.mrf.mxu1 }
0x2a29   :  { %12207 = vmatpush3.msk.msra.mxu1 %vm8337_vm7, %v8960_v16 }
0x2a2a   :  { %12209 = vmatmul.mubr.msk.f32.vlgmr.msra.gmra.mxu1 %vm8333_vm8, %v13542_v53  ;;  %12216 = vmatprep.subr.mxu1 %v13535_v49 }
0x2a2b   :  { %12232 = vmatprep.mubr.msk.f32.mxu1 %vm13536_vm2, %v13535_v49  ;;  %12217 = vmatpush3.msra.mxu1 %v9143_v9  ;;  %v9867_v9 = vld [vmem:[%s15172_s8 + $0x28] sm:$0xff] }
0x2a2c   :  { %12218 = vmatprep.subr.mxu1 %v13535_v49 }
0x2a2d   :  { %12219 = vmatpush3.msra.mxu1 %v9142_v55  ;;  %v9864_v55 = vld [vmem:[%s15172_s8 + $0x10] sm:$0xff] }
0x2a2e   :  { %12220 = vmatprep.subr.mxu1 %v13535_v49 }
0x2a2f   :  { %12221 = vmatpush3.msra.mxu1 %v9141_v45  ;;  %v8487_v45 = vadd.f32 1e-05, %v14949_v29  ;;  %v10350_v29 = vld [vmem:[#allocation52] ss:$0 sm:$0xff] }
0x2a30   :  { %12222 = vmatprep.subr.mxu1 %v13535_v49 }
0x2a31   :  { %12223 = vmatpush3.msra.mxu1 %v9140_v56 }
0x2a32   :  { %12224 = vmatprep.subr.mxu1 %v13535_v49 }
0x2a33   :  { %12225 = vmatpush3.msra.mxu1 %v9139_v54 }
0x2a34   :  { %12226 = vmatprep.subr.mxu1 %v13535_v49 }
0x2a35   :  { %12227 = vmatpush3.msra.mxu1 %v9138_v39 }
0x2a36   :  { %12228 = vmatprep.subr.mxu1 %v13535_v49 }
0x2a37   :  { %12229 = vmatpush3.msra.mxu1 %v9137_v62  ;;  %v10349_v62 = vld [vmem:[#allocation60] ss:$0 sm:$0xff] }
0x2a38   :  { %12230 = vmatprep.subr.mxu1 %v13535_v49 }
0x2a39   :  { %12231 = vmatpush3.msra.mxu1 %v9136_v30  ;;  %v10392_v30 = vld [vmem:[#allocation58] ss:$0 sm:$0xff] }
0x2a3a   :  { %12254 = vmatprep.subr.mxu1 %v13535_v49 }
0x2aea   :  { %v9030_v24 = vpop.f32.mrf.mxu1 }
0x2aeb   :  { %v9037_v48 = vrot.slane %v9030_v24, %v14452_v63 }
0x2aec   :  { %v12210_v50 = vpop.f32.mrf.mxu1 }
0x2aed   :  { %v9038_v10 = vsub.f32 %v8960_v16, %v9037_v48 }
0x2aef   :  { %v9039_v11 = vmul.f32 %v9038_v10, %v9038_v10 }
0x2af1   :  { %12212 = vmatpush3.msk.msra.mxu0 %vm8337_vm7, %v9039_v11  ;;  %v9868_v11 = vld [vmem:[%s15172_s8 + $0x30] sm:$0xff] }
0x2af2   :  { %12214 = vmatmul.mubr.msk.f32.vlgmr.msra.gmra.mxu0 %vm8333_vm8, %v13542_v53  ;;  %12235 = vmatprep.subr.mxu0 %v13535_v49 }
0x2af3   :  { %12251 = vmatprep.mubr.msk.f32.mxu0 %vm13536_vm2, %v13535_v49  ;;  %12236 = vmatpush3.msra.mxu0 %v10371_v46  ;;  %v9866_v46 = vld [vmem:[%s15172_s8 + $0x20] sm:$0xff] }
0x2af4   :  { %12237 = vmatprep.subr.mxu0 %v13535_v49 }
0x2af5   :  { %12238 = vmatpush3.msra.mxu0 %v10370_v1  ;;  %v9863_v1 = vld [vmem:[%s15172_s8 + $0x8] sm:$0xff] }
0x2af6   :  { %12239 = vmatprep.subr.mxu0 %v13535_v49 }
0x2af7   :  { %12240 = vmatpush3.msra.mxu0 %v10369_v14 }
0x2af8   :  { %12241 = vmatprep.subr.mxu0 %v13535_v49 }
0x2af9   :  { %12242 = vmatpush3.msra.mxu0 %v10368_v6 }
0x2afa   :  { %12243 = vmatprep.subr.mxu0 %v13535_v49 }
0x2afb   :  { %12244 = vmatpush3.msra.mxu0 %v10367_v57 }
0x2afc   :  { %12245 = vmatprep.subr.mxu0 %v13535_v49 }
0x2afd   :  { %12246 = vmatpush3.msra.mxu0 %v10366_v58 }
0x2afe   :  { %12247 = vmatprep.subr.mxu0 %v13535_v49 }
0x2aff   :  { %12248 = vmatpush3.msra.mxu0 %v10365_v52 }
0x2b00   :  { %12249 = vmatprep.subr.mxu0 %v13535_v49 }
0x2b01   :  { %12250 = vmatpush3.msra.mxu0 %v10364_v32 }
0x2b02   :  { %12259 = vmatprep.subr.mxu0 %v13535_v49 }
0x2bb2   :  { %v9109_v19 = vpop.f32.mrf.mxu0 }
0x2bb3   :  { %v9110_v20 = vadd.f32 1e-05, %v9109_v19  ;;  %v10393_v19 = vld [vmem:[#allocation51] ss:$0 sm:$0xff] }
0x2bb4   :  { %v12215_v61 = vpop.f32.mrf.mxu0 }
0x2bb5   :  { %12456 = vrsqrt.f32 %v9110_v20 }
0x2bb6   :  { %12458 = vrsqrt.f32 %v8487_v45 }
0x2bc2   :  { %v12457_v43 = vpop.eup %12456 }
0x2bc3   :  { %v9117_v59 = vrot.slane %v12457_v43, %v14452_v63  ;;  %v12459_v54 = vpop.eup %12458 }
0x2bc4   :  { %v8494_v57 = vrot.slane %v12459_v54, %v14452_v63 }
0x2bc5   :  { %v9118_v0 = vmul.f32 %v9117_v59, %v9038_v10  ;;  %v9869_v10 = vld [vmem:[%s15172_s8 + $0x38] sm:$0xff] }
0x2bc6   :  { %v8495_v39 = vmul.f32 %v8494_v57, %v14927_v22  ;;  %v9862_v22 = vld [vmem:[%s15172_s8] sm:$0xff] }
0x2bc7   :  { %v9126_v23 = vmul.f32 %v10361_v60, %v9118_v0  ;;  %v9785_v0 = vld [vmem:[%s15173_s23] sm:$0x3] }
0x2bc8   :  { %v8503_v32 = vmul.f32 %v10349_v62, %v8495_v39 }
0x2bc9   :  { %v9134_v21 = vadd.f32 %v10362_v18, %v9126_v23  ;;  %v10396_v23 = vld [vmem:[#allocation66] ss:$0 sm:$0xff] }
0x2bca   :  { %v8511_v61 = vadd.f32 %v10350_v29, %v8503_v32 }
0x2bcb   :  { %v9135_v2 = vmax.f32 %v9134_v21, 0.0 }
0x2bcd   :  { %12233 = vmatmul.mubr.msk.f32.vlgmr.msra.gmra.mxu1 %vm2743_vm3, %v9135_v2  ;;  %12252 = vmatmul.mubr.msk.f32.vlgmr.msra.gmra.mxu0 %vm2743_vm3, %v9135_v2 }
0x2bce   :  { %12256 = vmatprep.mubr.msk.f32.mxu1 %vm13536_vm2, %v13535_v49  ;;  %12261 = vmatprep.mubr.msk.f32.mxu0 %vm13536_vm2, %v13535_v49 }
0x2c8d   :  { %v9213_v7 = vpop.f32.mrf.mxu1  ;;  %v9293_v8 = vpop.f32.mrf.mxu0 }
0x2c8e   :  { %12255 = vmatpush3.msk.msra.mxu1 %vm8337_vm7, %v9293_v8  ;;  %12260 = vmatpush3.msk.msra.mxu0 %vm8337_vm7, %v9213_v7 }
0x2c8f   :  { %v12234_v17 = vpop.f32.mrf.mxu1  ;;  %v12253_v27 = vpop.f32.mrf.mxu0  ;;  %12264 = vmatprep.subr.mxu1 %v13535_v49  ;;  %12257 = vmatmul.mubr.msk.f32.vlgmr.msra.gmra.mxu1 %vm8333_vm8, %v9298_v3 }
0x2c90   :  { %12265 = vmatpush3.msra.mxu1 %v10384_v12  ;;  %12262 = vmatmul.mubr.msk.f32.vlgmr.msra.gmra.mxu0 %vm8333_vm8, %v9217_v13 }
0x2c91   :  { %12266 = vmatprep.subr.mxu1 %v13535_v49  ;;  %12280 = vmatprep.mubr.msk.f32.mxu1 %vm13536_vm2, %v13535_v49 }
0x2c92   :  { %12267 = vmatpush3.msra.mxu1 %v10383_v28  ;;  %12283 = vmatprep.subr.mxu0 %v13535_v49 }
0x2c93   :  { %12268 = vmatprep.subr.mxu1 %v13535_v49  ;;  %12285 = vmatprep.mubr.msk.f32.mxu0 %vm13536_vm2, %v13535_v49 }
0x2c94   :  { %12269 = vmatpush3.msra.mxu1 %v10382_v31 }
0x2c95   :  { %12270 = vmatprep.subr.mxu1 %v13535_v49 }
0x2c96   :  { %12271 = vmatpush3.msra.mxu1 %v10381_v33 }
0x2c97   :  { %12272 = vmatprep.subr.mxu1 %v13535_v49 }
0x2c98   :  { %12273 = vmatpush3.msra.mxu1 %v10380_v34 }
0x2c99   :  { %12274 = vmatprep.subr.mxu1 %v13535_v49 }
0x2c9a   :  { %12275 = vmatpush3.msra.mxu1 %v10379_v35 }
0x2c9b   :  { %12276 = vmatprep.subr.mxu1 %v13535_v49 }
0x2c9c   :  { %12277 = vmatpush3.msra.mxu1 %v10378_v36 }
0x2c9d   :  { %12278 = vmatprep.subr.mxu1 %v13535_v49 }
0x2c9e   :  { %12279 = vmatpush3.msra.mxu1 %v10377_v37 }
0x2c9f   :  { %12281 = vmatmul.mubr.msk.f32.vlgmr.msra.gmra.mxu1 %vm2743_vm3, %v9135_v2  ;;  %12303 = vmatprep.subr.mxu1 %v13535_v49 }
0x2ca0   :  { %12319 = vmatprep.mubr.msk.f32.mxu1 %vm13536_vm2, %v13535_v49  ;;  %12304 = vmatpush3.msra.mxu1 %v9869_v10 }
0x2ca1   :  { %12305 = vmatprep.subr.mxu1 %v13535_v49 }
0x2ca2   :  { %12306 = vmatpush3.msra.mxu1 %v9868_v11 }
0x2ca3   :  { %12307 = vmatprep.subr.mxu1 %v13535_v49 }
0x2ca4   :  { %12308 = vmatpush3.msra.mxu1 %v9867_v9 }
0x2ca5   :  { %12309 = vmatprep.subr.mxu1 %v13535_v49 }
0x2ca6   :  { %12310 = vmatpush3.msra.mxu1 %v9866_v46 }
0x2ca7   :  { %12311 = vmatprep.subr.mxu1 %v13535_v49 }
0x2d4f   :  { %v9371_v38 = vpop.f32.mrf.mxu1 }
0x2d50   :  { %v9447_v26 = vpop.f32.mrf.mxu0 }
0x2d51   :  { %v12258_v40 = vpop.f32.mrf.mxu1  ;;  %v9448_v25 = vadd.f32 %v9447_v26, %v9371_v38 }
0x2d52   :  { %v12263_v41 = vpop.f32.mrf.mxu0 }
0x2d5f   :  { %v9526_v44 = vpop.f32.mrf.mxu1 }
0x2d60   :  { %12284 = vmatpush3.msk.msra.mxu0 %vm8337_vm7, %v9526_v44 }
0x2d61   :  { %v12282_v47 = vpop.f32.mrf.mxu1  ;;  %12286 = vmatmul.mubr.msk.f32.vlgmr.msra.gmra.mxu0 %vm8333_vm8, %v9531_v42  ;;  %12288 = vmatprep.subr.mxu0 %v13535_v49 }
0x2d62   :  { %12290 = vmatprep.mubr.msk.f32.mxu0 %vm13536_vm2, %v13535_v49 }
0x2e21   :  { %v9604_v51 = vpop.f32.mrf.mxu0 }
0x2e22   :  { %v9608_v15 = vadd.f32 %v9604_v51, %v9448_v25 }
0x2e23   :  { %v12287_v5 = vpop.f32.mrf.mxu0 }
0x2e24   :  { %12289 = vmatpush3.msk.msra.mxu0 %vm8337_vm7, %v9608_v15 }
0x2e25   :  { %12291 = vmatmul.mubr.msk.f32.vlgmr.msra.gmra.mxu0 %vm8333_vm8, %v13542_v53  ;;  %12293 = vmatprep.subr.mxu0 %v13535_v49 }
0x2e26   :  { %12295 = vmatprep.mubr.msk.f32.mxu0 %vm13536_vm2, %v13535_v49 }
0x2ee5   :  { %v9678_v16 = vpop.f32.mrf.mxu0 }
0x2ee6   :  { %v9685_v4 = vrot.slane %v9678_v16, %v14452_v63 }
0x2ee7   :  { %v12292_v24 = vpop.f32.mrf.mxu0 }
0x2ee8   :  { %v9686_v48 = vsub.f32 %v9608_v15, %v9685_v4 }
0x2eea   :  { %v9687_v50 = vmul.f32 %v9686_v48, %v9686_v48 }
0x2eec   :  { %12294 = vmatpush3.msk.msra.mxu0 %vm8337_vm7, %v9687_v50 }
0x2eed   :  { %12296 = vmatmul.mubr.msk.f32.vlgmr.msra.gmra.mxu0 %vm8333_vm8, %v13542_v53  ;;  %12298 = vmatprep.subr.mxu0 %v13535_v49  ;;  %v9865_v53 = vld [vmem:[%s15172_s8 + $0x18] sm:$0xff] }
0x2eee   :  { %12300 = vmatprep.mubr.msk.f32.mxu0 %vm13536_vm2, %v13535_v49  ;;  %12312 = vmatpush3.msra.mxu1 %v9865_v53 }
0x2eef   :  { %12313 = vmatprep.subr.mxu1 %v13535_v49 }
0x2ef0   :  { %12314 = vmatpush3.msra.mxu1 %v9864_v55 }
0x2ef1   :  { %12315 = vmatprep.subr.mxu1 %v13535_v49 }
0x2ef2   :  { %12316 = vmatpush3.msra.mxu1 %v9863_v1 }
0x2ef3   :  { %12317 = vmatprep.subr.mxu1 %v13535_v49 }
0x2ef4   :  { %12318 = vmatpush3.msra.mxu1 %v9862_v22 }
0x2fad   :  { %v9757_v14 = vpop.f32.mrf.mxu0 }
0x2fae   :  { %v9758_v56 = vadd.f32 1e-05, %v9757_v14 }
0x2faf   :  { %v12297_v6 = vpop.f32.mrf.mxu0 }
0x2fb0   :  { %12460 = vrsqrt.f32 %v9758_v56 }
0x2fbd   :  { %v12461_v58 = vpop.eup %12460 }
0x2fbe   :  { %v9765_v52 = vrot.slane %v12461_v58, %v14452_v63 }
0x2fc0   :  { %v9766_v49 = vmul.f32 %v9765_v52, %v9686_v48 }
0x2fc2   :  { %v9774_v20 = vmul.f32 %v10392_v30, %v9766_v49 }
0x2fc4   :  { %v9782_v43 = vadd.f32 %v10393_v19, %v9774_v20 }
0x2fc6   :  { %v9783_v59 = vadd.f32 %v9782_v43, %v8511_v61 }
0x2fc8   :  { %v9784_v60 = vmax.f32 %v9783_v59, 0.0 }
0x2fca   :  { %12299 = vmatpush3.msk.msra.mxu0 %vm8337_vm7, %v9784_v60 }
0x2fcb   :  { %12301 = vmatmul.mubr.msk.f32.vlgmr.msra.gmra.mxu0 %vm8333_vm8, %v9785_v0 }
0x308b   :  { %v9858_v63 = vpop.f32.mrf.mxu0 }
0x308c   :  { %12320 = vmatmul.mubr.msk.f32.vlgmr.msra.gmra.mxu1 %vm2743_vm3, %v9858_v63 }
0x308d   :  { %v12302_v18 = vpop.f32.mrf.mxu0 }
0x314c   :  { %v9946_v21 = vpop.f32.mrf.mxu1 }
0x314d   :  { %v9947_v2 = vadd.f32 %v10396_v23, %v9946_v21 }
0x314e   :  { %v12321_v3 = vpop.f32.mrf.mxu1 }
0x314f   :  { %9953 = vrot.lane.b32.xlu0 %v9947_v2, %s13543_s29  ;;  %9951 = vst.msk [vmem:[%s13822_s17] sm:$0x3] %vm9950_vm9, %v9947_v2 }
0x31c1   :  { %v9954_v7 = vpop.permute.xlu0 %9953 }
0x31c2   :  { %9956 = vst.msk [vmem:[%s13827_s21] sm:$0x3] %vm9950_vm9, %v9954_v7 }
0x31c3   :  { %9965 = vsyncpa [#allocation3], 1 }
0x31c4   :  { %9966 = vsyncpa [#allocation5], 1 }
0x31c5   :  { %9967 = vsyncpa [#allocation8], 1 }
0x31c6   :  { %9968 = vsyncpa [#allocation11], 1 }
0x31c7   :  { %9969 = vsyncpa [#allocation14], 1 }
0x31c8   :  { %9970 = vsyncpa [#allocation17], 1 }
0x31c9   :  { %9971 = vsyncpa [#allocation20], 1 }
0x31ca   :  { %9972 = vsyncpa [#allocation23], 1 }
0x31cb   :  { %9973 = vsyncpa [#allocation26], 1 }
0x31cc   :  { %9974 = vsyncpa [#allocation29], 1 }
0x31cd   :  { %9975 = vsyncpa [#allocation32], 1 }
0x31ce   :  { %9976 = vsyncpa [#allocation35], 1 }
0x31cf   :  { %9977 = vsyncpa [#allocation38], 1 }
0x31d0   :  { %9978 = vsyncpa [#allocation41], 1 }
0x31d1   :  { %9979 = vsyncpa [#allocation44], 1 }
0x31d2   :  { %9980 = vsyncpa [#allocation47], 1 }
0x31d3   :  { %9981 = vsyncpa [#allocation50], 1 }
0x31d4   :  { %9982 = vsyncpa [#allocation53], 1 }
0x31d5   :  { %9983 = vsyncpa [#allocation56], 1 }
0x31d6   :  { %9984 = vsyncpa [#allocation59], 1 }
0x31d7   :  { %9985 = vsyncpa [#allocation62], 1 }
0x31d8   :  { %9986 = vsyncpa [#allocation65], 1 }
0x31d9   :  { %9987 = vsyncpa [#allocation68], 1 }
0x31da   :  { %9988 = vsyncpa [#allocation71], 1 }

</bundles_post_ra>
